<compile_context>
chip_gen: v6e
topology: v6e:2x2x1
jax: 0.10.0
libtpu: 0.0.40
codegen_flags: <defaults>
</compile_context>

<pallas_src>
import functools

import jax
import jax.numpy as jnp
from jax import lax
from jax.experimental import pallas as pl
from jax.experimental.pallas import tpu as pltpu

# -------------------- configuration (small synthetic shapes) --------------------
CFG = dict(
    B=2,            # batch
    N=8,            # sequence length (tokens)
    motion_dim=16,  # raw motion feature dim
    embed_dim=32,   # encoder embed dim
    vocab_width=64, # quantizer width
    num_codebooks=2,
    vocab_size=16,
    vq_beta=0.25,
    mlp_ratio=2,
)

LANE = 128        # lane width: pad narrow outputs to 128 for unmasked stores
STATS_ROWS = 8    # one sublane tile for the stats slab


# -------------------- weight ordering for the fused kernel --------------------

def _attn_proj_names(prefix):
    return [f"{prefix}_{n}" for n in (
        "norm1_g", "norm1_b", "norm3_g", "norm3_b", "norm2_g", "norm2_b",
        "proj_w", "proj_b",
        "qkv_w", "q_bias", "v_bias", "attn_proj_w", "attn_proj_b",
        "fc1_w", "fc1_b", "fc2_w", "fc2_b")]


WEIGHT_ORDER = (
    ["enc_w", "enc_b"]
    + _attn_proj_names("qp")
    + ["cbT_bd", "cb_bd", "cb_sq"]
    + _attn_proj_names("pq")
    + ["dec_w", "dec_b"]
)


# ============================= in-kernel building blocks =============================

def _layernorm(x, g, b, eps=1e-5):
    """x: (N, D) f32; g/b: (1, D) f32."""
    mu = jnp.mean(x, axis=-1, keepdims=True)
    var = jnp.mean((x - mu) ** 2, axis=-1, keepdims=True)
    return (x - mu) * lax.rsqrt(var + eps) * g + b


def _linear(x, w_bf16, b_f32, act=None):
    """bf16 MXU operands, f32 accumulation; elementwise math stays f32."""
    y = jnp.dot(x.astype(jnp.bfloat16), w_bf16,
                preferred_element_type=jnp.float32) + b_f32
    if act == "gelu":
        # TODO(synk): timm Mlp uses exact-erf nn.GELU; tanh approximation used here.
        y = jax.nn.gelu(y, approximate=True)
    return y


def _attention(x, w, pfx, in_dim, out_dim, num_heads):
    """x: (N, in_dim) f32. Mirrors the torch Attention module (no XLA transposes)."""
    dim = in_dim if in_dim > out_dim else out_dim
    hd = dim // num_heads
    scale = hd ** -0.5

    qkv = jnp.dot(x.astype(jnp.bfloat16), w[pfx + "_qkv_w"][...],
                  preferred_element_type=jnp.float32)            # (N, 3*dim)
    q = qkv[:, 0:dim] + w[pfx + "_q_bias"][...]
    k = qkv[:, dim:2 * dim]                                       # zero k bias
    v = qkv[:, 2 * dim:3 * dim] + w[pfx + "_v_bias"][...]

    heads = []
    for h in range(num_heads):                                    # static unroll (H=2)
        sl = slice(h * hd, (h + 1) * hd)
        qh = q[:, sl].astype(jnp.bfloat16)
        kh = k[:, sl].astype(jnp.bfloat16)
        vh = v[:, sl].astype(jnp.bfloat16)
        # scores via contracted dot_general (no materialized k transpose)
        s = lax.dot_general(qh, kh, (((1,), (1,)), ((), ())),
                            preferred_element_type=jnp.float32) * scale   # (N, N)
        m = jnp.max(s, axis=-1, keepdims=True)
        p = jnp.exp(s - m)
        p = p / jnp.sum(p, axis=-1, keepdims=True)
        heads.append(jnp.dot(p.astype(jnp.bfloat16), vh,
                             preferred_element_type=jnp.float32))          # (N, hd)

    if in_dim > out_dim:
        if hd != out_dim:
            # TODO(synk): adaptive_avg_pool1d branch not exercised with chosen dims.
            raise NotImplementedError("adaptive_avg_pool1d path not implemented")
        o = heads[0]
        for oh in heads[1:]:
            o = o + oh
        o = o * (1.0 / num_heads)                                  # mean over heads
    else:
        o = jnp.concatenate(heads, axis=-1)                        # (N, dim)

    return _linear(o, w[pfx + "_attn_proj_w"][...], w[pfx + "_attn_proj_b"][...])


def _attn_projection(x, w, pfx, in_dim, out_dim, num_heads):
    a = _linear(_layernorm(x, w[pfx + "_norm3_g"][...], w[pfx + "_norm3_b"][...]),
                w[pfx + "_proj_w"][...], w[pfx + "_proj_b"][...])
    b = _attention(_layernorm(x, w[pfx + "_norm1_g"][...], w[pfx + "_norm1_b"][...]),
                   w, pfx, in_dim, out_dim, num_heads)
    x = a + b
    h = _layernorm(x, w[pfx + "_norm2_g"][...], w[pfx + "_norm2_b"][...])
    h = _linear(h, w[pfx + "_fc1_w"][...], w[pfx + "_fc1_b"][...], act="gelu")
    h = _linear(h, w[pfx + "_fc2_w"][...], w[pfx + "_fc2_b"][...])
    return x + h


def _vector_quantize(f, cbT_bd, cb_bd, cb_sq, num_codebooks, vocab_size):
    """f: (N, W) f32. Block-diagonal codebook -> all codebooks in one contraction.

    Returns (quant (N, W) f32, usage (1, C*V) f32, sse (1, 1) f32).
    """
    n = f.shape[0]
    cv = num_codebooks * vocab_size
    # per-codebook inner products in one matmul (block-diagonal transposed codebook)
    fe = jnp.dot(f, cbT_bd, preferred_element_type=jnp.float32)    # (N, C*V)
    # ||f_c||^2 is constant within each codebook's V columns -> irrelevant for argmin.
    score = cb_sq - 2.0 * fe                                        # (N, C*V)
    lane = lax.broadcasted_iota(jnp.int32, (n, cv), 1)

    onehot = jnp.zeros((n, cv), jnp.float32)
    for c in range(num_codebooks):                                  # static unroll (C=2)
        in_blk = (lane >= c * vocab_size) & (lane < (c + 1) * vocab_size)
        sc = jnp.where(in_blk, score, jnp.inf)
        mn = jnp.min(sc, axis=-1, keepdims=True)
        idx = jnp.min(jnp.where(sc <= mn, lane, cv), axis=-1, keepdims=True)  # first argmin
        onehot = onehot + (lane == idx).astype(jnp.float32)

    # gather both selected codewords in one matmul (block-diagonal codebook)
    quant = jnp.dot(onehot, cb_bd, preferred_element_type=jnp.float32)        # (N, W)
    usage = jnp.sum(onehot, axis=0, keepdims=True)                            # (1, C*V)
    resid = quant - f
    sse = jnp.sum(jnp.sum(resid * resid, axis=-1, keepdims=True),
                  axis=0, keepdims=True)                                      # (1, 1)
    return quant, usage, sse


# ============================= fused forward kernel =============================

def _vqvae_kernel(*refs, cfg):
    nw = len(WEIGHT_ORDER)
    motion_ref = refs[0]
    w = dict(zip(WEIGHT_ORDER, refs[1:1 + nw]))
    rec_ref, stats_ref = refs[1 + nw], refs[2 + nw]

    n_tok, md = motion_ref.shape[1], motion_ref.shape[2]
    x = motion_ref[...].reshape(n_tok, md).astype(jnp.float32)     # (N, motion_dim)

    # TODO(synk): WrapedMotionEncoder source not provided; stand-in = single linear.
    feats = _linear(x, w["enc_w"][...], w["enc_b"][...])           # (N, embed_dim)

    feats = _attn_projection(feats, w, "qp",
                             cfg["embed_dim"], cfg["vocab_width"],
                             cfg["num_codebooks"])                  # (N, vocab_width)

    quant, usage, sse = _vector_quantize(
        feats, w["cbT_bd"][...], w["cb_bd"][...], w["cb_sq"][...],
        cfg["num_codebooks"], cfg["vocab_size"])

    feats = _attn_projection(quant, w, "pq",
                             cfg["vocab_width"], cfg["embed_dim"],
                             cfg["num_codebooks"])                  # (N, embed_dim)

    # TODO(synk): WrapedMotionDecoder source not provided; stand-in = single linear
    # (decoder weights zero-padded to 128 lanes so this store is lane-dense).
    rec = _linear(feats, w["dec_w"][...], w["dec_b"][...])          # (N, 128)
    rec_ref[...] = rec.reshape((1,) + rec.shape)

    # lane-dense stats slab: row 0 = per-(codebook,code) usage counts, row 1 lane 0 = SSE
    cv = cfg["num_codebooks"] * cfg["vocab_size"]
    row0 = jnp.concatenate([usage, jnp.zeros((1, LANE - cv), jnp.float32)], axis=1)
    lane0 = lax.broadcasted_iota(jnp.int32, (1, LANE), 1)
    row1 = jnp.where(lane0 == 0, sse, 0.0)
    rest = jnp.zeros((STATS_ROWS - 2, LANE), jnp.float32)
    stats = jnp.concatenate([row0, row1, rest], axis=0)             # (8, 128)
    stats_ref[...] = stats.reshape((1,) + stats.shape)


# ============================= wrapper (single pallas_call) =============================

def vqvae_forward(motion, prepared):
    B, N, md = motion.shape
    C, V, W = CFG["num_codebooks"], CFG["vocab_size"], CFG["vocab_width"]

    weights = [prepared[name] for name in WEIGHT_ORDER]
    weight_specs = [pl.BlockSpec(arr.shape, lambda b: (0, 0)) for arr in weights]

    rec_pad, stats = pl.pallas_call(
        functools.partial(_vqvae_kernel, cfg=CFG),
        out_shape=(
            jax.ShapeDtypeStruct((B, N, LANE), jnp.float32),
            jax.ShapeDtypeStruct((B, STATS_ROWS, LANE), jnp.float32),
        ),
        grid=(B,),
        in_specs=[pl.BlockSpec((1, N, md), lambda b: (b, 0, 0))] + weight_specs,
        out_specs=(
            pl.BlockSpec((1, N, LANE), lambda b: (b, 0, 0)),
            pl.BlockSpec((1, STATS_ROWS, LANE), lambda b: (b, 0, 0)),
        ),
        compiler_params=pltpu.CompilerParams(
            dimension_semantics=("parallel",),   # v7x: shard batch across TensorCores
        ),
    )(motion.astype(jnp.float32), *weights)

    rec_motion = rec_pad[..., :md]                                  # slice off lane padding
    usages = jnp.sum(stats[:, 0, :C * V], axis=0).reshape(C, V)     # per-code usage counts
    sse = jnp.sum(stats[:, 1, 0])

    # TODO(synk): VectorQuantizerM source not provided; standard VQ loss used
    # (codebook + beta*commitment; forward value = (1+beta)*mse averaged over codebooks).
    vq_loss = (1.0 + CFG["vq_beta"]) * sse / (B * N * W)
    entropy_loss = jnp.float32(0.0)  # TODO(synk): args.le <= 0 assumed -> entropy loss off.
    return rec_motion, vq_loss, entropy_loss, usages


# ============================= parameter init & preprocessing =============================

def _winit(key, shape, scale=0.02):
    return scale * jax.random.normal(key, shape, dtype=jnp.float32)


def init_attn_projection(key, in_dim, out_dim, num_heads, mlp_ratio=2):
    dim = in_dim if in_dim > out_dim else out_dim
    hidden = int(out_dim * mlp_ratio)
    k = jax.random.split(key, 5)
    return {
        "norm1_g": jnp.ones((in_dim,), jnp.float32), "norm1_b": jnp.zeros((in_dim,), jnp.float32),
        "norm3_g": jnp.ones((in_dim,), jnp.float32), "norm3_b": jnp.zeros((in_dim,), jnp.float32),
        "norm2_g": jnp.ones((out_dim,), jnp.float32), "norm2_b": jnp.zeros((out_dim,), jnp.float32),
        "proj_w": _winit(k[0], (in_dim, out_dim)), "proj_b": jnp.zeros((out_dim,), jnp.float32),
        "attn": {
            "qkv_w": _winit(k[1], (in_dim, 3 * dim)),
            "q_bias": jnp.zeros((dim,), jnp.float32),
            "v_bias": jnp.zeros((dim,), jnp.float32),
            "proj_w": _winit(k[2], (out_dim, out_dim)),
            "proj_b": jnp.zeros((out_dim,), jnp.float32),
        },
        "mlp_fc1_w": _winit(k[3], (out_dim, hidden)), "mlp_fc1_b": jnp.zeros((hidden,), jnp.float32),
        "mlp_fc2_w": _winit(k[4], (hidden, out_dim)), "mlp_fc2_b": jnp.zeros((out_dim,), jnp.float32),
    }


def prepare_params(params):
    """One-time preprocessing (outside jit): 2-D reshapes, bf16 matmul weights,
    block-diagonal codebook, lane-padded decoder weights."""
    md, W = CFG["motion_dim"], CFG["vocab_width"]
    C, V = CFG["num_codebooks"], CFG["vocab_size"]
    d = W // C
    assert W % C == 0
    # in>out attention path requires head_dim == out_dim (no adaptive pool implemented)
    assert W // C == CFG["embed_dim"]

    def w2(x):    # matmul weight -> bf16 (halves DMA bytes, 2x MXU rate)
        return x.astype(jnp.bfloat16)

    def row(x):   # bias / norm param -> (1, D) f32
        return x.reshape(1, -1).astype(jnp.float32)

    out = {"enc_w": w2(params["enc_w"]), "enc_b": row(params["enc_b"])}

    def add_attn_proj(prefix, p):
        out[f"{prefix}_norm1_g"] = row(p["norm1_g"]); out[f"{prefix}_norm1_b"] = row(p["norm1_b"])
        out[f"{prefix}_norm3_g"] = row(p["norm3_g"]); out[f"{prefix}_norm3_b"] = row(p["norm3_b"])
        out[f"{prefix}_norm2_g"] = row(p["norm2_g"]); out[f"{prefix}_norm2_b"] = row(p["norm2_b"])
        out[f"{prefix}_proj_w"] = w2(p["proj_w"]); out[f"{prefix}_proj_b"] = row(p["proj_b"])
        out[f"{prefix}_qkv_w"] = w2(p["attn"]["qkv_w"])
        out[f"{prefix}_q_bias"] = row(p["attn"]["q_bias"])
        out[f"{prefix}_v_bias"] = row(p["attn"]["v_bias"])
        out[f"{prefix}_attn_proj_w"] = w2(p["attn"]["proj_w"])
        out[f"{prefix}_attn_proj_b"] = row(p["attn"]["proj_b"])
        out[f"{prefix}_fc1_w"] = w2(p["mlp_fc1_w"]); out[f"{prefix}_fc1_b"] = row(p["mlp_fc1_b"])
        out[f"{prefix}_fc2_w"] = w2(p["mlp_fc2_w"]); out[f"{prefix}_fc2_b"] = row(p["mlp_fc2_b"])

    add_attn_proj("qp", params["quant_proj"])
    add_attn_proj("pq", params["post_quant_proj"])

    # Block-diagonal codebook: merges the per-codebook loop into single contractions.
    cb = params["codebook"].astype(jnp.float32)                     # (C, V, d)
    cbT_bd = jnp.zeros((W, C * V), jnp.float32)
    cb_bd = jnp.zeros((C * V, W), jnp.float32)
    for c in range(C):
        cbT_bd = cbT_bd.at[c * d:(c + 1) * d, c * V:(c + 1) * V].set(cb[c].T)
        cb_bd = cb_bd.at[c * V:(c + 1) * V, c * d:(c + 1) * d].set(cb[c])
    out["cbT_bd"] = cbT_bd                                          # (W, C*V) f32
    out["cb_bd"] = cb_bd                                            # (C*V, W) f32
    out["cb_sq"] = jnp.sum(cb * cb, axis=-1).reshape(1, C * V)      # (1, C*V) f32

    # Decoder weights zero-padded to 128 lanes -> lane-dense reconstruction store.
    dec_w = params["dec_w"].astype(jnp.float32)                     # (embed_dim, motion_dim)
    dec_b = params["dec_b"].astype(jnp.float32)                     # (motion_dim,)
    out["dec_w"] = w2(jnp.pad(dec_w, ((0, 0), (0, LANE - md))))
    out["dec_b"] = jnp.pad(dec_b, (0, LANE - md)).reshape(1, LANE)
    return out


if __name__ == "__main__":
    key = jax.random.PRNGKey(0)
    k = jax.random.split(key, 8)
    d_code = CFG["vocab_width"] // CFG["num_codebooks"]
    params = {
        "enc_w": _winit(k[0], (CFG["motion_dim"], CFG["embed_dim"])),
        "enc_b": jnp.zeros((CFG["embed_dim"],), jnp.float32),
        "dec_w": _winit(k[1], (CFG["embed_dim"], CFG["motion_dim"])),
        "dec_b": jnp.zeros((CFG["motion_dim"],), jnp.float32),
        "quant_proj": init_attn_projection(k[2], CFG["embed_dim"], CFG["vocab_width"],
                                           CFG["num_codebooks"], CFG["mlp_ratio"]),
        "post_quant_proj": init_attn_projection(k[3], CFG["vocab_width"], CFG["embed_dim"],
                                                CFG["num_codebooks"], CFG["mlp_ratio"]),
        "codebook": _winit(k[4], (CFG["num_codebooks"], CFG["vocab_size"], d_code), scale=1.0),
    }
    prepared = prepare_params(params)   # one-time weight preprocessing (outside jit)

    motion = jax.random.normal(k[5], (CFG["B"], CFG["N"], CFG["motion_dim"]), jnp.float32)

    fwd = jax.jit(vqvae_forward)
    rec_motion, vq_loss, entropy_loss, usages = fwd(motion, prepared)
    jax.block_until_ready((rec_motion, vq_loss, entropy_loss, usages))

    assert rec_motion.shape == (CFG["B"], CFG["N"], CFG["motion_dim"])
    assert usages.shape == (CFG["num_codebooks"], CFG["vocab_size"])
    assert bool(jnp.all(jnp.isfinite(rec_motion)))
    assert bool(jnp.isfinite(vq_loss))
    print("KERNEL_OK")
</pallas_src>

<mosaic_0001>
module attributes {stable_mosaic.version = 11 : i64} {
  func.func @_vqvae_kernel(%arg0: i32, %arg1: memref<1x8x16xf32, #tpu.memory_space<vmem>>, %arg2: memref<16x32xbf16, #tpu.memory_space<vmem>>, %arg3: memref<1x32xf32, #tpu.memory_space<vmem>>, %arg4: memref<1x32xf32, #tpu.memory_space<vmem>>, %arg5: memref<1x32xf32, #tpu.memory_space<vmem>>, %arg6: memref<1x32xf32, #tpu.memory_space<vmem>>, %arg7: memref<1x32xf32, #tpu.memory_space<vmem>>, %arg8: memref<1x64xf32, #tpu.memory_space<vmem>>, %arg9: memref<1x64xf32, #tpu.memory_space<vmem>>, %arg10: memref<32x64xbf16, #tpu.memory_space<vmem>>, %arg11: memref<1x64xf32, #tpu.memory_space<vmem>>, %arg12: memref<32x192xbf16, #tpu.memory_space<vmem>>, %arg13: memref<1x64xf32, #tpu.memory_space<vmem>>, %arg14: memref<1x64xf32, #tpu.memory_space<vmem>>, %arg15: memref<64x64xbf16, #tpu.memory_space<vmem>>, %arg16: memref<1x64xf32, #tpu.memory_space<vmem>>, %arg17: memref<64x128xbf16, #tpu.memory_space<vmem>>, %arg18: memref<1x128xf32, #tpu.memory_space<vmem>>, %arg19: memref<128x64xbf16, #tpu.memory_space<vmem>>, %arg20: memref<1x64xf32, #tpu.memory_space<vmem>>, %arg21: memref<64x32xf32, #tpu.memory_space<vmem>>, %arg22: memref<32x64xf32, #tpu.memory_space<vmem>>, %arg23: memref<1x32xf32, #tpu.memory_space<vmem>>, %arg24: memref<1x64xf32, #tpu.memory_space<vmem>>, %arg25: memref<1x64xf32, #tpu.memory_space<vmem>>, %arg26: memref<1x64xf32, #tpu.memory_space<vmem>>, %arg27: memref<1x64xf32, #tpu.memory_space<vmem>>, %arg28: memref<1x32xf32, #tpu.memory_space<vmem>>, %arg29: memref<1x32xf32, #tpu.memory_space<vmem>>, %arg30: memref<64x32xbf16, #tpu.memory_space<vmem>>, %arg31: memref<1x32xf32, #tpu.memory_space<vmem>>, %arg32: memref<64x192xbf16, #tpu.memory_space<vmem>>, %arg33: memref<1x64xf32, #tpu.memory_space<vmem>>, %arg34: memref<1x64xf32, #tpu.memory_space<vmem>>, %arg35: memref<32x32xbf16, #tpu.memory_space<vmem>>, %arg36: memref<1x32xf32, #tpu.memory_space<vmem>>, %arg37: memref<32x64xbf16, #tpu.memory_space<vmem>>, %arg38: memref<1x64xf32, #tpu.memory_space<vmem>>, %arg39: memref<64x32xbf16, #tpu.memory_space<vmem>>, %arg40: memref<1x32xf32, #tpu.memory_space<vmem>>, %arg41: memref<32x128xbf16, #tpu.memory_space<vmem>>, %arg42: memref<1x128xf32, #tpu.memory_space<vmem>>, %arg43: memref<1x8x128xf32, #tpu.memory_space<vmem>>, %arg44: memref<1x8x128xf32, #tpu.memory_space<vmem>>) attributes {dimension_semantics = [#tpu.dimension_semantics<parallel>], iteration_bounds = array<i64: 2>, scalar_prefetch = 0 : i64, scratch_operands = 0 : i64, tpu.core_type = #tpu.core_type<tc>, window_params = [{transform_indices = @transform_0, window_bounds = array<i64: 1, 8, 16>}, {pipeline_mode = #tpu.pipeline_mode<synchronous>, transform_indices = @transform_1, window_bounds = array<i64: 16, 32>}, {pipeline_mode = #tpu.pipeline_mode<synchronous>, transform_indices = @transform_2, window_bounds = array<i64: 1, 32>}, {pipeline_mode = #tpu.pipeline_mode<synchronous>, transform_indices = @transform_3, window_bounds = array<i64: 1, 32>}, {pipeline_mode = #tpu.pipeline_mode<synchronous>, transform_indices = @transform_4, window_bounds = array<i64: 1, 32>}, {pipeline_mode = #tpu.pipeline_mode<synchronous>, transform_indices = @transform_5, window_bounds = array<i64: 1, 32>}, {pipeline_mode = #tpu.pipeline_mode<synchronous>, transform_indices = @transform_6, window_bounds = array<i64: 1, 32>}, {pipeline_mode = #tpu.pipeline_mode<synchronous>, transform_indices = @transform_7, window_bounds = array<i64: 1, 64>}, {pipeline_mode = #tpu.pipeline_mode<synchronous>, transform_indices = @transform_8, window_bounds = array<i64: 1, 64>}, {pipeline_mode = #tpu.pipeline_mode<synchronous>, transform_indices = @transform_9, window_bounds = array<i64: 32, 64>}, {pipeline_mode = #tpu.pipeline_mode<synchronous>, transform_indices = @transform_10, window_bounds = array<i64: 1, 64>}, {pipeline_mode = #tpu.pipeline_mode<synchronous>, transform_indices = @transform_11, window_bounds = array<i64: 32, 192>}, {pipeline_mode = #tpu.pipeline_mode<synchronous>, transform_indices = @transform_12, window_bounds = array<i64: 1, 64>}, {pipeline_mode = #tpu.pipeline_mode<synchronous>, transform_indices = @transform_13, window_bounds = array<i64: 1, 64>}, {pipeline_mode = #tpu.pipeline_mode<synchronous>, transform_indices = @transform_14, window_bounds = array<i64: 64, 64>}, {pipeline_mode = #tpu.pipeline_mode<synchronous>, transform_indices = @transform_15, window_bounds = array<i64: 1, 64>}, {pipeline_mode = #tpu.pipeline_mode<synchronous>, transform_indices = @transform_16, window_bounds = array<i64: 64, 128>}, {pipeline_mode = #tpu.pipeline_mode<synchronous>, transform_indices = @transform_17, window_bounds = array<i64: 1, 128>}, {pipeline_mode = #tpu.pipeline_mode<synchronous>, transform_indices = @transform_18, window_bounds = array<i64: 128, 64>}, {pipeline_mode = #tpu.pipeline_mode<synchronous>, transform_indices = @transform_19, window_bounds = array<i64: 1, 64>}, {pipeline_mode = #tpu.pipeline_mode<synchronous>, transform_indices = @transform_20, window_bounds = array<i64: 64, 32>}, {pipeline_mode = #tpu.pipeline_mode<synchronous>, transform_indices = @transform_21, window_bounds = array<i64: 32, 64>}, {pipeline_mode = #tpu.pipeline_mode<synchronous>, transform_indices = @transform_22, window_bounds = array<i64: 1, 32>}, {pipeline_mode = #tpu.pipeline_mode<synchronous>, transform_indices = @transform_23, window_bounds = array<i64: 1, 64>}, {pipeline_mode = #tpu.pipeline_mode<synchronous>, transform_indices = @transform_24, window_bounds = array<i64: 1, 64>}, {pipeline_mode = #tpu.pipeline_mode<synchronous>, transform_indices = @transform_25, window_bounds = array<i64: 1, 64>}, {pipeline_mode = #tpu.pipeline_mode<synchronous>, transform_indices = @transform_26, window_bounds = array<i64: 1, 64>}, {pipeline_mode = #tpu.pipeline_mode<synchronous>, transform_indices = @transform_27, window_bounds = array<i64: 1, 32>}, {pipeline_mode = #tpu.pipeline_mode<synchronous>, transform_indices = @transform_28, window_bounds = array<i64: 1, 32>}, {pipeline_mode = #tpu.pipeline_mode<synchronous>, transform_indices = @transform_29, window_bounds = array<i64: 64, 32>}, {pipeline_mode = #tpu.pipeline_mode<synchronous>, transform_indices = @transform_30, window_bounds = array<i64: 1, 32>}, {pipeline_mode = #tpu.pipeline_mode<synchronous>, transform_indices = @transform_31, window_bounds = array<i64: 64, 192>}, {pipeline_mode = #tpu.pipeline_mode<synchronous>, transform_indices = @transform_32, window_bounds = array<i64: 1, 64>}, {pipeline_mode = #tpu.pipeline_mode<synchronous>, transform_indices = @transform_33, window_bounds = array<i64: 1, 64>}, {pipeline_mode = #tpu.pipeline_mode<synchronous>, transform_indices = @transform_34, window_bounds = array<i64: 32, 32>}, {pipeline_mode = #tpu.pipeline_mode<synchronous>, transform_indices = @transform_35, window_bounds = array<i64: 1, 32>}, {pipeline_mode = #tpu.pipeline_mode<synchronous>, transform_indices = @transform_36, window_bounds = array<i64: 32, 64>}, {pipeline_mode = #tpu.pipeline_mode<synchronous>, transform_indices = @transform_37, window_bounds = array<i64: 1, 64>}, {pipeline_mode = #tpu.pipeline_mode<synchronous>, transform_indices = @transform_38, window_bounds = array<i64: 64, 32>}, {pipeline_mode = #tpu.pipeline_mode<synchronous>, transform_indices = @transform_39, window_bounds = array<i64: 1, 32>}, {pipeline_mode = #tpu.pipeline_mode<synchronous>, transform_indices = @transform_40, window_bounds = array<i64: 32, 128>}, {pipeline_mode = #tpu.pipeline_mode<synchronous>, transform_indices = @transform_41, window_bounds = array<i64: 1, 128>}, {transform_indices = @transform_42, window_bounds = array<i64: 1, 8, 128>}, {transform_indices = @transform_43, window_bounds = array<i64: 1, 8, 128>}]} {
    %c0 = arith.constant 0 : index
    %c0_0 = arith.constant 0 : index
    %c0_1 = arith.constant 0 : index
    %0 = vector.load %arg1[%c0, %c0_0, %c0_1] : memref<1x8x16xf32, #tpu.memory_space<vmem>>, vector<1x8x16xf32>
    %1 = vector.shape_cast %0 : vector<1x8x16xf32> to vector<8x16xf32>
    %c0_2 = arith.constant 0 : index
    %c0_3 = arith.constant 0 : index
    %2 = vector.load %arg2[%c0_2, %c0_3] : memref<16x32xbf16, #tpu.memory_space<vmem>>, vector<16x32xbf16>
    %c0_4 = arith.constant 0 : index
    %c0_5 = arith.constant 0 : index
    %3 = vector.load %arg3[%c0_4, %c0_5] : memref<1x32xf32, #tpu.memory_space<vmem>>, vector<1x32xf32>
    %4 = arith.truncf %1 : vector<8x16xf32> to vector<8x16xbf16>
    %cst = arith.constant dense<0.000000e+00> : vector<8x32xf32>
    %5 = tpu.matmul %4, %2, %cst {dimension_numbers = #tpu.dot_dimension_numbers<[1], [0], [0], [1], [0, 0, 1, 1], [], []>} : vector<8x16xbf16>, vector<16x32xbf16>, vector<8x32xf32> -> vector<8x32xf32>
    %6 = vector.broadcast %3 : vector<1x32xf32> to vector<8x32xf32>
    %7 = arith.addf %5, %6 : vector<8x32xf32>
    %c0_6 = arith.constant 0 : index
    %c0_7 = arith.constant 0 : index
    %8 = vector.load %arg6[%c0_6, %c0_7] : memref<1x32xf32, #tpu.memory_space<vmem>>, vector<1x32xf32>
    %c0_8 = arith.constant 0 : index
    %c0_9 = arith.constant 0 : index
    %9 = vector.load %arg7[%c0_8, %c0_9] : memref<1x32xf32, #tpu.memory_space<vmem>>, vector<1x32xf32>
    %cst_10 = arith.constant dense<0.000000e+00> : vector<8xf32>
    %10 = vector.multi_reduction <add>, %7, %cst_10 [1] : vector<8x32xf32> to vector<8xf32>
    %11 = vector.shape_cast %10 : vector<8xf32> to vector<8x1xf32>
    %cst_11 = arith.constant 3.200000e+01 : f32
    %12 = vector.broadcast %cst_11 : f32 to vector<8x1xf32>
    %13 = arith.divf %11, %12 : vector<8x1xf32>
    %14 = vector.broadcast %13 : vector<8x1xf32> to vector<8x32xf32>
    %15 = arith.subf %7, %14 : vector<8x32xf32>
    %16 = arith.mulf %15, %15 : vector<8x32xf32>
    %cst_12 = arith.constant dense<0.000000e+00> : vector<8xf32>
    %17 = vector.multi_reduction <add>, %16, %cst_12 [1] : vector<8x32xf32> to vector<8xf32>
    %18 = vector.shape_cast %17 : vector<8xf32> to vector<8x1xf32>
    %cst_13 = arith.constant 3.200000e+01 : f32
    %19 = vector.broadcast %cst_13 : f32 to vector<8x1xf32>
    %20 = arith.divf %18, %19 : vector<8x1xf32>
    %21 = vector.broadcast %13 : vector<8x1xf32> to vector<8x32xf32>
    %22 = arith.subf %7, %21 : vector<8x32xf32>
    %cst_14 = arith.constant 9.99999974E-6 : f32
    %23 = vector.broadcast %cst_14 : f32 to vector<8x1xf32>
    %24 = arith.addf %20, %23 : vector<8x1xf32>
    %25 = math.rsqrt %24 : vector<8x1xf32>
    %26 = vector.broadcast %25 : vector<8x1xf32> to vector<8x32xf32>
    %27 = arith.mulf %22, %26 : vector<8x32xf32>
    %28 = vector.broadcast %8 : vector<1x32xf32> to vector<8x32xf32>
    %29 = arith.mulf %27, %28 : vector<8x32xf32>
    %30 = vector.broadcast %9 : vector<1x32xf32> to vector<8x32xf32>
    %31 = arith.addf %29, %30 : vector<8x32xf32>
    %c0_15 = arith.constant 0 : index
    %c0_16 = arith.constant 0 : index
    %32 = vector.load %arg10[%c0_15, %c0_16] : memref<32x64xbf16, #tpu.memory_space<vmem>>, vector<32x64xbf16>
    %c0_17 = arith.constant 0 : index
    %c0_18 = arith.constant 0 : index
    %33 = vector.load %arg11[%c0_17, %c0_18] : memref<1x64xf32, #tpu.memory_space<vmem>>, vector<1x64xf32>
    %34 = arith.truncf %31 : vector<8x32xf32> to vector<8x32xbf16>
    %cst_19 = arith.constant dense<0.000000e+00> : vector<8x64xf32>
    %35 = tpu.matmul %34, %32, %cst_19 {dimension_numbers = #tpu.dot_dimension_numbers<[1], [0], [0], [1], [0, 0, 1, 1], [], []>} : vector<8x32xbf16>, vector<32x64xbf16>, vector<8x64xf32> -> vector<8x64xf32>
    %36 = vector.broadcast %33 : vector<1x64xf32> to vector<8x64xf32>
    %37 = arith.addf %35, %36 : vector<8x64xf32>
    %c0_20 = arith.constant 0 : index
    %c0_21 = arith.constant 0 : index
    %38 = vector.load %arg4[%c0_20, %c0_21] : memref<1x32xf32, #tpu.memory_space<vmem>>, vector<1x32xf32>
    %c0_22 = arith.constant 0 : index
    %c0_23 = arith.constant 0 : index
    %39 = vector.load %arg5[%c0_22, %c0_23] : memref<1x32xf32, #tpu.memory_space<vmem>>, vector<1x32xf32>
    %cst_24 = arith.constant dense<0.000000e+00> : vector<8xf32>
    %40 = vector.multi_reduction <add>, %7, %cst_24 [1] : vector<8x32xf32> to vector<8xf32>
    %41 = vector.shape_cast %40 : vector<8xf32> to vector<8x1xf32>
    %cst_25 = arith.constant 3.200000e+01 : f32
    %42 = vector.broadcast %cst_25 : f32 to vector<8x1xf32>
    %43 = arith.divf %41, %42 : vector<8x1xf32>
    %44 = vector.broadcast %43 : vector<8x1xf32> to vector<8x32xf32>
    %45 = arith.subf %7, %44 : vector<8x32xf32>
    %46 = arith.mulf %45, %45 : vector<8x32xf32>
    %cst_26 = arith.constant dense<0.000000e+00> : vector<8xf32>
    %47 = vector.multi_reduction <add>, %46, %cst_26 [1] : vector<8x32xf32> to vector<8xf32>
    %48 = vector.shape_cast %47 : vector<8xf32> to vector<8x1xf32>
    %cst_27 = arith.constant 3.200000e+01 : f32
    %49 = vector.broadcast %cst_27 : f32 to vector<8x1xf32>
    %50 = arith.divf %48, %49 : vector<8x1xf32>
    %51 = vector.broadcast %43 : vector<8x1xf32> to vector<8x32xf32>
    %52 = arith.subf %7, %51 : vector<8x32xf32>
    %cst_28 = arith.constant 9.99999974E-6 : f32
    %53 = vector.broadcast %cst_28 : f32 to vector<8x1xf32>
    %54 = arith.addf %50, %53 : vector<8x1xf32>
    %55 = math.rsqrt %54 : vector<8x1xf32>
    %56 = vector.broadcast %55 : vector<8x1xf32> to vector<8x32xf32>
    %57 = arith.mulf %52, %56 : vector<8x32xf32>
    %58 = vector.broadcast %38 : vector<1x32xf32> to vector<8x32xf32>
    %59 = arith.mulf %57, %58 : vector<8x32xf32>
    %60 = vector.broadcast %39 : vector<1x32xf32> to vector<8x32xf32>
    %61 = arith.addf %59, %60 : vector<8x32xf32>
    %62 = arith.truncf %61 : vector<8x32xf32> to vector<8x32xbf16>
    %c0_29 = arith.constant 0 : index
    %c0_30 = arith.constant 0 : index
    %63 = vector.load %arg12[%c0_29, %c0_30] : memref<32x192xbf16, #tpu.memory_space<vmem>>, vector<32x192xbf16>
    %cst_31 = arith.constant dense<0.000000e+00> : vector<8x192xf32>
    %64 = tpu.matmul %62, %63, %cst_31 {dimension_numbers = #tpu.dot_dimension_numbers<[1], [0], [0], [1], [0, 0, 1, 1], [], []>} : vector<8x32xbf16>, vector<32x192xbf16>, vector<8x192xf32> -> vector<8x192xf32>
    %65 = vector.extract_strided_slice %64 {offsets = [0, 0], sizes = [8, 64], strides = [1, 1]} : vector<8x192xf32> to vector<8x64xf32>
    %c0_32 = arith.constant 0 : index
    %c0_33 = arith.constant 0 : index
    %66 = vector.load %arg13[%c0_32, %c0_33] : memref<1x64xf32, #tpu.memory_space<vmem>>, vector<1x64xf32>
    %67 = vector.broadcast %66 : vector<1x64xf32> to vector<8x64xf32>
    %68 = arith.addf %65, %67 : vector<8x64xf32>
    %69 = vector.extract_strided_slice %64 {offsets = [0, 64], sizes = [8, 64], strides = [1, 1]} : vector<8x192xf32> to vector<8x64xf32>
    %70 = vector.extract_strided_slice %64 {offsets = [0, 128], sizes = [8, 64], strides = [1, 1]} : vector<8x192xf32> to vector<8x64xf32>
    %c0_34 = arith.constant 0 : index
    %c0_35 = arith.constant 0 : index
    %71 = vector.load %arg14[%c0_34, %c0_35] : memref<1x64xf32, #tpu.memory_space<vmem>>, vector<1x64xf32>
    %72 = vector.broadcast %71 : vector<1x64xf32> to vector<8x64xf32>
    %73 = arith.addf %70, %72 : vector<8x64xf32>
    %74 = vector.extract_strided_slice %68 {offsets = [0, 0], sizes = [8, 32], strides = [1, 1]} : vector<8x64xf32> to vector<8x32xf32>
    %75 = arith.truncf %74 : vector<8x32xf32> to vector<8x32xbf16>
    %76 = vector.extract_strided_slice %69 {offsets = [0, 0], sizes = [8, 32], strides = [1, 1]} : vector<8x64xf32> to vector<8x32xf32>
    %77 = arith.truncf %76 : vector<8x32xf32> to vector<8x32xbf16>
    %78 = vector.extract_strided_slice %73 {offsets = [0, 0], sizes = [8, 32], strides = [1, 1]} : vector<8x64xf32> to vector<8x32xf32>
    %79 = arith.truncf %78 : vector<8x32xf32> to vector<8x32xbf16>
    %cst_36 = arith.constant dense<0.000000e+00> : vector<8x8xf32>
    %80 = tpu.matmul %75, %77, %cst_36 {dimension_numbers = #tpu.dot_dimension_numbers<[1], [1], [0], [0], [0, 0, 1, 0], [], []>} : vector<8x32xbf16>, vector<8x32xbf16>, vector<8x8xf32> -> vector<8x8xf32>
    %cst_37 = arith.constant 0.176776692 : f32
    %81 = vector.broadcast %cst_37 : f32 to vector<8x8xf32>
    %82 = arith.mulf %80, %81 : vector<8x8xf32>
    %cst_38 = arith.constant dense<0xFF800000> : vector<8xf32>
    %83 = vector.multi_reduction <maximumf>, %82, %cst_38 [1] : vector<8x8xf32> to vector<8xf32>
    %84 = vector.shape_cast %83 : vector<8xf32> to vector<8x1xf32>
    %85 = vector.broadcast %84 : vector<8x1xf32> to vector<8x8xf32>
    %86 = arith.subf %82, %85 : vector<8x8xf32>
    %87 = math.exp %86 : vector<8x8xf32>
    %cst_39 = arith.constant dense<0.000000e+00> : vector<8xf32>
    %88 = vector.multi_reduction <add>, %87, %cst_39 [1] : vector<8x8xf32> to vector<8xf32>
    %89 = vector.shape_cast %88 : vector<8xf32> to vector<8x1xf32>
    %90 = vector.broadcast %89 : vector<8x1xf32> to vector<8x8xf32>
    %91 = arith.divf %87, %90 : vector<8x8xf32>
    %92 = arith.truncf %91 : vector<8x8xf32> to vector<8x8xbf16>
    %cst_40 = arith.constant dense<0.000000e+00> : vector<8x32xf32>
    %93 = tpu.matmul %92, %79, %cst_40 {dimension_numbers = #tpu.dot_dimension_numbers<[1], [0], [0], [1], [0, 0, 1, 1], [], []>} : vector<8x8xbf16>, vector<8x32xbf16>, vector<8x32xf32> -> vector<8x32xf32>
    %94 = vector.extract_strided_slice %68 {offsets = [0, 32], sizes = [8, 32], strides = [1, 1]} : vector<8x64xf32> to vector<8x32xf32>
    %95 = arith.truncf %94 : vector<8x32xf32> to vector<8x32xbf16>
    %96 = vector.extract_strided_slice %69 {offsets = [0, 32], sizes = [8, 32], strides = [1, 1]} : vector<8x64xf32> to vector<8x32xf32>
    %97 = arith.truncf %96 : vector<8x32xf32> to vector<8x32xbf16>
    %98 = vector.extract_strided_slice %73 {offsets = [0, 32], sizes = [8, 32], strides = [1, 1]} : vector<8x64xf32> to vector<8x32xf32>
    %99 = arith.truncf %98 : vector<8x32xf32> to vector<8x32xbf16>
    %cst_41 = arith.constant dense<0.000000e+00> : vector<8x8xf32>
    %100 = tpu.matmul %95, %97, %cst_41 {dimension_numbers = #tpu.dot_dimension_numbers<[1], [1], [0], [0], [0, 0, 1, 0], [], []>} : vector<8x32xbf16>, vector<8x32xbf16>, vector<8x8xf32> -> vector<8x8xf32>
    %cst_42 = arith.constant 0.176776692 : f32
    %101 = vector.broadcast %cst_42 : f32 to vector<8x8xf32>
    %102 = arith.mulf %100, %101 : vector<8x8xf32>
    %cst_43 = arith.constant dense<0xFF800000> : vector<8xf32>
    %103 = vector.multi_reduction <maximumf>, %102, %cst_43 [1] : vector<8x8xf32> to vector<8xf32>
    %104 = vector.shape_cast %103 : vector<8xf32> to vector<8x1xf32>
    %105 = vector.broadcast %104 : vector<8x1xf32> to vector<8x8xf32>
    %106 = arith.subf %102, %105 : vector<8x8xf32>
    %107 = math.exp %106 : vector<8x8xf32>
    %cst_44 = arith.constant dense<0.000000e+00> : vector<8xf32>
    %108 = vector.multi_reduction <add>, %107, %cst_44 [1] : vector<8x8xf32> to vector<8xf32>
    %109 = vector.shape_cast %108 : vector<8xf32> to vector<8x1xf32>
    %110 = vector.broadcast %109 : vector<8x1xf32> to vector<8x8xf32>
    %111 = arith.divf %107, %110 : vector<8x8xf32>
    %112 = arith.truncf %111 : vector<8x8xf32> to vector<8x8xbf16>
    %cst_45 = arith.constant dense<0.000000e+00> : vector<8x32xf32>
    %113 = tpu.matmul %112, %99, %cst_45 {dimension_numbers = #tpu.dot_dimension_numbers<[1], [0], [0], [1], [0, 0, 1, 1], [], []>} : vector<8x8xbf16>, vector<8x32xbf16>, vector<8x32xf32> -> vector<8x32xf32>
    %114 = tpu.concatenate %93, %113 in 1 : vector<8x32xf32>, vector<8x32xf32> -> vector<8x64xf32>
    %c0_46 = arith.constant 0 : index
    %c0_47 = arith.constant 0 : index
    %115 = vector.load %arg15[%c0_46, %c0_47] : memref<64x64xbf16, #tpu.memory_space<vmem>>, vector<64x64xbf16>
    %c0_48 = arith.constant 0 : index
    %c0_49 = arith.constant 0 : index
    %116 = vector.load %arg16[%c0_48, %c0_49] : memref<1x64xf32, #tpu.memory_space<vmem>>, vector<1x64xf32>
    %117 = arith.truncf %114 : vector<8x64xf32> to vector<8x64xbf16>
    %cst_50 = arith.constant dense<0.000000e+00> : vector<8x64xf32>
    %118 = tpu.matmul %117, %115, %cst_50 {dimension_numbers = #tpu.dot_dimension_numbers<[1], [0], [0], [1], [0, 0, 1, 1], [], []>} : vector<8x64xbf16>, vector<64x64xbf16>, vector<8x64xf32> -> vector<8x64xf32>
    %119 = vector.broadcast %116 : vector<1x64xf32> to vector<8x64xf32>
    %120 = arith.addf %118, %119 : vector<8x64xf32>
    %121 = arith.addf %37, %120 : vector<8x64xf32>
    %c0_51 = arith.constant 0 : index
    %c0_52 = arith.constant 0 : index
    %122 = vector.load %arg8[%c0_51, %c0_52] : memref<1x64xf32, #tpu.memory_space<vmem>>, vector<1x64xf32>
    %c0_53 = arith.constant 0 : index
    %c0_54 = arith.constant 0 : index
    %123 = vector.load %arg9[%c0_53, %c0_54] : memref<1x64xf32, #tpu.memory_space<vmem>>, vector<1x64xf32>
    %cst_55 = arith.constant dense<0.000000e+00> : vector<8xf32>
    %124 = vector.multi_reduction <add>, %121, %cst_55 [1] : vector<8x64xf32> to vector<8xf32>
    %125 = vector.shape_cast %124 : vector<8xf32> to vector<8x1xf32>
    %cst_56 = arith.constant 6.400000e+01 : f32
    %126 = vector.broadcast %cst_56 : f32 to vector<8x1xf32>
    %127 = arith.divf %125, %126 : vector<8x1xf32>
    %128 = vector.broadcast %127 : vector<8x1xf32> to vector<8x64xf32>
    %129 = arith.subf %121, %128 : vector<8x64xf32>
    %130 = arith.mulf %129, %129 : vector<8x64xf32>
    %cst_57 = arith.constant dense<0.000000e+00> : vector<8xf32>
    %131 = vector.multi_reduction <add>, %130, %cst_57 [1] : vector<8x64xf32> to vector<8xf32>
    %132 = vector.shape_cast %131 : vector<8xf32> to vector<8x1xf32>
    %cst_58 = arith.constant 6.400000e+01 : f32
    %133 = vector.broadcast %cst_58 : f32 to vector<8x1xf32>
    %134 = arith.divf %132, %133 : vector<8x1xf32>
    %135 = vector.broadcast %127 : vector<8x1xf32> to vector<8x64xf32>
    %136 = arith.subf %121, %135 : vector<8x64xf32>
    %cst_59 = arith.constant 9.99999974E-6 : f32
    %137 = vector.broadcast %cst_59 : f32 to vector<8x1xf32>
    %138 = arith.addf %134, %137 : vector<8x1xf32>
    %139 = math.rsqrt %138 : vector<8x1xf32>
    %140 = vector.broadcast %139 : vector<8x1xf32> to vector<8x64xf32>
    %141 = arith.mulf %136, %140 : vector<8x64xf32>
    %142 = vector.broadcast %122 : vector<1x64xf32> to vector<8x64xf32>
    %143 = arith.mulf %141, %142 : vector<8x64xf32>
    %144 = vector.broadcast %123 : vector<1x64xf32> to vector<8x64xf32>
    %145 = arith.addf %143, %144 : vector<8x64xf32>
    %c0_60 = arith.constant 0 : index
    %c0_61 = arith.constant 0 : index
    %146 = vector.load %arg17[%c0_60, %c0_61] : memref<64x128xbf16, #tpu.memory_space<vmem>>, vector<64x128xbf16>
    %c0_62 = arith.constant 0 : index
    %c0_63 = arith.constant 0 : index
    %147 = vector.load %arg18[%c0_62, %c0_63] : memref<1x128xf32, #tpu.memory_space<vmem>>, vector<1x128xf32>
    %148 = arith.truncf %145 : vector<8x64xf32> to vector<8x64xbf16>
    %cst_64 = arith.constant dense<0.000000e+00> : vector<8x128xf32>
    %149 = tpu.matmul %148, %146, %cst_64 {dimension_numbers = #tpu.dot_dimension_numbers<[1], [0], [0], [1], [0, 0, 1, 1], [], []>} : vector<8x64xbf16>, vector<64x128xbf16>, vector<8x128xf32> -> vector<8x128xf32>
    %150 = vector.broadcast %147 : vector<1x128xf32> to vector<8x128xf32>
    %151 = arith.addf %149, %150 : vector<8x128xf32>
    %152 = arith.mulf %151, %151 : vector<8x128xf32>
    %153 = arith.mulf %151, %152 : vector<8x128xf32>
    %cst_65 = arith.constant 4.471500e-02 : f32
    %154 = vector.broadcast %cst_65 : f32 to vector<8x128xf32>
    %155 = arith.mulf %154, %153 : vector<8x128xf32>
    %156 = arith.addf %151, %155 : vector<8x128xf32>
    %cst_66 = arith.constant 0.797884583 : f32
    %157 = vector.broadcast %cst_66 : f32 to vector<8x128xf32>
    %158 = arith.mulf %157, %156 : vector<8x128xf32>
    %159 = math.tanh %158 : vector<8x128xf32>
    %cst_67 = arith.constant 1.000000e+00 : f32
    %160 = vector.broadcast %cst_67 : f32 to vector<8x128xf32>
    %161 = arith.addf %160, %159 : vector<8x128xf32>
    %cst_68 = arith.constant 5.000000e-01 : f32
    %162 = vector.broadcast %cst_68 : f32 to vector<8x128xf32>
    %163 = arith.mulf %162, %161 : vector<8x128xf32>
    %164 = arith.mulf %151, %163 : vector<8x128xf32>
    %c0_69 = arith.constant 0 : index
    %c0_70 = arith.constant 0 : index
    %165 = vector.load %arg19[%c0_69, %c0_70] : memref<128x64xbf16, #tpu.memory_space<vmem>>, vector<128x64xbf16>
    %c0_71 = arith.constant 0 : index
    %c0_72 = arith.constant 0 : index
    %166 = vector.load %arg20[%c0_71, %c0_72] : memref<1x64xf32, #tpu.memory_space<vmem>>, vector<1x64xf32>
    %167 = arith.truncf %164 : vector<8x128xf32> to vector<8x128xbf16>
    %cst_73 = arith.constant dense<0.000000e+00> : vector<8x64xf32>
    %168 = tpu.matmul %167, %165, %cst_73 {dimension_numbers = #tpu.dot_dimension_numbers<[1], [0], [0], [1], [0, 0, 1, 1], [], []>} : vector<8x128xbf16>, vector<128x64xbf16>, vector<8x64xf32> -> vector<8x64xf32>
    %169 = vector.broadcast %166 : vector<1x64xf32> to vector<8x64xf32>
    %170 = arith.addf %168, %169 : vector<8x64xf32>
    %171 = arith.addf %121, %170 : vector<8x64xf32>
    %c0_74 = arith.constant 0 : index
    %c0_75 = arith.constant 0 : index
    %172 = vector.load %arg21[%c0_74, %c0_75] : memref<64x32xf32, #tpu.memory_space<vmem>>, vector<64x32xf32>
    %c0_76 = arith.constant 0 : index
    %c0_77 = arith.constant 0 : index
    %173 = vector.load %arg22[%c0_76, %c0_77] : memref<32x64xf32, #tpu.memory_space<vmem>>, vector<32x64xf32>
    %c0_78 = arith.constant 0 : index
    %c0_79 = arith.constant 0 : index
    %174 = vector.load %arg23[%c0_78, %c0_79] : memref<1x32xf32, #tpu.memory_space<vmem>>, vector<1x32xf32>
    %cst_80 = arith.constant dense<0.000000e+00> : vector<8x32xf32>
    %175 = tpu.matmul %171, %172, %cst_80 {dimension_numbers = #tpu.dot_dimension_numbers<[1], [0], [0], [1], [0, 0, 1, 1], [], []>} : vector<8x64xf32>, vector<64x32xf32>, vector<8x32xf32> -> vector<8x32xf32>
    %cst_81 = arith.constant 2.000000e+00 : f32
    %176 = vector.broadcast %cst_81 : f32 to vector<8x32xf32>
    %177 = arith.mulf %176, %175 : vector<8x32xf32>
    %178 = vector.broadcast %174 : vector<1x32xf32> to vector<8x32xf32>
    %179 = arith.subf %178, %177 : vector<8x32xf32>
    %180 = tpu.iota {dimensions = array<i32: 1>} : vector<8x32xi32>
    %cst_82 = arith.constant 0.000000e+00 : f32
    %181 = vector.broadcast %cst_82 : f32 to vector<8x32xf32>
    %c0_i32 = arith.constant 0 : i32
    %182 = vector.broadcast %c0_i32 : i32 to vector<8x32xi32>
    %183 = arith.cmpi sge, %180, %182 : vector<8x32xi32>
    %c16_i32 = arith.constant 16 : i32
    %184 = vector.broadcast %c16_i32 : i32 to vector<8x32xi32>
    %185 = arith.cmpi slt, %180, %184 : vector<8x32xi32>
    %186 = arith.andi %183, %185 : vector<8x32xi1>
    %cst_83 = arith.constant 0x7F800000 : f32
    %187 = vector.broadcast %cst_83 : f32 to vector<8x32xf32>
    %188 = arith.select %186, %179, %187 : vector<8x32xi1>, vector<8x32xf32>
    %cst_84 = arith.constant dense<0x7F800000> : vector<8xf32>
    %189 = vector.multi_reduction <minimumf>, %188, %cst_84 [1] : vector<8x32xf32> to vector<8xf32>
    %190 = vector.shape_cast %189 : vector<8xf32> to vector<8x1xf32>
    %191 = vector.broadcast %190 : vector<8x1xf32> to vector<8x32xf32>
    %192 = arith.cmpf ole, %188, %191 : vector<8x32xf32>
    %c32_i32 = arith.constant 32 : i32
    %193 = vector.broadcast %c32_i32 : i32 to vector<8x32xi32>
    %194 = arith.select %192, %180, %193 : vector<8x32xi1>, vector<8x32xi32>
    %cst_85 = arith.constant dense<2147483647> : vector<8xi32>
    %195 = vector.multi_reduction <minsi>, %194, %cst_85 [1] : vector<8x32xi32> to vector<8xi32>
    %196 = vector.shape_cast %195 : vector<8xi32> to vector<8x1xi32>
    %197 = vector.broadcast %196 : vector<8x1xi32> to vector<8x32xi32>
    %198 = arith.cmpi eq, %180, %197 : vector<8x32xi32>
    %199 = arith.extui %198 : vector<8x32xi1> to vector<8x32xi32>
    %200 = arith.sitofp %199 : vector<8x32xi32> to vector<8x32xf32>
    %201 = arith.addf %181, %200 : vector<8x32xf32>
    %c16_i32_86 = arith.constant 16 : i32
    %202 = vector.broadcast %c16_i32_86 : i32 to vector<8x32xi32>
    %203 = arith.cmpi sge, %180, %202 : vector<8x32xi32>
    %c32_i32_87 = arith.constant 32 : i32
    %204 = vector.broadcast %c32_i32_87 : i32 to vector<8x32xi32>
    %205 = arith.cmpi slt, %180, %204 : vector<8x32xi32>
    %206 = arith.andi %203, %205 : vector<8x32xi1>
    %cst_88 = arith.constant 0x7F800000 : f32
    %207 = vector.broadcast %cst_88 : f32 to vector<8x32xf32>
    %208 = arith.select %206, %179, %207 : vector<8x32xi1>, vector<8x32xf32>
    %cst_89 = arith.constant dense<0x7F800000> : vector<8xf32>
    %209 = vector.multi_reduction <minimumf>, %208, %cst_89 [1] : vector<8x32xf32> to vector<8xf32>
    %210 = vector.shape_cast %209 : vector<8xf32> to vector<8x1xf32>
    %211 = vector.broadcast %210 : vector<8x1xf32> to vector<8x32xf32>
    %212 = arith.cmpf ole, %208, %211 : vector<8x32xf32>
    %c32_i32_90 = arith.constant 32 : i32
    %213 = vector.broadcast %c32_i32_90 : i32 to vector<8x32xi32>
    %214 = arith.select %212, %180, %213 : vector<8x32xi1>, vector<8x32xi32>
    %cst_91 = arith.constant dense<2147483647> : vector<8xi32>
    %215 = vector.multi_reduction <minsi>, %214, %cst_91 [1] : vector<8x32xi32> to vector<8xi32>
    %216 = vector.shape_cast %215 : vector<8xi32> to vector<8x1xi32>
    %217 = vector.broadcast %216 : vector<8x1xi32> to vector<8x32xi32>
    %218 = arith.cmpi eq, %180, %217 : vector<8x32xi32>
    %219 = arith.extui %218 : vector<8x32xi1> to vector<8x32xi32>
    %220 = arith.sitofp %219 : vector<8x32xi32> to vector<8x32xf32>
    %221 = arith.addf %201, %220 : vector<8x32xf32>
    %cst_92 = arith.constant dense<0.000000e+00> : vector<8x64xf32>
    %222 = tpu.matmul %221, %173, %cst_92 {dimension_numbers = #tpu.dot_dimension_numbers<[1], [0], [0], [1], [0, 0, 1, 1], [], []>} : vector<8x32xf32>, vector<32x64xf32>, vector<8x64xf32> -> vector<8x64xf32>
    %cst_93 = arith.constant dense<0.000000e+00> : vector<32xf32>
    %223 = vector.multi_reduction <add>, %221, %cst_93 [0] : vector<8x32xf32> to vector<32xf32>
    %224 = vector.shape_cast %223 : vector<32xf32> to vector<1x32xf32>
    %225 = arith.subf %222, %171 : vector<8x64xf32>
    %226 = arith.mulf %225, %225 : vector<8x64xf32>
    %cst_94 = arith.constant dense<0.000000e+00> : vector<8xf32>
    %227 = vector.multi_reduction <add>, %226, %cst_94 [1] : vector<8x64xf32> to vector<8xf32>
    %228 = vector.shape_cast %227 : vector<8xf32> to vector<8x1xf32>
    %cst_95 = arith.constant dense<0.000000e+00> : vector<1xf32>
    %229 = vector.multi_reduction <add>, %228, %cst_95 [0] : vector<8x1xf32> to vector<1xf32>
    %230 = vector.shape_cast %229 : vector<1xf32> to vector<1x1xf32>
    %c0_96 = arith.constant 0 : index
    %c0_97 = arith.constant 0 : index
    %231 = vector.load %arg26[%c0_96, %c0_97] : memref<1x64xf32, #tpu.memory_space<vmem>>, vector<1x64xf32>
    %c0_98 = arith.constant 0 : index
    %c0_99 = arith.constant 0 : index
    %232 = vector.load %arg27[%c0_98, %c0_99] : memref<1x64xf32, #tpu.memory_space<vmem>>, vector<1x64xf32>
    %cst_100 = arith.constant dense<0.000000e+00> : vector<8xf32>
    %233 = vector.multi_reduction <add>, %222, %cst_100 [1] : vector<8x64xf32> to vector<8xf32>
    %234 = vector.shape_cast %233 : vector<8xf32> to vector<8x1xf32>
    %cst_101 = arith.constant 6.400000e+01 : f32
    %235 = vector.broadcast %cst_101 : f32 to vector<8x1xf32>
    %236 = arith.divf %234, %235 : vector<8x1xf32>
    %237 = vector.broadcast %236 : vector<8x1xf32> to vector<8x64xf32>
    %238 = arith.subf %222, %237 : vector<8x64xf32>
    %239 = arith.mulf %238, %238 : vector<8x64xf32>
    %cst_102 = arith.constant dense<0.000000e+00> : vector<8xf32>
    %240 = vector.multi_reduction <add>, %239, %cst_102 [1] : vector<8x64xf32> to vector<8xf32>
    %241 = vector.shape_cast %240 : vector<8xf32> to vector<8x1xf32>
    %cst_103 = arith.constant 6.400000e+01 : f32
    %242 = vector.broadcast %cst_103 : f32 to vector<8x1xf32>
    %243 = arith.divf %241, %242 : vector<8x1xf32>
    %244 = vector.broadcast %236 : vector<8x1xf32> to vector<8x64xf32>
    %245 = arith.subf %222, %244 : vector<8x64xf32>
    %cst_104 = arith.constant 9.99999974E-6 : f32
    %246 = vector.broadcast %cst_104 : f32 to vector<8x1xf32>
    %247 = arith.addf %243, %246 : vector<8x1xf32>
    %248 = math.rsqrt %247 : vector<8x1xf32>
    %249 = vector.broadcast %248 : vector<8x1xf32> to vector<8x64xf32>
    %250 = arith.mulf %245, %249 : vector<8x64xf32>
    %251 = vector.broadcast %231 : vector<1x64xf32> to vector<8x64xf32>
    %252 = arith.mulf %250, %251 : vector<8x64xf32>
    %253 = vector.broadcast %232 : vector<1x64xf32> to vector<8x64xf32>
    %254 = arith.addf %252, %253 : vector<8x64xf32>
    %c0_105 = arith.constant 0 : index
    %c0_106 = arith.constant 0 : index
    %255 = vector.load %arg30[%c0_105, %c0_106] : memref<64x32xbf16, #tpu.memory_space<vmem>>, vector<64x32xbf16>
    %c0_107 = arith.constant 0 : index
    %c0_108 = arith.constant 0 : index
    %256 = vector.load %arg31[%c0_107, %c0_108] : memref<1x32xf32, #tpu.memory_space<vmem>>, vector<1x32xf32>
    %257 = arith.truncf %254 : vector<8x64xf32> to vector<8x64xbf16>
    %cst_109 = arith.constant dense<0.000000e+00> : vector<8x32xf32>
    %258 = tpu.matmul %257, %255, %cst_109 {dimension_numbers = #tpu.dot_dimension_numbers<[1], [0], [0], [1], [0, 0, 1, 1], [], []>} : vector<8x64xbf16>, vector<64x32xbf16>, vector<8x32xf32> -> vector<8x32xf32>
    %259 = vector.broadcast %256 : vector<1x32xf32> to vector<8x32xf32>
    %260 = arith.addf %258, %259 : vector<8x32xf32>
    %c0_110 = arith.constant 0 : index
    %c0_111 = arith.constant 0 : index
    %261 = vector.load %arg24[%c0_110, %c0_111] : memref<1x64xf32, #tpu.memory_space<vmem>>, vector<1x64xf32>
    %c0_112 = arith.constant 0 : index
    %c0_113 = arith.constant 0 : index
    %262 = vector.load %arg25[%c0_112, %c0_113] : memref<1x64xf32, #tpu.memory_space<vmem>>, vector<1x64xf32>
    %cst_114 = arith.constant dense<0.000000e+00> : vector<8xf32>
    %263 = vector.multi_reduction <add>, %222, %cst_114 [1] : vector<8x64xf32> to vector<8xf32>
    %264 = vector.shape_cast %263 : vector<8xf32> to vector<8x1xf32>
    %cst_115 = arith.constant 6.400000e+01 : f32
    %265 = vector.broadcast %cst_115 : f32 to vector<8x1xf32>
    %266 = arith.divf %264, %265 : vector<8x1xf32>
    %267 = vector.broadcast %266 : vector<8x1xf32> to vector<8x64xf32>
    %268 = arith.subf %222, %267 : vector<8x64xf32>
    %269 = arith.mulf %268, %268 : vector<8x64xf32>
    %cst_116 = arith.constant dense<0.000000e+00> : vector<8xf32>
    %270 = vector.multi_reduction <add>, %269, %cst_116 [1] : vector<8x64xf32> to vector<8xf32>
    %271 = vector.shape_cast %270 : vector<8xf32> to vector<8x1xf32>
    %cst_117 = arith.constant 6.400000e+01 : f32
    %272 = vector.broadcast %cst_117 : f32 to vector<8x1xf32>
    %273 = arith.divf %271, %272 : vector<8x1xf32>
    %274 = vector.broadcast %266 : vector<8x1xf32> to vector<8x64xf32>
    %275 = arith.subf %222, %274 : vector<8x64xf32>
    %cst_118 = arith.constant 9.99999974E-6 : f32
    %276 = vector.broadcast %cst_118 : f32 to vector<8x1xf32>
    %277 = arith.addf %273, %276 : vector<8x1xf32>
    %278 = math.rsqrt %277 : vector<8x1xf32>
    %279 = vector.broadcast %278 : vector<8x1xf32> to vector<8x64xf32>
    %280 = arith.mulf %275, %279 : vector<8x64xf32>
    %281 = vector.broadcast %261 : vector<1x64xf32> to vector<8x64xf32>
    %282 = arith.mulf %280, %281 : vector<8x64xf32>
    %283 = vector.broadcast %262 : vector<1x64xf32> to vector<8x64xf32>
    %284 = arith.addf %282, %283 : vector<8x64xf32>
    %285 = arith.truncf %284 : vector<8x64xf32> to vector<8x64xbf16>
    %c0_119 = arith.constant 0 : index
    %c0_120 = arith.constant 0 : index
    %286 = vector.load %arg32[%c0_119, %c0_120] : memref<64x192xbf16, #tpu.memory_space<vmem>>, vector<64x192xbf16>
    %cst_121 = arith.constant dense<0.000000e+00> : vector<8x192xf32>
    %287 = tpu.matmul %285, %286, %cst_121 {dimension_numbers = #tpu.dot_dimension_numbers<[1], [0], [0], [1], [0, 0, 1, 1], [], []>} : vector<8x64xbf16>, vector<64x192xbf16>, vector<8x192xf32> -> vector<8x192xf32>
    %288 = vector.extract_strided_slice %287 {offsets = [0, 0], sizes = [8, 64], strides = [1, 1]} : vector<8x192xf32> to vector<8x64xf32>
    %c0_122 = arith.constant 0 : index
    %c0_123 = arith.constant 0 : index
    %289 = vector.load %arg33[%c0_122, %c0_123] : memref<1x64xf32, #tpu.memory_space<vmem>>, vector<1x64xf32>
    %290 = vector.broadcast %289 : vector<1x64xf32> to vector<8x64xf32>
    %291 = arith.addf %288, %290 : vector<8x64xf32>
    %292 = vector.extract_strided_slice %287 {offsets = [0, 64], sizes = [8, 64], strides = [1, 1]} : vector<8x192xf32> to vector<8x64xf32>
    %293 = vector.extract_strided_slice %287 {offsets = [0, 128], sizes = [8, 64], strides = [1, 1]} : vector<8x192xf32> to vector<8x64xf32>
    %c0_124 = arith.constant 0 : index
    %c0_125 = arith.constant 0 : index
    %294 = vector.load %arg34[%c0_124, %c0_125] : memref<1x64xf32, #tpu.memory_space<vmem>>, vector<1x64xf32>
    %295 = vector.broadcast %294 : vector<1x64xf32> to vector<8x64xf32>
    %296 = arith.addf %293, %295 : vector<8x64xf32>
    %297 = vector.extract_strided_slice %291 {offsets = [0, 0], sizes = [8, 32], strides = [1, 1]} : vector<8x64xf32> to vector<8x32xf32>
    %298 = arith.truncf %297 : vector<8x32xf32> to vector<8x32xbf16>
    %299 = vector.extract_strided_slice %292 {offsets = [0, 0], sizes = [8, 32], strides = [1, 1]} : vector<8x64xf32> to vector<8x32xf32>
    %300 = arith.truncf %299 : vector<8x32xf32> to vector<8x32xbf16>
    %301 = vector.extract_strided_slice %296 {offsets = [0, 0], sizes = [8, 32], strides = [1, 1]} : vector<8x64xf32> to vector<8x32xf32>
    %302 = arith.truncf %301 : vector<8x32xf32> to vector<8x32xbf16>
    %cst_126 = arith.constant dense<0.000000e+00> : vector<8x8xf32>
    %303 = tpu.matmul %298, %300, %cst_126 {dimension_numbers = #tpu.dot_dimension_numbers<[1], [1], [0], [0], [0, 0, 1, 0], [], []>} : vector<8x32xbf16>, vector<8x32xbf16>, vector<8x8xf32> -> vector<8x8xf32>
    %cst_127 = arith.constant 0.176776692 : f32
    %304 = vector.broadcast %cst_127 : f32 to vector<8x8xf32>
    %305 = arith.mulf %303, %304 : vector<8x8xf32>
    %cst_128 = arith.constant dense<0xFF800000> : vector<8xf32>
    %306 = vector.multi_reduction <maximumf>, %305, %cst_128 [1] : vector<8x8xf32> to vector<8xf32>
    %307 = vector.shape_cast %306 : vector<8xf32> to vector<8x1xf32>
    %308 = vector.broadcast %307 : vector<8x1xf32> to vector<8x8xf32>
    %309 = arith.subf %305, %308 : vector<8x8xf32>
    %310 = math.exp %309 : vector<8x8xf32>
    %cst_129 = arith.constant dense<0.000000e+00> : vector<8xf32>
    %311 = vector.multi_reduction <add>, %310, %cst_129 [1] : vector<8x8xf32> to vector<8xf32>
    %312 = vector.shape_cast %311 : vector<8xf32> to vector<8x1xf32>
    %313 = vector.broadcast %312 : vector<8x1xf32> to vector<8x8xf32>
    %314 = arith.divf %310, %313 : vector<8x8xf32>
    %315 = arith.truncf %314 : vector<8x8xf32> to vector<8x8xbf16>
    %cst_130 = arith.constant dense<0.000000e+00> : vector<8x32xf32>
    %316 = tpu.matmul %315, %302, %cst_130 {dimension_numbers = #tpu.dot_dimension_numbers<[1], [0], [0], [1], [0, 0, 1, 1], [], []>} : vector<8x8xbf16>, vector<8x32xbf16>, vector<8x32xf32> -> vector<8x32xf32>
    %317 = vector.extract_strided_slice %291 {offsets = [0, 32], sizes = [8, 32], strides = [1, 1]} : vector<8x64xf32> to vector<8x32xf32>
    %318 = arith.truncf %317 : vector<8x32xf32> to vector<8x32xbf16>
    %319 = vector.extract_strided_slice %292 {offsets = [0, 32], sizes = [8, 32], strides = [1, 1]} : vector<8x64xf32> to vector<8x32xf32>
    %320 = arith.truncf %319 : vector<8x32xf32> to vector<8x32xbf16>
    %321 = vector.extract_strided_slice %296 {offsets = [0, 32], sizes = [8, 32], strides = [1, 1]} : vector<8x64xf32> to vector<8x32xf32>
    %322 = arith.truncf %321 : vector<8x32xf32> to vector<8x32xbf16>
    %cst_131 = arith.constant dense<0.000000e+00> : vector<8x8xf32>
    %323 = tpu.matmul %318, %320, %cst_131 {dimension_numbers = #tpu.dot_dimension_numbers<[1], [1], [0], [0], [0, 0, 1, 0], [], []>} : vector<8x32xbf16>, vector<8x32xbf16>, vector<8x8xf32> -> vector<8x8xf32>
    %cst_132 = arith.constant 0.176776692 : f32
    %324 = vector.broadcast %cst_132 : f32 to vector<8x8xf32>
    %325 = arith.mulf %323, %324 : vector<8x8xf32>
    %cst_133 = arith.constant dense<0xFF800000> : vector<8xf32>
    %326 = vector.multi_reduction <maximumf>, %325, %cst_133 [1] : vector<8x8xf32> to vector<8xf32>
    %327 = vector.shape_cast %326 : vector<8xf32> to vector<8x1xf32>
    %328 = vector.broadcast %327 : vector<8x1xf32> to vector<8x8xf32>
    %329 = arith.subf %325, %328 : vector<8x8xf32>
    %330 = math.exp %329 : vector<8x8xf32>
    %cst_134 = arith.constant dense<0.000000e+00> : vector<8xf32>
    %331 = vector.multi_reduction <add>, %330, %cst_134 [1] : vector<8x8xf32> to vector<8xf32>
    %332 = vector.shape_cast %331 : vector<8xf32> to vector<8x1xf32>
    %333 = vector.broadcast %332 : vector<8x1xf32> to vector<8x8xf32>
    %334 = arith.divf %330, %333 : vector<8x8xf32>
    %335 = arith.truncf %334 : vector<8x8xf32> to vector<8x8xbf16>
    %cst_135 = arith.constant dense<0.000000e+00> : vector<8x32xf32>
    %336 = tpu.matmul %335, %322, %cst_135 {dimension_numbers = #tpu.dot_dimension_numbers<[1], [0], [0], [1], [0, 0, 1, 1], [], []>} : vector<8x8xbf16>, vector<8x32xbf16>, vector<8x32xf32> -> vector<8x32xf32>
    %337 = arith.addf %316, %336 : vector<8x32xf32>
    %cst_136 = arith.constant 5.000000e-01 : f32
    %338 = vector.broadcast %cst_136 : f32 to vector<8x32xf32>
    %339 = arith.mulf %337, %338 : vector<8x32xf32>
    %c0_137 = arith.constant 0 : index
    %c0_138 = arith.constant 0 : index
    %340 = vector.load %arg35[%c0_137, %c0_138] : memref<32x32xbf16, #tpu.memory_space<vmem>>, vector<32x32xbf16>
    %c0_139 = arith.constant 0 : index
    %c0_140 = arith.constant 0 : index
    %341 = vector.load %arg36[%c0_139, %c0_140] : memref<1x32xf32, #tpu.memory_space<vmem>>, vector<1x32xf32>
    %342 = arith.truncf %339 : vector<8x32xf32> to vector<8x32xbf16>
    %cst_141 = arith.constant dense<0.000000e+00> : vector<8x32xf32>
    %343 = tpu.matmul %342, %340, %cst_141 {dimension_numbers = #tpu.dot_dimension_numbers<[1], [0], [0], [1], [0, 0, 1, 1], [], []>} : vector<8x32xbf16>, vector<32x32xbf16>, vector<8x32xf32> -> vector<8x32xf32>
    %344 = vector.broadcast %341 : vector<1x32xf32> to vector<8x32xf32>
    %345 = arith.addf %343, %344 : vector<8x32xf32>
    %346 = arith.addf %260, %345 : vector<8x32xf32>
    %c0_142 = arith.constant 0 : index
    %c0_143 = arith.constant 0 : index
    %347 = vector.load %arg28[%c0_142, %c0_143] : memref<1x32xf32, #tpu.memory_space<vmem>>, vector<1x32xf32>
    %c0_144 = arith.constant 0 : index
    %c0_145 = arith.constant 0 : index
    %348 = vector.load %arg29[%c0_144, %c0_145] : memref<1x32xf32, #tpu.memory_space<vmem>>, vector<1x32xf32>
    %cst_146 = arith.constant dense<0.000000e+00> : vector<8xf32>
    %349 = vector.multi_reduction <add>, %346, %cst_146 [1] : vector<8x32xf32> to vector<8xf32>
    %350 = vector.shape_cast %349 : vector<8xf32> to vector<8x1xf32>
    %cst_147 = arith.constant 3.200000e+01 : f32
    %351 = vector.broadcast %cst_147 : f32 to vector<8x1xf32>
    %352 = arith.divf %350, %351 : vector<8x1xf32>
    %353 = vector.broadcast %352 : vector<8x1xf32> to vector<8x32xf32>
    %354 = arith.subf %346, %353 : vector<8x32xf32>
    %355 = arith.mulf %354, %354 : vector<8x32xf32>
    %cst_148 = arith.constant dense<0.000000e+00> : vector<8xf32>
    %356 = vector.multi_reduction <add>, %355, %cst_148 [1] : vector<8x32xf32> to vector<8xf32>
    %357 = vector.shape_cast %356 : vector<8xf32> to vector<8x1xf32>
    %cst_149 = arith.constant 3.200000e+01 : f32
    %358 = vector.broadcast %cst_149 : f32 to vector<8x1xf32>
    %359 = arith.divf %357, %358 : vector<8x1xf32>
    %360 = vector.broadcast %352 : vector<8x1xf32> to vector<8x32xf32>
    %361 = arith.subf %346, %360 : vector<8x32xf32>
    %cst_150 = arith.constant 9.99999974E-6 : f32
    %362 = vector.broadcast %cst_150 : f32 to vector<8x1xf32>
    %363 = arith.addf %359, %362 : vector<8x1xf32>
    %364 = math.rsqrt %363 : vector<8x1xf32>
    %365 = vector.broadcast %364 : vector<8x1xf32> to vector<8x32xf32>
    %366 = arith.mulf %361, %365 : vector<8x32xf32>
    %367 = vector.broadcast %347 : vector<1x32xf32> to vector<8x32xf32>
    %368 = arith.mulf %366, %367 : vector<8x32xf32>
    %369 = vector.broadcast %348 : vector<1x32xf32> to vector<8x32xf32>
    %370 = arith.addf %368, %369 : vector<8x32xf32>
    %c0_151 = arith.constant 0 : index
    %c0_152 = arith.constant 0 : index
    %371 = vector.load %arg37[%c0_151, %c0_152] : memref<32x64xbf16, #tpu.memory_space<vmem>>, vector<32x64xbf16>
    %c0_153 = arith.constant 0 : index
    %c0_154 = arith.constant 0 : index
    %372 = vector.load %arg38[%c0_153, %c0_154] : memref<1x64xf32, #tpu.memory_space<vmem>>, vector<1x64xf32>
    %373 = arith.truncf %370 : vector<8x32xf32> to vector<8x32xbf16>
    %cst_155 = arith.constant dense<0.000000e+00> : vector<8x64xf32>
    %374 = tpu.matmul %373, %371, %cst_155 {dimension_numbers = #tpu.dot_dimension_numbers<[1], [0], [0], [1], [0, 0, 1, 1], [], []>} : vector<8x32xbf16>, vector<32x64xbf16>, vector<8x64xf32> -> vector<8x64xf32>
    %375 = vector.broadcast %372 : vector<1x64xf32> to vector<8x64xf32>
    %376 = arith.addf %374, %375 : vector<8x64xf32>
    %377 = arith.mulf %376, %376 : vector<8x64xf32>
    %378 = arith.mulf %376, %377 : vector<8x64xf32>
    %cst_156 = arith.constant 4.471500e-02 : f32
    %379 = vector.broadcast %cst_156 : f32 to vector<8x64xf32>
    %380 = arith.mulf %379, %378 : vector<8x64xf32>
    %381 = arith.addf %376, %380 : vector<8x64xf32>
    %cst_157 = arith.constant 0.797884583 : f32
    %382 = vector.broadcast %cst_157 : f32 to vector<8x64xf32>
    %383 = arith.mulf %382, %381 : vector<8x64xf32>
    %384 = math.tanh %383 : vector<8x64xf32>
    %cst_158 = arith.constant 1.000000e+00 : f32
    %385 = vector.broadcast %cst_158 : f32 to vector<8x64xf32>
    %386 = arith.addf %385, %384 : vector<8x64xf32>
    %cst_159 = arith.constant 5.000000e-01 : f32
    %387 = vector.broadcast %cst_159 : f32 to vector<8x64xf32>
    %388 = arith.mulf %387, %386 : vector<8x64xf32>
    %389 = arith.mulf %376, %388 : vector<8x64xf32>
    %c0_160 = arith.constant 0 : index
    %c0_161 = arith.constant 0 : index
    %390 = vector.load %arg39[%c0_160, %c0_161] : memref<64x32xbf16, #tpu.memory_space<vmem>>, vector<64x32xbf16>
    %c0_162 = arith.constant 0 : index
    %c0_163 = arith.constant 0 : index
    %391 = vector.load %arg40[%c0_162, %c0_163] : memref<1x32xf32, #tpu.memory_space<vmem>>, vector<1x32xf32>
    %392 = arith.truncf %389 : vector<8x64xf32> to vector<8x64xbf16>
    %cst_164 = arith.constant dense<0.000000e+00> : vector<8x32xf32>
    %393 = tpu.matmul %392, %390, %cst_164 {dimension_numbers = #tpu.dot_dimension_numbers<[1], [0], [0], [1], [0, 0, 1, 1], [], []>} : vector<8x64xbf16>, vector<64x32xbf16>, vector<8x32xf32> -> vector<8x32xf32>
    %394 = vector.broadcast %391 : vector<1x32xf32> to vector<8x32xf32>
    %395 = arith.addf %393, %394 : vector<8x32xf32>
    %396 = arith.addf %346, %395 : vector<8x32xf32>
    %c0_165 = arith.constant 0 : index
    %c0_166 = arith.constant 0 : index
    %397 = vector.load %arg41[%c0_165, %c0_166] : memref<32x128xbf16, #tpu.memory_space<vmem>>, vector<32x128xbf16>
    %c0_167 = arith.constant 0 : index
    %c0_168 = arith.constant 0 : index
    %398 = vector.load %arg42[%c0_167, %c0_168] : memref<1x128xf32, #tpu.memory_space<vmem>>, vector<1x128xf32>
    %399 = arith.truncf %396 : vector<8x32xf32> to vector<8x32xbf16>
    %cst_169 = arith.constant dense<0.000000e+00> : vector<8x128xf32>
    %400 = tpu.matmul %399, %397, %cst_169 {dimension_numbers = #tpu.dot_dimension_numbers<[1], [0], [0], [1], [0, 0, 1, 1], [], []>} : vector<8x32xbf16>, vector<32x128xbf16>, vector<8x128xf32> -> vector<8x128xf32>
    %401 = vector.broadcast %398 : vector<1x128xf32> to vector<8x128xf32>
    %402 = arith.addf %400, %401 : vector<8x128xf32>
    %403 = vector.shape_cast %402 : vector<8x128xf32> to vector<1x8x128xf32>
    %c0_170 = arith.constant 0 : index
    %c0_171 = arith.constant 0 : index
    %c0_172 = arith.constant 0 : index
    %404 = vector.load %arg43[%c0_170, %c0_171, %c0_172] : memref<1x8x128xf32, #tpu.memory_space<vmem>>, vector<1x8x128xf32>
    tpu.vector_store %arg43[%c0_170, %c0_171, %c0_172], %403 {strides = array<i32>} : memref<1x8x128xf32, #tpu.memory_space<vmem>>, vector<1x8x128xf32>,
    %cst_173 = arith.constant 0.000000e+00 : f32
    %405 = vector.broadcast %cst_173 : f32 to vector<1x96xf32>
    %406 = tpu.concatenate %224, %405 in 1 : vector<1x32xf32>, vector<1x96xf32> -> vector<1x128xf32>
    %407 = tpu.iota {dimensions = array<i32: 1>} : vector<1x128xi32>
    %c0_i32_174 = arith.constant 0 : i32
    %408 = vector.broadcast %c0_i32_174 : i32 to vector<1x128xi32>
    %409 = arith.cmpi eq, %407, %408 : vector<1x128xi32>
    %cst_175 = arith.constant 0.000000e+00 : f32
    %410 = vector.shape_cast %230 : vector<1x1xf32> to vector<1x1xf32>
    %411 = vector.broadcast %410 : vector<1x1xf32> to vector<1x128xf32>
    %412 = vector.broadcast %cst_175 : f32 to vector<1x128xf32>
    %413 = arith.select %409, %411, %412 : vector<1x128xi1>, vector<1x128xf32>
    %cst_176 = arith.constant 0.000000e+00 : f32
    %414 = vector.broadcast %cst_176 : f32 to vector<6x128xf32>
    %415 = tpu.concatenate %406, %413, %414 in 0 : vector<1x128xf32>, vector<1x128xf32>, vector<6x128xf32> -> vector<8x128xf32>
    %416 = vector.shape_cast %415 : vector<8x128xf32> to vector<1x8x128xf32>
    %c0_177 = arith.constant 0 : index
    %c0_178 = arith.constant 0 : index
    %c0_179 = arith.constant 0 : index
    %417 = vector.load %arg44[%c0_177, %c0_178, %c0_179] : memref<1x8x128xf32, #tpu.memory_space<vmem>>, vector<1x8x128xf32>
    tpu.vector_store %arg44[%c0_177, %c0_178, %c0_179], %416 {strides = array<i32>} : memref<1x8x128xf32, #tpu.memory_space<vmem>>, vector<1x8x128xf32>,
    return
  }
  func.func @transform_0(%arg0: i32) -> (i32, i32, i32) {
    %c0_i32 = arith.constant 0 : i32
    %c0_i32_0 = arith.constant 0 : i32
    %c0_i32_1 = arith.constant 0 : i32
    return %arg0, %c0_i32, %c0_i32_0 : i32, i32, i32
  }
  func.func @transform_1(%arg0: i32) -> (i32, i32) {
    %c0_i32 = arith.constant 0 : i32
    %c0_i32_0 = arith.constant 0 : i32
    %c0_i32_1 = arith.constant 0 : i32
    return %c0_i32, %c0_i32_0 : i32, i32
  }
  func.func @transform_2(%arg0: i32) -> (i32, i32) {
    %c0_i32 = arith.constant 0 : i32
    %c0_i32_0 = arith.constant 0 : i32
    %c0_i32_1 = arith.constant 0 : i32
    return %c0_i32, %c0_i32_0 : i32, i32
  }
  func.func @transform_3(%arg0: i32) -> (i32, i32) {
    %c0_i32 = arith.constant 0 : i32
    %c0_i32_0 = arith.constant 0 : i32
    %c0_i32_1 = arith.constant 0 : i32
    return %c0_i32, %c0_i32_0 : i32, i32
  }
  func.func @transform_4(%arg0: i32) -> (i32, i32) {
    %c0_i32 = arith.constant 0 : i32
    %c0_i32_0 = arith.constant 0 : i32
    %c0_i32_1 = arith.constant 0 : i32
    return %c0_i32, %c0_i32_0 : i32, i32
  }
  func.func @transform_5(%arg0: i32) -> (i32, i32) {
    %c0_i32 = arith.constant 0 : i32
    %c0_i32_0 = arith.constant 0 : i32
    %c0_i32_1 = arith.constant 0 : i32
    return %c0_i32, %c0_i32_0 : i32, i32
  }
  func.func @transform_6(%arg0: i32) -> (i32, i32) {
    %c0_i32 = arith.constant 0 : i32
    %c0_i32_0 = arith.constant 0 : i32
    %c0_i32_1 = arith.constant 0 : i32
    return %c0_i32, %c0_i32_0 : i32, i32
  }
  func.func @transform_7(%arg0: i32) -> (i32, i32) {
    %c0_i32 = arith.constant 0 : i32
    %c0_i32_0 = arith.constant 0 : i32
    %c0_i32_1 = arith.constant 0 : i32
    return %c0_i32, %c0_i32_0 : i32, i32
  }
  func.func @transform_8(%arg0: i32) -> (i32, i32) {
    %c0_i32 = arith.constant 0 : i32
    %c0_i32_0 = arith.constant 0 : i32
    %c0_i32_1 = arith.constant 0 : i32
    return %c0_i32, %c0_i32_0 : i32, i32
  }
  func.func @transform_9(%arg0: i32) -> (i32, i32) {
    %c0_i32 = arith.constant 0 : i32
    %c0_i32_0 = arith.constant 0 : i32
    %c0_i32_1 = arith.constant 0 : i32
    return %c0_i32, %c0_i32_0 : i32, i32
  }
  func.func @transform_10(%arg0: i32) -> (i32, i32) {
    %c0_i32 = arith.constant 0 : i32
    %c0_i32_0 = arith.constant 0 : i32
    %c0_i32_1 = arith.constant 0 : i32
    return %c0_i32, %c0_i32_0 : i32, i32
  }
  func.func @transform_11(%arg0: i32) -> (i32, i32) {
    %c0_i32 = arith.constant 0 : i32
    %c0_i32_0 = arith.constant 0 : i32
    %c0_i32_1 = arith.constant 0 : i32
    return %c0_i32, %c0_i32_0 : i32, i32
  }
  func.func @transform_12(%arg0: i32) -> (i32, i32) {
    %c0_i32 = arith.constant 0 : i32
    %c0_i32_0 = arith.constant 0 : i32
    %c0_i32_1 = arith.constant 0 : i32
    return %c0_i32, %c0_i32_0 : i32, i32
  }
  func.func @transform_13(%arg0: i32) -> (i32, i32) {
    %c0_i32 = arith.constant 0 : i32
    %c0_i32_0 = arith.constant 0 : i32
    %c0_i32_1 = arith.constant 0 : i32
    return %c0_i32, %c0_i32_0 : i32, i32
  }
  func.func @transform_14(%arg0: i32) -> (i32, i32) {
    %c0_i32 = arith.constant 0 : i32
    %c0_i32_0 = arith.constant 0 : i32
    %c0_i32_1 = arith.constant 0 : i32
    return %c0_i32, %c0_i32_0 : i32, i32
  }
  func.func @transform_15(%arg0: i32) -> (i32, i32) {
    %c0_i32 = arith.constant 0 : i32
    %c0_i32_0 = arith.constant 0 : i32
    %c0_i32_1 = arith.constant 0 : i32
    return %c0_i32, %c0_i32_0 : i32, i32
  }
  func.func @transform_16(%arg0: i32) -> (i32, i32) {
    %c0_i32 = arith.constant 0 : i32
    %c0_i32_0 = arith.constant 0 : i32
    %c0_i32_1 = arith.constant 0 : i32
    return %c0_i32, %c0_i32_0 : i32, i32
  }
  func.func @transform_17(%arg0: i32) -> (i32, i32) {
    %c0_i32 = arith.constant 0 : i32
    %c0_i32_0 = arith.constant 0 : i32
    %c0_i32_1 = arith.constant 0 : i32
    return %c0_i32, %c0_i32_0 : i32, i32
  }
  func.func @transform_18(%arg0: i32) -> (i32, i32) {
    %c0_i32 = arith.constant 0 : i32
    %c0_i32_0 = arith.constant 0 : i32
    %c0_i32_1 = arith.constant 0 : i32
    return %c0_i32, %c0_i32_0 : i32, i32
  }
  func.func @transform_19(%arg0: i32) -> (i32, i32) {
    %c0_i32 = arith.constant 0 : i32
    %c0_i32_0 = arith.constant 0 : i32
    %c0_i32_1 = arith.constant 0 : i32
    return %c0_i32, %c0_i32_0 : i32, i32
  }
  func.func @transform_20(%arg0: i32) -> (i32, i32) {
    %c0_i32 = arith.constant 0 : i32
    %c0_i32_0 = arith.constant 0 : i32
    %c0_i32_1 = arith.constant 0 : i32
    return %c0_i32, %c0_i32_0 : i32, i32
  }
  func.func @transform_21(%arg0: i32) -> (i32, i32) {
    %c0_i32 = arith.constant 0 : i32
    %c0_i32_0 = arith.constant 0 : i32
    %c0_i32_1 = arith.constant 0 : i32
    return %c0_i32, %c0_i32_0 : i32, i32
  }
  func.func @transform_22(%arg0: i32) -> (i32, i32) {
    %c0_i32 = arith.constant 0 : i32
    %c0_i32_0 = arith.constant 0 : i32
    %c0_i32_1 = arith.constant 0 : i32
    return %c0_i32, %c0_i32_0 : i32, i32
  }
  func.func @transform_23(%arg0: i32) -> (i32, i32) {
    %c0_i32 = arith.constant 0 : i32
    %c0_i32_0 = arith.constant 0 : i32
    %c0_i32_1 = arith.constant 0 : i32
    return %c0_i32, %c0_i32_0 : i32, i32
  }
  func.func @transform_24(%arg0: i32) -> (i32, i32) {
    %c0_i32 = arith.constant 0 : i32
    %c0_i32_0 = arith.constant 0 : i32
    %c0_i32_1 = arith.constant 0 : i32
    return %c0_i32, %c0_i32_0 : i32, i32
  }
  func.func @transform_25(%arg0: i32) -> (i32, i32) {
    %c0_i32 = arith.constant 0 : i32
    %c0_i32_0 = arith.constant 0 : i32
    %c0_i32_1 = arith.constant 0 : i32
    return %c0_i32, %c0_i32_0 : i32, i32
  }
  func.func @transform_26(%arg0: i32) -> (i32, i32) {
    %c0_i32 = arith.constant 0 : i32
    %c0_i32_0 = arith.constant 0 : i32
    %c0_i32_1 = arith.constant 0 : i32
    return %c0_i32, %c0_i32_0 : i32, i32
  }
  func.func @transform_27(%arg0: i32) -> (i32, i32) {
    %c0_i32 = arith.constant 0 : i32
    %c0_i32_0 = arith.constant 0 : i32
    %c0_i32_1 = arith.constant 0 : i32
    return %c0_i32, %c0_i32_0 : i32, i32
  }
  func.func @transform_28(%arg0: i32) -> (i32, i32) {
    %c0_i32 = arith.constant 0 : i32
    %c0_i32_0 = arith.constant 0 : i32
    %c0_i32_1 = arith.constant 0 : i32
    return %c0_i32, %c0_i32_0 : i32, i32
  }
  func.func @transform_29(%arg0: i32) -> (i32, i32) {
    %c0_i32 = arith.constant 0 : i32
    %c0_i32_0 = arith.constant 0 : i32
    %c0_i32_1 = arith.constant 0 : i32
    return %c0_i32, %c0_i32_0 : i32, i32
  }
  func.func @transform_30(%arg0: i32) -> (i32, i32) {
    %c0_i32 = arith.constant 0 : i32
    %c0_i32_0 = arith.constant 0 : i32
    %c0_i32_1 = arith.constant 0 : i32
    return %c0_i32, %c0_i32_0 : i32, i32
  }
  func.func @transform_31(%arg0: i32) -> (i32, i32) {
    %c0_i32 = arith.constant 0 : i32
    %c0_i32_0 = arith.constant 0 : i32
    %c0_i32_1 = arith.constant 0 : i32
    return %c0_i32, %c0_i32_0 : i32, i32
  }
  func.func @transform_32(%arg0: i32) -> (i32, i32) {
    %c0_i32 = arith.constant 0 : i32
    %c0_i32_0 = arith.constant 0 : i32
    %c0_i32_1 = arith.constant 0 : i32
    return %c0_i32, %c0_i32_0 : i32, i32
  }
  func.func @transform_33(%arg0: i32) -> (i32, i32) {
    %c0_i32 = arith.constant 0 : i32
    %c0_i32_0 = arith.constant 0 : i32
    %c0_i32_1 = arith.constant 0 : i32
    return %c0_i32, %c0_i32_0 : i32, i32
  }
  func.func @transform_34(%arg0: i32) -> (i32, i32) {
    %c0_i32 = arith.constant 0 : i32
    %c0_i32_0 = arith.constant 0 : i32
    %c0_i32_1 = arith.constant 0 : i32
    return %c0_i32, %c0_i32_0 : i32, i32
  }
  func.func @transform_35(%arg0: i32) -> (i32, i32) {
    %c0_i32 = arith.constant 0 : i32
    %c0_i32_0 = arith.constant 0 : i32
    %c0_i32_1 = arith.constant 0 : i32
    return %c0_i32, %c0_i32_0 : i32, i32
  }
  func.func @transform_36(%arg0: i32) -> (i32, i32) {
    %c0_i32 = arith.constant 0 : i32
    %c0_i32_0 = arith.constant 0 : i32
    %c0_i32_1 = arith.constant 0 : i32
    return %c0_i32, %c0_i32_0 : i32, i32
  }
  func.func @transform_37(%arg0: i32) -> (i32, i32) {
    %c0_i32 = arith.constant 0 : i32
    %c0_i32_0 = arith.constant 0 : i32
    %c0_i32_1 = arith.constant 0 : i32
    return %c0_i32, %c0_i32_0 : i32, i32
  }
  func.func @transform_38(%arg0: i32) -> (i32, i32) {
    %c0_i32 = arith.constant 0 : i32
    %c0_i32_0 = arith.constant 0 : i32
    %c0_i32_1 = arith.constant 0 : i32
    return %c0_i32, %c0_i32_0 : i32, i32
  }
  func.func @transform_39(%arg0: i32) -> (i32, i32) {
    %c0_i32 = arith.constant 0 : i32
    %c0_i32_0 = arith.constant 0 : i32
    %c0_i32_1 = arith.constant 0 : i32
    return %c0_i32, %c0_i32_0 : i32, i32
  }
  func.func @transform_40(%arg0: i32) -> (i32, i32) {
    %c0_i32 = arith.constant 0 : i32
    %c0_i32_0 = arith.constant 0 : i32
    %c0_i32_1 = arith.constant 0 : i32
    return %c0_i32, %c0_i32_0 : i32, i32
  }
  func.func @transform_41(%arg0: i32) -> (i32, i32) {
    %c0_i32 = arith.constant 0 : i32
    %c0_i32_0 = arith.constant 0 : i32
    %c0_i32_1 = arith.constant 0 : i32
    return %c0_i32, %c0_i32_0 : i32, i32
  }
  func.func @transform_42(%arg0: i32) -> (i32, i32, i32) {
    %c0_i32 = arith.constant 0 : i32
    %c0_i32_0 = arith.constant 0 : i32
    %c0_i32_1 = arith.constant 0 : i32
    return %arg0, %c0_i32, %c0_i32_0 : i32, i32, i32
  }
  func.func @transform_43(%arg0: i32) -> (i32, i32, i32) {
    %c0_i32 = arith.constant 0 : i32
    %c0_i32_0 = arith.constant 0 : i32
    %c0_i32_1 = arith.constant 0 : i32
    return %arg0, %c0_i32, %c0_i32_0 : i32, i32, i32
  }
}

</mosaic_0001>

<bundles_post_ra>
// kernel: vqvae_forward.1
= control target key start
LH: loop header
LB: loop body
LE: loop exit
PB: predicated region body
PF: predicated region fallthrough
CT: control target
= control target key end

     0   :  { %s5269_s6 = smov 1   ;;  %s5270_s10 = smov 2   ;;  %s6117_s0 = inlined_call_operand.smem [shape: u32[44], index: -1, kind: input, shape index: {}] }
   0x1   :  { %s5351_s5 = sld [smem:[%s6117_s0]]   ;;  %s5271_s14 = smov 3  }
   0x2   :  { %s5356_s9 = sld [smem:[%s6117_s0 + %s5269_s6]]   ;;  %s5272_s18 = smov 4  }
   0x3   :  { %s5361_s13 = sld [smem:[%s6117_s0 + %s5270_s10]]   ;;  %s5273_s22 = smov 5  }
   0x4   :  { %s5366_s17 = sld [smem:[%s6117_s0 + %s5271_s14]]   ;;  %s5274_s26 = smov 6  }
   0x5   :  { %s5371_s21 = sld [smem:[%s6117_s0 + %s5272_s18]]   ;;  %s5275_s30 = smov 7  }
   0x6   :  { %s5376_s25 = sld [smem:[%s6117_s0 + %s5273_s22]]   ;;  %s5276_s4 = smov 8  }
   0x7   :  { %6150 = sst [smem:[#allocation51_spill]] %s5351_s5  ;;  %s5277_s10 = smov 9  }
   0x8   :  { %6151 = sst [smem:[#allocation52_spill]] %s5356_s9  ;;  %s5278_s15 = smov 10  }
   0x9   :  { %6152 = sst [smem:[#allocation53_spill]] %s5361_s13  ;;  %s5279_s20 = smov 11  }
   0xa   :  { %s5381_s29 = sld [smem:[%s6117_s0 + %s5274_s26]]   ;;  %s5280_s26 = smov 12  }
   0xb   :  { %6153 = sst [smem:[#allocation54_spill]] %s5371_s21  ;;  %s5281_s1 = smov 13  }
   0xc   :  { %s5386_s3 = sld [smem:[%s6117_s0 + %s5275_s30]]   ;;  %s5282_s7 = smov 14  }
   0xd   :  { %s5391_s8 = sld [smem:[%s6117_s0 + %s5276_s4]]   ;;  %s5284_s22 = smov 16  }
   0xe   :  { %s5396_s14 = sld [smem:[%s6117_s0 + %s5277_s10]]   ;;  %s5285_s28 = smov 17  }
   0xf   :  { %s5401_s19 = sld [smem:[%s6117_s0 + %s5278_s15]]   ;;  %s5283_s15 = smov 15  }
  0x10   :  { %s5406_s24 = sld [smem:[%s6117_s0 + %s5279_s20]]  }
  0x11   :  { %s5411_s30 = sld [smem:[%s6117_s0 + %s5280_s26]]  }
  0x12   :  { %6154 = sst [smem:[#allocation55_spill]] %s5386_s3 }
  0x13   :  { %6155 = sst [smem:[#allocation56_spill]] %s5391_s8 }
  0x14   :  { %6156 = sst [smem:[#allocation57_spill]] %s5396_s14 }
  0x15   :  { %s5416_s6 = sld [smem:[%s6117_s0 + %s5281_s1]]  }
  0x16   :  { %6157 = sst [smem:[#allocation58_spill]] %s5406_s24 }
  0x17   :  { %s5421_s12 = sld [smem:[%s6117_s0 + %s5282_s7]]   ;;  %s5286_s7 = smov 18  }
  0x18   :  { %s5426_s20 = sld [smem:[%s6117_s0 + %s5283_s15]]   ;;  %s5287_s15 = smov 19  }
  0x19   :  { %s5431_s27 = sld [smem:[%s6117_s0 + %s5284_s22]]   ;;  %s5288_s22 = smov 20  }
  0x1a   :  { %s5436_s4 = sld [smem:[%s6117_s0 + %s5285_s28]]   ;;  %s5289_s28 = smov 21  }
  0x1b   :  { %6158 = sst [smem:[#allocation59_spill]] %s5416_s6 }
  0x1c   :  { %s5446_s14 = sld [smem:[%s6117_s0 + %s5287_s15]]   ;;  %s5291_s15 = smov 23  }
  0x1d   :  { %6159 = sst [smem:[#allocation60_spill]] %s5421_s12 }
  0x1e   :  { %s5441_s12 = sld [smem:[%s6117_s0 + %s5286_s7]]   ;;  %s5290_s7 = smov 22  }
  0x1f   :  { %6160 = sst [smem:[#allocation61_spill]] %s5431_s27 }
  0x20   :  { %6161 = sst [smem:[#allocation62_spill]] %s5436_s4 }
  0x21   :  { %s5451_s27 = sld [smem:[%s6117_s0 + %s5288_s22]]   ;;  %s5292_s22 = smov 24  }
  0x22   :  { %s5456_s24 = sld [smem:[%s6117_s0 + %s5289_s28]]   ;;  %s5293_s28 = smov 25  }
  0x23   :  { %s5466_s13 = sld [smem:[%s6117_s0 + %s5291_s15]]   ;;  %s5295_s15 = smov 27  }
  0x24   :  { %6162 = sst [smem:[#allocation63_spill]] %s5441_s12 }
  0x25   :  { %s5461_s12 = sld [smem:[%s6117_s0 + %s5290_s7]]   ;;  %s5294_s7 = smov 26  }
  0x27   :  { %6163 = sst [smem:[#allocation64_spill]] %s5451_s27 }
  0x28   :  { %6164 = sst [smem:[#allocation65_spill]] %s5456_s24 }
  0x29   :  { %6166 = sst [smem:[#allocation67_spill]] %s5466_s13 }
  0x2a   :  { %s5471_s27 = sld [smem:[%s6117_s0 + %s5292_s22]]   ;;  %s5296_s22 = smov 28  }
  0x2b   :  { %6165 = sst [smem:[#allocation66_spill]] %s5461_s12 }
  0x2c   :  { %s5476_s24 = sld [smem:[%s6117_s0 + %s5293_s28]]   ;;  %s5297_s28 = smov 29  }
  0x2d   :  { %s5481_s12 = sld [smem:[%s6117_s0 + %s5294_s7]]   ;;  %s5298_s7 = smov 30  }
  0x2e   :  { %s5486_s13 = sld [smem:[%s6117_s0 + %s5295_s15]]   ;;  %s5299_s15 = smov 31  }
  0x30   :  { %6167 = sst [smem:[#allocation68_spill]] %s5471_s27 }
  0x31   :  { %s5491_s27 = sld [smem:[%s6117_s0 + %s5296_s22]]   ;;  %s5300_s22 = smov 32  }
  0x32   :  { %6168 = sst [smem:[#allocation69_spill]] %s5476_s24 }
  0x33   :  { %6169 = sst [smem:[#allocation70_spill]] %s5481_s12 }
  0x34   :  { %6170 = sst [smem:[#allocation71_spill]] %s5486_s13 }
  0x35   :  { %s5496_s24 = sld [smem:[%s6117_s0 + %s5297_s28]]   ;;  %s5301_s28 = smov 33  }
  0x36   :  { %s5501_s12 = sld [smem:[%s6117_s0 + %s5298_s7]]   ;;  %s5302_s7 = smov 34  }
  0x37   :  { %6171 = sst [smem:[#allocation72_spill]] %s5491_s27 }
  0x38   :  { %s5506_s13 = sld [smem:[%s6117_s0 + %s5299_s15]]   ;;  %s5303_s15 = smov 35  }
  0x39   :  { %s5511_s9 = sld [smem:[%s6117_s0 + %s5300_s22]]   ;;  %s5304_s22 = smov 36  }
  0x3a   :  { %s5521_s5 = sld [smem:[%s6117_s0 + %s5302_s7]]   ;;  %s5306_s7 = smov 38  }
  0x3b   :  { %6172 = sst [smem:[#allocation73_spill]] %s5496_s24 }
  0x3c   :  { %s5516_s24 = sld [smem:[%s6117_s0 + %s5301_s28]]   ;;  %s5305_s28 = smov 37  }
  0x3d   :  { %s5536_s27 = sld [smem:[%s6117_s0 + %s5305_s28]]   ;;  %s5309_s28 = smov 41  }
  0x3e   :  { %6173 = sst [smem:[#allocation74_spill]] %s5506_s13 }
  0x3f   :  { %6174 = sst [smem:[#allocation75_spill]] %s5511_s9 }
  0x40   :  { %6175 = sst [smem:[#allocation76_spill]] %s5521_s5 }
  0x41   :  { %s5526_s13 = sld [smem:[%s6117_s0 + %s5303_s15]]   ;;  %s5307_s15 = smov 39  }
  0x42   :  { %s5531_s9 = sld [smem:[%s6117_s0 + %s5304_s22]]   ;;  %s5308_s22 = smov 40  }
  0x43   :  { %6177 = sst [smem:[#allocation78_spill]] %s5536_s27 }
  0x44   :  { %s5541_s5 = sld [smem:[%s6117_s0 + %s5306_s7]]   ;;  %s5310_s7 = smov 42  }
  0x45   :  { %s5551_s4 = sld [smem:[%s6117_s0 + %s5308_s22]]  }
  0x46   :  { %s5556_s27 = sld [smem:[%s6117_s0 + %s5309_s28]]  }
  0x47   :  { %6176 = sst [smem:[#allocation77_spill]] %s5526_s13 }
  0x48   :  { %s5546_s13 = sld [smem:[%s6117_s0 + %s5307_s15]]   ;;  %s5311_s15 = smov 43  }
  0x49   :  { %s5566_s6 = sld [smem:[%s6117_s0 + %s5311_s15]]  }
  0x4a   :  { %6178 = sst [smem:[#allocation79_spill]] %s5541_s5 }
  0x4b   :  { %6179 = sst [smem:[#allocation80_spill]] %s5551_s4 }
  0x4c   :  { %s5561_s5 = sld [smem:[%s6117_s0 + %s5310_s7]]  }
  0x4f   :  { %6180 = sst [smem:[#allocation81_spill]] %s5566_s6 }
  0x50   :  { %93 = vsyncpa [#allocation3], 0 }
  0x51   :  { %94 = vsyncpa [#allocation6], 0 }
  0x52   :  { %95 = vsyncpa [#allocation9], 0 }
  0x53   :  { %96 = vsyncpa [#allocation12], 0 }
  0x54   :  { %97 = vsyncpa [#allocation15], 0 }
  0x55   :  { %98 = vsyncpa [#allocation18], 0 }
  0x56   :  { %99 = vsyncpa [#allocation21], 0 }
  0x57   :  { %100 = vsyncpa [#allocation24], 0 }
  0x58   :  { %101 = vsyncpa [#allocation27], 0 }
  0x59   :  { %102 = vsyncpa [#allocation30], 0 }
  0x5a   :  { %103 = vsyncpa [#allocation33], 0 }
  0x5b   :  { %104 = vsyncpa [#allocation36], 0 }
  0x5c   :  { %105 = vsyncpa [#allocation4], 0 }
  0x5d   :  { %107 = vsyncpa [#allocation4 + $0x1], 0  ;;  %s5568_s22 = smov 0   ;;  %s5570_s23 = smov 0  }
  0x5e   :  { %s5572_s0 = smov 0   ;;  %s5574_s26 = smov 0  }
  0x5f LB: > { %6181 = sst [smem:[#allocation82_spill]] %s5255_s22  ;;  %s5589_s28 = sadd.s32 4294967295, %s5267_s26   ;;  %s5267_s26 = sphi %s5574_s26, %s6265_s26   ;;  %s5263_s0 = sphi %s5572_s0, %s6267_s0   ;;  %s5259_s23 = sphi %s5570_s23, %s6269_s23   ;;  %s5255_s22 = sphi %s5568_s22, %s6268_s22  }
  0x60   : > { %6182 = sst [smem:[#allocation83_spill]] %s5263_s0  ;;  %s3790_s1 = sadd.s32 4294967294, %s5267_s26  }
  0x61   : > { %6183 = sst [smem:[#allocation84_spill]] %s5267_s26  ;;  %s5593_s2 = sadd.s32 1, %s5267_s26  }
  0x62   : > { %6184 = sst [smem:[#allocation85_spill]] %s5593_s2  ;;  %s1007_s7 = sadd.s32 1, %s5263_s0 }
  0x63   : > { %s1004_s10 = ssub.s32 %s5267_s26, %s5593_s2  ;;  %p1017_p0 = scmp.ne.s32.totalorder %s5263_s0, %s5259_s23 }
  0x64   : > { %p1005_p1 = scmp.eq.s32.totalorder %s1004_s10, 0  ;;  %p1018_p2 = scmp.eq.s32.totalorder %s5589_s28, 1 }
  0x65   : > { %p1023_p3 = scmp.ne.s32.totalorder %s5259_s23, %s5255_s22  ;;  %p1024_p4 = scmp.eq.s32.totalorder %s3790_s1, 1 }
  0x66   : > { %s5604_s11 = scalar_select %p1005_p1, %s5263_s0, %s1007_s7  }
  0x67   : > { %p5606_p5 = por %p1018_p2, %p1017_p0  ;;  %p5610_p6 = por %p1024_p4, %p1023_p3 }
  0x68   : > { %6185 = sst [smem:[#allocation86_spill]] %s5604_s11  ;;  %p3791_p7 = scmp.ge.s32.totalorder %s5267_s26, 1 }
  0x69   : > { %s6186_s15 = scalar_select %p5606_p5, 1, 0 }
  0x6a   : > { %s6187_s16 = scalar_select %p5610_p6, 1, 0 }
  0x6b   : > { %p1057_p8 = scmp.lt.s32.totalorder %s5267_s26, 3  ;;  %p6134_p9 = scmp.eq.s32.totalorder %s5589_s28, 0 }
  0x6c   : > { %6188 = sst [smem:[#allocation87_spill]] %s6187_s16  ;;  %s5312_s10 = smov [#allocation5]  }
  0x6d   : > { %p5617_p10 = pnand %p3791_p7, %p1057_p8  ;;  %s1087_s1 = sshll.u32 %s5312_s10, 4  ;;  %s1088_s1 = int_to_ptr.vmem [resolvable:$true] %s1087_s1 }
  0x6e   : > { %s5313_s7 = smov [#allocation8]   ;;  %s5314_s2 = smov [#allocation11]  }
  0x6f   : > { %s6189_s18 = scalar_select %p5617_p10, 1, 0 }
  0x70   : > { %p4287_p11 = pneg %p5617_p10  ;;  %s1109_s11 = sshll.u32 %s5313_s7, 4  ;;  %s1110_s11 = int_to_ptr.vmem [resolvable:$true] %s1109_s11 }
  0x71   : > { %s1131_s16 = sshll.u32 %s5314_s2, 4  ;;  %s4598_s10 = scalar_lea.vmem %s1088_s1, 16  ;;  %s5629_s16 = int_to_ptr.vmem [resolvable:$true] %s1131_s16 }
  0x72   : > { %p5625_p12 = pnand %p6134_p9, %p4287_p11  ;;  %p4599_p0 = scmp.ne.s32.totalorder %s1088_s1, %s4598_s10 }
  0x73   : > { %s4605_s7 = scalar_lea.vmem %s1088_s1, 32  ;;  %p4606_p3 = scmp.lt.s32.totalorder %s1088_s1, %s1088_s1 }
  0x74   : > { %p5633_p13 = pneg %p5625_p12  ;;  %p4607_p4 = scmp.lt.s32.totalorder %s4605_s7, %s4598_s10 }
  0x76   : > { %p4601_p1 = pnand %p4599_p0, %p5633_p13  ;;  %p4608_p7 = por %p4607_p4, %p4606_p3 }
  0x78   : > { %p4602_p2 = pneg %p4601_p1 }
  0x7a   : > { %p4609_p8 = pnand %p4608_p7, %p4602_p2 }
  0x7c   : > { %4612 = shalt.err (!%p4609_p8)
}
  0x7d   : > { %s6192_s21 = sld [smem:[#allocation54_spill]]  ;;  %s4624_s2 = scalar_lea.vmem %s1110_s11, 16 }
  0x7e   : > { %p4625_p11 = scmp.ne.s32.totalorder %s1110_s11, %s4624_s2  ;;  %s4631_s26 = scalar_lea.vmem %s1110_s11, 32 }
  0x7f   : > { %p4632_p5 = scmp.lt.s32.totalorder %s1110_s11, %s1110_s11  ;;  %p4633_p0 = scmp.lt.s32.totalorder %s4631_s26, %s4624_s2 }
  0x80   : > { %p4627_p9 = pnand %p4625_p11, %p5633_p13 }
  0x81   : > { %p4634_p1 = por %p4633_p0, %p4632_p5 }
  0x82   : > { %p4628_p6 = pneg %p4627_p9 }
  0x83   : > { %4293 = dma.hbm_to_vmem [thread:$0]  (!%p5625_p12), %s6192_s21, 16, %s1088_s1, [#allocation6]  }
  0x84   : > { %p4635_p10 = pnand %p4634_p1, %p4628_p6 }
  0x86   : > { %4638 = shalt.err (!%p4635_p10)
}
  0x87   : > { %4299 = dma.hbm_to_vmem [thread:$0]  (!%p5625_p12), %s5381_s29, 16, %s1110_s11, [#allocation9]  }
  0x88   : > { %s4650_s1 = scalar_lea.vmem %s5629_s16, 16  ;;  %s4657_s10 = scalar_lea.vmem %s5629_s16, 32 }
  0x89   : > { %p4651_p2 = scmp.ne.s32.totalorder %s5629_s16, %s4650_s1  ;;  %p4658_p4 = scmp.lt.s32.totalorder %s5629_s16, %s5629_s16 }
  0x8a   : > { %p4659_p5 = scmp.lt.s32.totalorder %s4657_s10, %s4650_s1 }
  0x8b   : > { %p4653_p3 = pnand %p4651_p2, %p5633_p13 }
  0x8c   : > { %p4660_p6 = por %p4659_p5, %p4658_p4 }
  0x8d   : > { %p4654_p9 = pneg %p4653_p3 }
  0x8f   : > { %p4661_p10 = pnand %p4660_p6, %p4654_p9 }
  0x91   : > { %4664 = shalt.err (!%p4661_p10)
}
  0x92   : > { %s6193_s8 = sld [smem:[#allocation56_spill]]  ;;  %s5315_s26 = smov [#allocation14]  }
  0x93   : > { %s1159_s11 = sshll.u32 %s5315_s26, 4  ;;  %s5316_s7 = smov [#allocation17]   ;;  %s1160_s11 = int_to_ptr.vmem [resolvable:$true] %s1159_s11 }
  0x94   : > { %s1184_s2 = sshll.u32 %s5316_s7, 4  ;;  %s4676_s21 = scalar_lea.vmem %s1160_s11, 16  ;;  %s1185_s2 = int_to_ptr.vmem [resolvable:$true] %s1184_s2 }
  0x95   : > { %p4677_p7 = scmp.ne.s32.totalorder %s1160_s11, %s4676_s21  ;;  %s4683_s1 = scalar_lea.vmem %s1160_s11, 32 }
  0x96   : > { %p4684_p0 = scmp.lt.s32.totalorder %s1160_s11, %s1160_s11  ;;  %p4685_p1 = scmp.lt.s32.totalorder %s4683_s1, %s4676_s21 }
  0x97   : > { %p4679_p8 = pnand %p4677_p7, %p5633_p13 }
  0x98   : > { %4305 = dma.hbm_to_vmem [thread:$0]  (!%p5625_p12), %s6193_s8, 16, %s5629_s16, [#allocation12]  }
  0x99   : > { %p4680_p11 = pneg %p4679_p8  ;;  %p4686_p2 = por %p4685_p1, %p4684_p0 }
  0x9b   : > { %p4687_p3 = pnand %p4686_p2, %p4680_p11 }
  0x9d   : > { %4690 = shalt.err (!%p4687_p3)
}
  0x9e   : > { %4311 = dma.hbm_to_vmem [thread:$0]  (!%p5625_p12), %s5411_s30, 16, %s1160_s11, [#allocation15]  }
  0x9f   : > { %s4702_s16 = scalar_lea.vmem %s1185_s2, 16  ;;  %s4709_s10 = scalar_lea.vmem %s1185_s2, 32 }
  0xa0   : > { %p4703_p9 = scmp.ne.s32.totalorder %s1185_s2, %s4702_s16  ;;  %p4710_p6 = scmp.lt.s32.totalorder %s1185_s2, %s1185_s2 }
  0xa1   : > { %p4711_p10 = scmp.lt.s32.totalorder %s4709_s10, %s4702_s16 }
  0xa2   : > { %p4705_p4 = pnand %p4703_p9, %p5633_p13 }
  0xa3   : > { %p4712_p7 = por %p4711_p10, %p4710_p6 }
  0xa4   : > { %p4706_p5 = pneg %p4705_p4 }
  0xa6   : > { %p4713_p8 = pnand %p4712_p7, %p4706_p5 }
  0xa8   : > { %4716 = shalt.err (!%p4713_p8)
}
  0xa9   : > { %4317 = dma.hbm_to_vmem [thread:$0]  (!%p5625_p12), %s5426_s20, 16, %s1185_s2, [#allocation18]  }
  0xaa   : > { %s5317_s21 = smov [#allocation20]   ;;  %s5318_s11 = smov [#allocation23]  }
  0xab   : > { %s1212_s26 = sshll.u32 %s5317_s21, 4  ;;  %s1261_s7 = sshll.u32 %s5318_s11, 4  ;;  %s1213_s26 = int_to_ptr.vmem [resolvable:$true] %s1212_s26  ;;  %s1262_s7 = int_to_ptr.vmem [resolvable:$true] %s1261_s7 }
  0xac   : > { %s4728_s1 = scalar_lea.vmem %s1213_s26, 16  ;;  %s4735_s8 = scalar_lea.vmem %s1213_s26, 32 }
  0xad   : > { %p4729_p11 = scmp.ne.s32.totalorder %s1213_s26, %s4728_s1  ;;  %p4736_p2 = scmp.lt.s32.totalorder %s1213_s26, %s1213_s26 }
  0xae   : > { %p4737_p3 = scmp.lt.s32.totalorder %s4735_s8, %s4728_s1 }
  0xaf   : > { %p4731_p0 = pnand %p4729_p11, %p5633_p13 }
  0xb0   : > { %p4738_p9 = por %p4737_p3, %p4736_p2 }
  0xb1   : > { %p4732_p1 = pneg %p4731_p0 }
  0xb3   : > { %p4739_p4 = pnand %p4738_p9, %p4732_p1 }
  0xb5   : > { %4742 = shalt.err (!%p4739_p4)
}
  0xb6   : > { %4323 = dma.hbm_to_vmem [thread:$0]  (!%p5625_p12), %s5446_s14, 16, %s1213_s26, [#allocation21]  }
  0xb7   : > { %s4754_s2 = scalar_lea.vmem %s1262_s7, 16  ;;  %s4761_s16 = scalar_lea.vmem %s1262_s7, 32 }
  0xb8   : > { %p4755_p5 = scmp.ne.s32.totalorder %s1262_s7, %s4754_s2  ;;  %p4762_p7 = scmp.lt.s32.totalorder %s1262_s7, %s1262_s7 }
  0xb9   : > { %p4763_p8 = scmp.lt.s32.totalorder %s4761_s16, %s4754_s2 }
  0xba   : > { %p4757_p6 = pnand %p4755_p5, %p5633_p13 }
  0xbb   : > { %p4764_p11 = por %p4763_p8, %p4762_p7 }
  0xbc   : > { %p4758_p10 = pneg %p4757_p6 }
  0xbe   : > { %p4765_p0 = pnand %p4764_p11, %p4758_p10 }
  0xc0   : > { %4768 = shalt.err (!%p4765_p0)
}
  0xc1   : > { %4329 = dma.hbm_to_vmem [thread:$0]  (!%p5625_p12), %s5501_s12, 16, %s1262_s7, [#allocation24]  }
  0xc2   : > { %s5319_s8 = smov [#allocation26]   ;;  %s5320_s21 = smov [#allocation29]  }
  0xc3   : > { %s1286_s10 = sshll.u32 %s5319_s8, 4  ;;  %s1310_s26 = sshll.u32 %s5320_s21, 4  ;;  %s1287_s10 = int_to_ptr.vmem [resolvable:$true] %s1286_s10  ;;  %s1311_s26 = int_to_ptr.vmem [resolvable:$true] %s1310_s26 }
  0xc4   : > { %s4780_s11 = scalar_lea.vmem %s1287_s10, 16  ;;  %s4787_s1 = scalar_lea.vmem %s1287_s10, 32 }
  0xc5   : > { %p4781_p1 = scmp.ne.s32.totalorder %s1287_s10, %s4780_s11  ;;  %p4788_p9 = scmp.lt.s32.totalorder %s1287_s10, %s1287_s10 }
  0xc6   : > { %p4789_p4 = scmp.lt.s32.totalorder %s4787_s1, %s4780_s11 }
  0xc7   : > { %p4783_p2 = pnand %p4781_p1, %p5633_p13 }
  0xc8   : > { %p4790_p5 = por %p4789_p4, %p4788_p9 }
  0xc9   : > { %p4784_p3 = pneg %p4783_p2 }
  0xcb   : > { %p4791_p6 = pnand %p4790_p5, %p4784_p3 }
  0xcd   : > { %4794 = shalt.err (!%p4791_p6)
}
  0xce   : > { %4335 = dma.hbm_to_vmem [thread:$0]  (!%p5625_p12), %s5516_s24, 16, %s1287_s10, [#allocation27]  }
  0xcf   : > { %s4806_s7 = scalar_lea.vmem %s1311_s26, 256  ;;  %p4814_p11 = scmp.lt.s32.totalorder %s1311_s26, %s1311_s26 }
  0xd0   : > { %p4807_p10 = scmp.ne.s32.totalorder %s1311_s26, %s4806_s7  ;;  %p4815_p0 = scmp.lt.s32.totalorder %s4806_s7, %s4806_s7 }
  0xd2   : > { %p4809_p7 = pnand %p4807_p10, %p5633_p13  ;;  %p4816_p1 = por %p4815_p0, %p4814_p11 }
  0xd4   : > { %p4810_p8 = pneg %p4809_p7 }
  0xd6   : > { %p4817_p2 = pnand %p4816_p1, %p4810_p8 }
  0xd8   : > { %4820 = shalt.err (!%p4817_p2)
}
  0xd9   : > { %s6138_s2 = smov 64   ;;  %s6139_s16 = smov 4  }
  0xda   : > { %4341 = dma.hbm_to_vmem [thread:$0]  (!%p5625_p12), %s5531_s9, 256, %s1311_s26, [#allocation30], %s6138_s2, %s6138_s2, %s6139_s16  }
  0xdb   : > { %s5323_s8 = smov [#allocation32]   ;;  %s5324_s21 = smov [#allocation2]  }
  0xdc   : > { %s1338_s10 = sshll.u32 %s5323_s8, 4  ;;  %s1076_s11 = sshll.u32 %s5324_s21, 4  ;;  %s1339_s10 = int_to_ptr.vmem [resolvable:$true] %s1338_s10  ;;  %s1077_s11 = int_to_ptr.vmem [resolvable:$true] %s1076_s11 }
  0xdd   : > { %s4832_s1 = scalar_lea.vmem %s1339_s10, 16  ;;  %s4839_s7 = scalar_lea.vmem %s1339_s10, 32 }
  0xde   : > { %p4833_p3 = scmp.ne.s32.totalorder %s1339_s10, %s4832_s1  ;;  %p4840_p5 = scmp.lt.s32.totalorder %s1339_s10, %s1339_s10 }
  0xdf   : > { %p4841_p6 = scmp.lt.s32.totalorder %s4839_s7, %s4832_s1 }
  0xe0   : > { %p4835_p9 = pnand %p4833_p3, %p5633_p13 }
  0xe1   : > { %p4842_p10 = por %p4841_p6, %p4840_p5 }
  0xe2   : > { %p4836_p4 = pneg %p4835_p9 }
  0xe4   : > { %p4843_p7 = pnand %p4842_p10, %p4836_p4 }
  0xe6   : > { %4846 = shalt.err (!%p4843_p7)
}
  0xe7   : > { %4347 = dma.hbm_to_vmem [thread:$0]  (!%p5625_p12), %s5546_s13, 16, %s1339_s10, [#allocation33]  }
  0xe8   : > { %s4858_s26 = scalar_lea.vmem %s1077_s11, 16  ;;  %s4865_s8 = scalar_lea.vmem %s1077_s11, 32 }
  0xe9   : > { %p4859_p8 = scmp.ne.s32.totalorder %s1077_s11, %s4858_s26  ;;  %p4866_p1 = scmp.lt.s32.totalorder %s1077_s11, %s1077_s11 }
  0xea   : > { %p4867_p2 = scmp.lt.s32.totalorder %s4865_s8, %s4858_s26 }
  0xeb   : > { %p4861_p11 = pnand %p4859_p8, %p5633_p13 }
  0xec   : > { %p4868_p3 = por %p4867_p2, %p4866_p1 }
  0xed   : > { %p4862_p0 = pneg %p4861_p11 }
  0xef   : > { %p4869_p9 = pnand %p4868_p3, %p4862_p0 }
  0xf1   : > { %4872 = shalt.err (!%p4869_p9)
}
  0xf2   : > { %4290 = dma.hbm_to_vmem [thread:$0]  (!%p5625_p12), %s5366_s17, 16, %s1077_s11, [#allocation3]  }
  0xf3   : > { %s5325_s21 = smov [#allocation7]   ;;  %s5326_s10 = smov [#allocation10]  }
  0xf4   : > { %s1098_s1 = sshll.u32 %s5325_s21, 4  ;;  %s1120_s7 = sshll.u32 %s5326_s10, 4  ;;  %s1099_s1 = int_to_ptr.vmem [resolvable:$true] %s1098_s1  ;;  %s1121_s7 = int_to_ptr.vmem [resolvable:$true] %s1120_s7 }
  0xf5   : > { %s4884_s2 = scalar_lea.vmem %s1099_s1, 16  ;;  %s4891_s16 = scalar_lea.vmem %s1099_s1, 32 }
  0xf6   : > { %p4885_p4 = scmp.ne.s32.totalorder %s1099_s1, %s4884_s2  ;;  %p4892_p10 = scmp.lt.s32.totalorder %s1099_s1, %s1099_s1 }
  0xf7   : > { %p4893_p7 = scmp.lt.s32.totalorder %s4891_s16, %s4884_s2 }
  0xf8   : > { %p4887_p5 = pnand %p4885_p4, %p5633_p13 }
  0xf9   : > { %p4894_p8 = por %p4893_p7, %p4892_p10 }
  0xfa   : > { %p4888_p6 = pneg %p4887_p5 }
  0xfc   : > { %p4895_p11 = pnand %p4894_p8, %p4888_p6 }
  0xfe   : > { %4898 = shalt.err (!%p4895_p11)
}
  0xff   : > { %4296 = dma.hbm_to_vmem [thread:$0]  (!%p5625_p12), %s5376_s25, 16, %s1099_s1, [#allocation6]  }
 0x100   : > { %s4910_s11 = scalar_lea.vmem %s1121_s7, 16  ;;  %s4917_s26 = scalar_lea.vmem %s1121_s7, 32 }
 0x101   : > { %p4911_p0 = scmp.ne.s32.totalorder %s1121_s7, %s4910_s11  ;;  %p4918_p3 = scmp.lt.s32.totalorder %s1121_s7, %s1121_s7 }
 0x102   : > { %p4919_p9 = scmp.lt.s32.totalorder %s4917_s26, %s4910_s11 }
 0x103   : > { %p4913_p1 = pnand %p4911_p0, %p5633_p13 }
 0x104   : > { %p4920_p4 = por %p4919_p9, %p4918_p3 }
 0x105   : > { %p4914_p2 = pneg %p4913_p1 }
 0x107   : > { %p4921_p5 = pnand %p4920_p4, %p4914_p2 }
 0x109   : > { %4924 = shalt.err (!%p4921_p5)
}
 0x10a   : > { %s6194_s3 = sld [smem:[#allocation55_spill]]  ;;  %s5327_s2 = smov [#allocation13]  }
 0x10b   : > { %s1145_s16 = sshll.u32 %s5327_s2, 4  ;;  %s5328_s8 = smov [#allocation16]   ;;  %s1146_s16 = int_to_ptr.vmem [resolvable:$true] %s1145_s16 }
 0x10c   : > { %s1170_s21 = sshll.u32 %s5328_s8, 4  ;;  %s4936_s1 = scalar_lea.vmem %s1146_s16, 16  ;;  %s1171_s21 = int_to_ptr.vmem [resolvable:$true] %s1170_s21 }
 0x10d   : > { %p4937_p6 = scmp.ne.s32.totalorder %s1146_s16, %s4936_s1  ;;  %s4943_s10 = scalar_lea.vmem %s1146_s16, 32 }
 0x10e   : > { %p4944_p8 = scmp.lt.s32.totalorder %s1146_s16, %s1146_s16  ;;  %p4945_p11 = scmp.lt.s32.totalorder %s4943_s10, %s4936_s1 }
 0x10f   : > { %p4939_p10 = pnand %p4937_p6, %p5633_p13 }
 0x110   : > { %4302 = dma.hbm_to_vmem [thread:$0]  (!%p5625_p12), %s6194_s3, 16, %s1121_s7, [#allocation9]  }
 0x111   : > { %p4940_p7 = pneg %p4939_p10  ;;  %p4946_p0 = por %p4945_p11, %p4944_p8 }
 0x113   : > { %p4947_p1 = pnand %p4946_p0, %p4940_p7 }
 0x115   : > { %4950 = shalt.err (!%p4947_p1)
}
 0x116   : > { %4308 = dma.hbm_to_vmem [thread:$0]  (!%p5625_p12), %s5401_s19, 16, %s1146_s16, [#allocation12]  }
 0x117   : > { %s4962_s7 = scalar_lea.vmem %s1171_s21, 16  ;;  %s4969_s11 = scalar_lea.vmem %s1171_s21, 32 }
 0x118   : > { %p4963_p2 = scmp.ne.s32.totalorder %s1171_s21, %s4962_s7  ;;  %p4970_p4 = scmp.lt.s32.totalorder %s1171_s21, %s1171_s21 }
 0x119   : > { %p4971_p5 = scmp.lt.s32.totalorder %s4969_s11, %s4962_s7 }
 0x11a   : > { %p4965_p3 = pnand %p4963_p2, %p5633_p13 }
 0x11b   : > { %p4972_p6 = por %p4971_p5, %p4970_p4 }
 0x11c   : > { %p4966_p9 = pneg %p4965_p3 }
 0x11e   : > { %p4973_p10 = pnand %p4972_p6, %p4966_p9 }
 0x120   : > { %4976 = shalt.err (!%p4973_p10)
}
 0x121   : > { %s6195_s26 = sld [smem:[#allocation59_spill]]  ;;  %s5329_s2 = smov [#allocation19]  }
 0x122   : > { %s1198_s8 = sshll.u32 %s5329_s2, 4  ;;  %s5330_s16 = smov [#allocation22]   ;;  %s1199_s8 = int_to_ptr.vmem [resolvable:$true] %s1198_s8 }
 0x123   : > { %s1247_s1 = sshll.u32 %s5330_s16, 4  ;;  %s4988_s10 = scalar_lea.vmem %s1199_s8, 16  ;;  %s1248_s1 = int_to_ptr.vmem [resolvable:$true] %s1247_s1 }
 0x124   : > { %p4989_p7 = scmp.ne.s32.totalorder %s1199_s8, %s4988_s10  ;;  %s4995_s3 = scalar_lea.vmem %s1199_s8, 32 }
 0x125   : > { %p4996_p0 = scmp.lt.s32.totalorder %s1199_s8, %s1199_s8  ;;  %p4997_p1 = scmp.lt.s32.totalorder %s4995_s3, %s4988_s10 }
 0x126   : > { %p4991_p8 = pnand %p4989_p7, %p5633_p13 }
 0x127   : > { %4314 = dma.hbm_to_vmem [thread:$0]  (!%p5625_p12), %s6195_s26, 16, %s1171_s21, [#allocation15]  }
 0x128   : > { %p4992_p11 = pneg %p4991_p8  ;;  %p4998_p2 = por %p4997_p1, %p4996_p0 }
 0x12a   : > { %p4999_p3 = pnand %p4998_p2, %p4992_p11 }
 0x12c   : > { %5002 = shalt.err (!%p4999_p3)
}
 0x12d   : > { %s6196_s7 = sld [smem:[#allocation62_spill]]  ;;  %s5014_s21 = scalar_lea.vmem %s1248_s1, 16 }
 0x12e   : > { %p5015_p9 = scmp.ne.s32.totalorder %s1248_s1, %s5014_s21  ;;  %s5021_s11 = scalar_lea.vmem %s1248_s1, 32 }
 0x12f   : > { %p5022_p6 = scmp.lt.s32.totalorder %s1248_s1, %s1248_s1  ;;  %p5023_p10 = scmp.lt.s32.totalorder %s5021_s11, %s5014_s21 }
 0x130   : > { %p5017_p4 = pnand %p5015_p9, %p5633_p13 }
 0x131   : > { %p5024_p7 = por %p5023_p10, %p5022_p6 }
 0x132   : > { %p5018_p5 = pneg %p5017_p4 }
 0x133   : > { %4320 = dma.hbm_to_vmem [thread:$0]  (!%p5625_p12), %s6196_s7, 16, %s1199_s8, [#allocation18]  }
 0x134   : > { %p5025_p8 = pnand %p5024_p7, %p5018_p5 }
 0x136   : > { %5028 = shalt.err (!%p5025_p8)
}
 0x137   : > { %s6197_s3 = sld [smem:[#allocation72_spill]]  ;;  %s5331_s26 = smov [#allocation25]  }
 0x138   : > { %s1275_s2 = sshll.u32 %s5331_s26, 4  ;;  %s5332_s8 = smov [#allocation28]   ;;  %s1276_s2 = int_to_ptr.vmem [resolvable:$true] %s1275_s2 }
 0x139   : > { %s1300_s16 = sshll.u32 %s5332_s8, 4  ;;  %s5040_s10 = scalar_lea.vmem %s1276_s2, 16  ;;  %s1301_s16 = int_to_ptr.vmem [resolvable:$true] %s1300_s16 }
 0x13a   : > { %p5041_p11 = scmp.ne.s32.totalorder %s1276_s2, %s5040_s10  ;;  %s5047_s7 = scalar_lea.vmem %s1276_s2, 32 }
 0x13b   : > { %p5048_p2 = scmp.lt.s32.totalorder %s1276_s2, %s1276_s2  ;;  %p5049_p3 = scmp.lt.s32.totalorder %s5047_s7, %s5040_s10 }
 0x13c   : > { %p5043_p0 = pnand %p5041_p11, %p5633_p13 }
 0x13d   : > { %4326 = dma.hbm_to_vmem [thread:$0]  (!%p5625_p12), %s6197_s3, 16, %s1248_s1, [#allocation21]  }
 0x13e   : > { %p5044_p1 = pneg %p5043_p0  ;;  %p5050_p9 = por %p5049_p3, %p5048_p2 }
 0x140   : > { %p5051_p4 = pnand %p5050_p9, %p5044_p1 }
 0x142   : > { %5054 = shalt.err (!%p5051_p4)
}
 0x143   : > { %s6198_s21 = sld [smem:[#allocation75_spill]]  ;;  %s5066_s1 = scalar_lea.vmem %s1301_s16, 16 }
 0x144   : > { %p5067_p5 = scmp.ne.s32.totalorder %s1301_s16, %s5066_s1  ;;  %s5073_s11 = scalar_lea.vmem %s1301_s16, 32 }
 0x145   : > { %p5074_p7 = scmp.lt.s32.totalorder %s1301_s16, %s1301_s16  ;;  %p5075_p8 = scmp.lt.s32.totalorder %s5073_s11, %s5066_s1 }
 0x146   : > { %p5069_p6 = pnand %p5067_p5, %p5633_p13 }
 0x147   : > { %p5076_p11 = por %p5075_p8, %p5074_p7 }
 0x148   : > { %p5070_p10 = pneg %p5069_p6 }
 0x149   : > { %4332 = dma.hbm_to_vmem [thread:$0]  (!%p5625_p12), %s6198_s21, 16, %s1276_s2, [#allocation24]  }
 0x14a   : > { %p5077_p0 = pnand %p5076_p11, %p5070_p10 }
 0x14c   : > { %5080 = shalt.err (!%p5077_p0)
}
 0x14d   : > { %s6199_s3 = sld [smem:[#allocation77_spill]]  ;;  %s5333_s26 = smov [#allocation31]  }
 0x14e   : > { %s1324_s8 = sshll.u32 %s5333_s26, 4  ;;  %s5334_s2 = smov [#allocation34]   ;;  %s1325_s8 = int_to_ptr.vmem [resolvable:$true] %s1324_s8 }
 0x14f   : > { %s1348_s10 = sshll.u32 %s5334_s2, 4  ;;  %s5092_s7 = scalar_lea.vmem %s1325_s8, 16  ;;  %s1349_s10 = int_to_ptr.vmem [resolvable:$true] %s1348_s10 }
 0x150   : > { %p5093_p1 = scmp.ne.s32.totalorder %s1325_s8, %s5092_s7  ;;  %s5099_s21 = scalar_lea.vmem %s1325_s8, 32 }
 0x151   : > { %p5100_p9 = scmp.lt.s32.totalorder %s1325_s8, %s1325_s8  ;;  %p5101_p4 = scmp.lt.s32.totalorder %s5099_s21, %s5092_s7 }
 0x152   : > { %p5095_p2 = pnand %p5093_p1, %p5633_p13 }
 0x153   : > { %4338 = dma.hbm_to_vmem [thread:$0]  (!%p5625_p12), %s6199_s3, 16, %s1301_s16, [#allocation27]  }
 0x154   : > { %p5096_p3 = pneg %p5095_p2  ;;  %p5102_p5 = por %p5101_p4, %p5100_p9 }
 0x156   : > { %p5103_p6 = pnand %p5102_p5, %p5096_p3 }
 0x158   : > { %5106 = shalt.err (!%p5103_p6)
}
 0x159   : > { %s6200_s1 = sld [smem:[#allocation78_spill]]  ;;  %s5118_s16 = scalar_lea.vmem %s1349_s10, 256 }
 0x15a   : > { %p5119_p10 = scmp.ne.s32.totalorder %s1349_s10, %s5118_s16  ;;  %p5126_p11 = scmp.lt.s32.totalorder %s1349_s10, %s1349_s10 }
 0x15b   : > { %p5127_p0 = scmp.lt.s32.totalorder %s5118_s16, %s5118_s16 }
 0x15c   : > { %p5121_p7 = pnand %p5119_p10, %p5633_p13 }
 0x15d   : > { %p5128_p1 = por %p5127_p0, %p5126_p11 }
 0x15e   : > { %p5122_p8 = pneg %p5121_p7 }
 0x15f   : > { %4344 = dma.hbm_to_vmem [thread:$0]  (!%p5625_p12), %s6200_s1, 16, %s1325_s8, [#allocation30]  }
 0x160   : > { %p5129_p2 = pnand %p5128_p1, %p5122_p8 }
 0x162   : > { %5132 = shalt.err (!%p5129_p2)
}
 0x163   : > { %s6201_s11 = smov 4   ;;  %s6202_s3 = smov 64  }
 0x164   : > { %s6203_s4 = sld [smem:[#allocation80_spill]]  ;;  %s5335_s26 = smov [#allocation35]  }
 0x165   : > { %s1362_s8 = sshll.u32 %s5335_s26, 4  ;;  %s1363_s8 = int_to_ptr.vmem [resolvable:$true] %s1362_s8 }
 0x166   : > { %s5144_s2 = scalar_lea.vmem %s1363_s8, 16  ;;  %s5151_s7 = scalar_lea.vmem %s1363_s8, 32 }
 0x167   : > { %p5145_p3 = scmp.ne.s32.totalorder %s1363_s8, %s5144_s2  ;;  %p5152_p5 = scmp.lt.s32.totalorder %s1363_s8, %s1363_s8 }
 0x168   : > { %p5153_p6 = scmp.lt.s32.totalorder %s5151_s7, %s5144_s2 }
 0x169   : > { %p5147_p9 = pnand %p5145_p3, %p5633_p13 }
 0x16a   : > { %4350 = dma.hbm_to_vmem [thread:$0]  (!%p5625_p12), %s6203_s4, 256, %s1349_s10, [#allocation33], %s6202_s3, %s6202_s3, %s6201_s11  }
 0x16b   : > { %p5148_p4 = pneg %p5147_p9  ;;  %p5154_p10 = por %p5153_p6, %p5152_p5 }
 0x16d   : > { %p5155_p7 = pnand %p5154_p10, %p5148_p4 }
 0x16f   : > { %5158 = shalt.err (!%p5155_p7)
}
 0x170   : > { %4353 = dma.hbm_to_vmem [thread:$0]  (!%p5625_p12), %s5556_s27, 16, %s1363_s8, [#allocation36]  }
 0x171   : > { %p6204_p8 = scmp.ne.s32.totalorder %s6189_s18, 0 }
 0x172   : > { %p6205_p11 = scmp.eq.s32.totalorder (!%p6204_p8), %s5589_s28, 0 }
 0x173   : > { %1382 = sbr.rel (%p6204_p8) target bundleno = 6310 (0x18a6), region = 188 }
 0x178   : > { %5202 = dma.done.wait (%p6205_p11), [#allocation3], 16   ;;  %p6206_p0 = pmov %p6205_p11 }
 0x17a   : > { %5204 = vsyncadd (%p6206_p0), [#allocation3], 4294967280  ;;  %p6207_p13 = pmov %p6206_p0 }
 0x17b   : > { %p6208_p1 = pmov %p6206_p0 }
 0x17c   : > { %5206 = dma.done.wait (%p6207_p13), [#allocation6], 32  }
 0x17d   : > { %5208 = vsyncadd (%p6208_p1), [#allocation6], 4294967264  ;;  %p6209_p2 = pmov %p6206_p0 }
 0x17e   : > { %p6210_p12 = pmov %p6206_p0 }
 0x17f   : > { %5210 = dma.done.wait (%p6209_p2), [#allocation9], 32  }
 0x180   : > { %5212 = vsyncadd (%p6210_p12), [#allocation9], 4294967264  ;;  %p6211_p3 = pmov %p6206_p0 }
 0x181   : > { %p6212_p9 = pmov %p6206_p0 }
 0x182   : > { %5214 = dma.done.wait (%p6211_p3), [#allocation12], 32  }
 0x183   : > { %5216 = vsyncadd (%p6212_p9), [#allocation12], 4294967264  ;;  %p6213_p4 = pmov %p6206_p0 }
 0x184   : > { %p6214_p5 = pmov %p6206_p0 }
 0x185   : > { %5218 = dma.done.wait (%p6213_p4), [#allocation15], 32  }
 0x186   : > { %5220 = vsyncadd (%p6214_p5), [#allocation15], 4294967264  ;;  %p6215_p6 = pmov %p6206_p0 }
 0x187   : > { %p6216_p10 = pmov %p6206_p0 }
 0x188   : > { %5222 = dma.done.wait (%p6215_p6), [#allocation18], 32  }
 0x189   : > { %5224 = vsyncadd (%p6216_p10), [#allocation18], 4294967264  ;;  %p6217_p7 = pmov %p6206_p0 }
 0x18a   : > { %p6218_p8 = pmov %p6206_p0 }
 0x18b   : > { %5226 = dma.done.wait (%p6217_p7), [#allocation21], 32  }
 0x18c   : > { %5228 = vsyncadd (%p6218_p8), [#allocation21], 4294967264  ;;  %p6219_p11 = pmov %p6206_p0 }
 0x18e   : > { %5230 = dma.done.wait (%p6219_p11), [#allocation24], 32  }
 0x18f   : > { %5232 = vsyncadd (%p6206_p0), [#allocation24], 4294967264  ;;  %p6220_p13 = pmov %p6206_p0 }
 0x190   : > { %p6221_p1 = pmov %p6206_p0 }
 0x191   : > { %5234 = dma.done.wait (%p6220_p13), [#allocation27], 32  }
 0x192   : > { %5236 = vsyncadd (%p6221_p1), [#allocation27], 4294967264  ;;  %p6222_p2 = pmov %p6206_p0 }
 0x193   : > { %p6223_p12 = pmov %p6206_p0 }
 0x194   : > { %5238 = dma.done.wait (%p6222_p2), [#allocation30], 272  }
 0x195   : > { %5240 = vsyncadd (%p6223_p12), [#allocation30], 4294967024  ;;  %p6224_p3 = pmov %p6206_p0 }
 0x196   : > { %p6225_p9 = pmov %p6206_p0 }
 0x197   : > { %5242 = dma.done.wait (%p6224_p3), [#allocation33], 272  }
 0x198   : > { %5244 = vsyncadd (%p6225_p9), [#allocation33], 4294967024  ;;  %p6226_p4 = pmov %p6206_p0 }
 0x199   : > { %p6227_p5 = pmov %p6206_p0 }
 0x19a   : > { %5246 = dma.done.wait (%p6226_p4), [#allocation36], 16  }
 0x19b   : > { %5248 = vsyncadd (%p6227_p5), [#allocation36], 4294967280  ;;  %s6228_s22 = sld [smem:[#allocation51_spill]]  ;;  %p1573_p6 = scmp.lt.s32.totalorder %s5589_s28, 1  ;;  %v5336_v0 = vmov 0.0   ;;  %vm5337_vm0 = vmmov 0  }
 0x19c   : > { %s6229_s0 = sld [smem:[#allocation52_spill]]  ;;  %4013 = vmatprep.subr.bf16.mxu0 %v5336_v0  ;;  %4015 = vmatprep.mubr.msk.bf16.mxu0 %vm5337_vm0, %v5336_v0  ;;  %vm1599_vm1 = vcmask 130048   ;;  %vm1645_vm2 = vcmask 261120   ;;  %v5338_v20 = vmov 0   ;;  %v3844_v27 = vld [vmem:[#allocation7] ss:$0 sm:$0xff] }
 0x19d   : > { %s6230_s18 = sld [smem:[#allocation53_spill]]  ;;  %4019 = vmatprep.subr.bf16.mxu1 %v5336_v0  ;;  %4023 = vmatprep.mubr.msk.bf16.mxu1 %vm5337_vm0, %v5336_v0  ;;  %v3850_v28 = vld [vmem:[#allocation2] ss:$0 sm:$0xff]  ;;  %v3845_v30 = vld [vmem:[#allocation8] ss:$0 sm:$0xff]  ;;  %s6141_s3 = smov 64  }
 0x19e   : > { %s5814_s10 = scalar_select %p1573_p6, %s5589_s28, 1  ;;  %v3851_v31 = vld [vmem:[#allocation5] ss:$0 sm:$0xff]  ;;  %v3857_v38 = vld [vmem:[#allocation14] ss:$0 sm:$0xff]  ;;  %vm1911_vm3 = vcmask 1043456  }
 0x19f   : > { %s6231_s16 = sld [smem:[#allocation58_spill]]  ;;  %v3858_v41 = vld [vmem:[#allocation16] ss:$0 sm:$0xff]  ;;  %s6143_s26 = smov 96   ;;  %vm1895_vm4 = vcmask 64512   ;;  %vm2113_vm5 = vcmask 523264  }
 0x1a0   : > { %s6140_s21 = sshll.u32 %s5814_s10, 3  ;;  %s6232_s11 = sld [smem:[#allocation57_spill]] }
 0x1a1   : > { %s1576_s1 = scalar_lea.vmem %s6228_s22, %s6140_s21  ;;  %s6142_s8 = smov 32  }
 0x1a2   : > { %v4508_v1 = vld [vmem:[%s6229_s0] sm:$0xff]   ;;  %s6233_s2 = sld [smem:[#allocation60_spill]]  ;;  %p6260_p7 = scmp.ne.s32.totalorder %s6186_s15, 0 }
 0x1a3   : > { %v1582_v2 = vld [vmem:[%s1576_s1] sm:$0xff]  ;;  %4014 = vmatpush3.bf16.msra.mxu0 %v4508_v1  ;;  %s6234_s7 = sld [smem:[#allocation61_spill]] }
 0x1a4   : > { %v1586_v3 = vpack.c.bf16 %v1582_v2, %v1582_v2  ;;  %v3841_v4 = vld [vmem:[%s6230_s18] ss:$0 sm:$0xff]  ;;  %s6235_s22 = sld [smem:[#allocation63_spill]] }
 0x1a5   : > { %v4509_v16 = vld [vmem:[%s6231_s16 + $0x10] ss:$8 sps:$4 sm:$0xff]   ;;  %v4511_v17 = vld [vmem:[%s6231_s16 + $0x14] ss:$8 sps:$4 sm:$0xff]   ;;  %v4515_v19 = vld [vmem:[%s6231_s16 + $0x4] ss:$8 sps:$4 sm:$0xff]  }
 0x1a6   : > { %4016 = vmatmul.mubr.msk.bf16.vlgmr.msra.gmra.mxu0 %vm1599_vm1, %v1586_v3  ;;  %v4512_v18 = vld [vmem:[%s6232_s11 + $0x8] sm:$0xff]   ;;  %1797 = vmatprep.subr.bf16.mxu0 %v4511_v17  ;;  %v4516_v21 = vld [vmem:[%s6232_s11] sm:$0xff]   ;;  %s6237_s0 = sld [smem:[#allocation64_spill]] }
 0x1a7   : > { %1817 = vmatprep.mubr.bf16.mxu0 %v5338_v20  ;;  %4020 = vmatpush3.bf16.msra.mxu1 %v4512_v18  ;;  %v4513_v22 = vld [vmem:[%s6231_s16] ss:$8 sps:$4 sm:$0xff]   ;;  %s6255_s6 = sld [smem:[#allocation81_spill]] }
 0x1a8   : > { %1798 = vmatpush1.bf16.msra.mxu0 %v4509_v16  ;;  %4021 = vmatprep.subr.bf16.mxu1 %v5336_v0 }
 0x1a9   : > { %1799 = vmatprep.subr.bf16.mxu0 %v4515_v19 }
 0x1aa   : > { %s6236_s18 = smov %s6235_s22 }
 0x1ab   : > { %4022 = vmatpush3.bf16.msra.mxu1 %v4516_v21 }
 0x1ac   : > { %1800 = vmatpush1.bf16.msra.mxu0 %v4513_v22  ;;  %4027 = vmatprep.subr.bf16.mxu1 %v5336_v0  ;;  %s6238_s1 = smov %s6237_s0 }
 0x1ad   : > { %4033 = vmatprep.subr.bf16.mxu0 %v5336_v0 }
 0x266   : > { %v1637_v5 = vpop.f32.mrf.mxu0 }
 0x267   : > { %v1638_v6 = vadd.f32 %v3841_v4, %v1637_v5 }
 0x268   : > { %v4017_v7 = vpop.f32.mrf.mxu0 }
 0x269   : > { %v1646_v8 = vsel %vm1645_vm2, %v1638_v6, 0.0 }
 0x26a   : > { %1647 = vadd.xlane.f32.xlu0 %v1646_v8  ;;  %v1640_v9 = vpop.f32.mrf.mxu0 }
 0x26c   : > { %v4018_v10 = vpop.f32.mrf.mxu0 }
 0x2f3   : > { %v1648_v11 = vpop.xlane.xlu0 %1647 }
 0x2f4   : > { %v1650_v12 = vmul.f32 0.03125, %v1648_v11 }
 0x2f6   : > { %v1651_v13 = vsub.f32 %v1638_v6, %v1650_v12 }
 0x2f8   : > { %v1652_v14 = vmul.f32 %v1651_v13, %v1651_v13 }
 0x2fa   : > { %v1653_v15 = vsel %vm1645_vm2, %v1652_v14, 0.0 }
 0x2fb   : > { %1654 = vadd.xlane.f32.xlu0 %v1653_v15 }
 0x384   : > { %v1655_v23 = vpop.xlane.xlu0 %1654 }
 0x385   : > { %v1656_v24 = vmul.f32 0.03125, %v1655_v23 }
 0x387   : > { %v1657_v25 = vadd.f32 1e-05, %v1656_v24 }
 0x389   : > { %4559 = vrsqrt.f32 %v1657_v25 }
 0x396   : > { %v4560_v26 = vpop.eup %4559 }
 0x397   : > { %v1659_v29 = vmul.f32 %v4560_v26, %v1651_v13 }
 0x399   : > { %v1666_v32 = vmul.f32 %v3844_v27, %v1659_v29  ;;  %v1749_v33 = vmul.f32 %v3850_v28, %v1659_v29  ;;  %v4517_v29 = vld [vmem:[%s6233_s2 + $0x18] sm:$0xff]  }
 0x39b   : > { %v1673_v34 = vadd.f32 %v3845_v30, %v1666_v32  ;;  %v1756_v35 = vadd.f32 %v3851_v31, %v1749_v33  ;;  %v4518_v30 = vld [vmem:[%s6233_s2 + $0x10] sm:$0xff]   ;;  %v4519_v31 = vld [vmem:[%s6233_s2 + $0x8] sm:$0xff]   ;;  %v4520_v32 = vld [vmem:[%s6233_s2] sm:$0xff]  }
 0x39d   : > { %v1679_v36 = vpack.c.bf16 %v1673_v34, %v1673_v34  ;;  %v1757_v37 = vpack.c.bf16 %v1756_v35, %v1756_v35 }
 0x39f   : > { %4024 = vmatmul.mubr.msk.bf16.vlgmr.msra.gmra.mxu1 %vm1645_vm2, %v1679_v36  ;;  %3856 = vmatmul.mubr.msk.bf16.vlgmr.msra.gmra.mxu0 %vm1645_vm2, %v1757_v37 }
 0x3a0   : > { %4029 = vmatprep.mubr.msk.bf16.mxu1 %vm5337_vm0, %v5336_v0  ;;  %4035 = vmatprep.mubr.msk.bf16.mxu0 %vm5337_vm0, %v5336_v0 }
 0x45f   : > { %v5843_v39 = vpop.f32.mrf.mxu1  ;;  %v1819_v40 = vpop.f32.mrf.mxu0 }
 0x460   : > { %v1833_v42 = vadd.f32 %v3857_v38, %v1819_v40  ;;  %v1843_v43 = vpack.c.bf16 %v1819_v40, %v1819_v40 }
 0x461   : > { %v4025_v44 = vpop.f32.mrf.mxu1  ;;  %v1821_v45 = vpop.f32.mrf.mxu0 }
 0x462   : > { %v1842_v46 = vpack.c.bf16 %v1833_v42, %v1833_v42  ;;  %v1841_v47 = vadd.f32 %v3858_v41, %v1821_v45  ;;  %1846 = vrot.lane.b32.xlu1 %v1843_v43, %s6141_s3  ;;  %v3846_v45 = vld [vmem:[#allocation13] ss:$0 sm:$0xff] }
 0x463   : > { %v1738_v48 = vpop.f32.mrf.mxu1  ;;  %v1823_v49 = vpop.f32.mrf.mxu0 }
 0x464   : > { %v1844_v50 = vpack.c.bf16 %v1841_v47, %v1841_v47  ;;  %1956 = vrot.lane.b32.xlu0 %v1842_v46, %s6143_s26  ;;  %v1736_v48 = vadd.f32 %v3846_v45, %v5843_v39 }
 0x465   : > { %v4026_v51 = vpop.f32.mrf.mxu1  ;;  %v1824_v52 = vpop.f32.mrf.mxu0 }
 0x466   : > { %v1913_v53 = vsel %vm1911_vm3, %v1844_v50, 0  ;;  %1958 = vrot.lane.b32.xlu1 %v1843_v43, %s6142_s8 }
 0x467   : > { %4034 = vmatpush3.bf16.msra.mxu0 %v1913_v53 }
 0x468   : > { %4045 = vmatprep.subr.bf16.mxu0 %v5336_v0 }
 0x4d4   : > { %v1847_v54 = vpop.permute.xlu1 %1846 }
 0x4d5   : > { %v1852_v55 = vsel %vm1645_vm2, %v1847_v54, 0 }
 0x4d6   : > { %4028 = vmatpush3.bf16.xpose.msra.mxu1 %v1852_v55  ;;  %v1957_v58 = vpop.permute.xlu0 %1956 }
 0x4d7   : > { %4039 = vmatprep.subr.bf16.mxu1 %v5336_v0 }
 0x4d8   : > { %v1959_v56 = vpop.permute.xlu1 %1958 }
 0x4d9   : > { %v1964_v57 = vsel %vm1645_vm2, %v1959_v56, 0 }
 0x4dd   : > { %4030 = vmatmul.mubr.msk.bf16.vlgmr.msra.gmra.mxu1 %vm1645_vm2, %v1842_v46  ;;  %v3863_v46 = vld [vmem:[#allocation17] ss:$0 sm:$0xff] }
 0x4de   : > { %4040 = vmatpush3.bf16.xpose.msra.mxu1 %v1964_v57  ;;  %4041 = vmatprep.mubr.msk.bf16.mxu1 %vm5337_vm0, %v5336_v0 }
 0x4df   : > { %4051 = vmatprep.subr.bf16.mxu1 %v5336_v0 }
 0x4e5   : > { %4042 = vmatmul.mubr.msk.bf16.vlgmr.msra.gmra.mxu1 %vm1645_vm2, %v1957_v58 }
 0x4e6   : > { %4059 = vmatprep.mubr.msk.bf16.mxu1 %vm5337_vm0, %v5336_v0  ;;  %4052 = vmatpush3.bf16.msra.mxu1 %v4517_v29 }
 0x4e7   : > { %4053 = vmatprep.subr.bf16.mxu1 %v5336_v0 }
 0x4ea   : > { %4054 = vmatpush3.bf16.msra.mxu1 %v4518_v30 }
 0x4eb   : > { %4055 = vmatprep.subr.bf16.mxu1 %v5336_v0 }
 0x4ee   : > { %4056 = vmatpush3.bf16.msra.mxu1 %v4519_v31 }
 0x4ef   : > { %4057 = vmatprep.subr.bf16.mxu1 %v5336_v0 }
 0x4f2   : > { %4058 = vmatpush3.bf16.msra.mxu1 %v4520_v32 }
 0x4f3   : > { %4075 = vmatprep.subr.bf16.mxu1 %v5336_v0 }
 0x59d   : > { %v1888_v59 = vpop.f32.mrf.mxu1 }
 0x59e   : > { %v1894_v60 = vmul.f32 0.17677669, %v1888_v59  ;;  %v4521_v59 = vld [vmem:[%s6234_s7 + $0x18] sm:$0xff]  }
 0x59f   : > { %v4031_v61 = vpop.f32.mrf.mxu1 }
 0x5a0   : > { %v1896_v62 = vsel %vm1895_vm4, %v1894_v60, -inf  ;;  %v4523_v61 = vld [vmem:[%s6234_s7 + $0x8] sm:$0xff]  }
 0x5a1   : > { %1897 = vmax.xlane.f32.xlu1 %v1896_v62  ;;  %v1891_v63 = vpop.f32.mrf.mxu1  ;;  %v4524_v62 = vld [vmem:[%s6234_s7] sm:$0xff]  }
 0x5a3   : > { %v4032_v1 = vpop.f32.mrf.mxu1 }
 0x5a5   : > { %v2000_v2 = vpop.f32.mrf.mxu1 }
 0x5a6   : > { %v2006_v3 = vmul.f32 0.17677669, %v2000_v2 }
 0x5a7   : > { %v4043_v4 = vpop.f32.mrf.mxu1 }
 0x5a8   : > { %v2007_v5 = vsel %vm1895_vm4, %v2006_v3, -inf  ;;  %v3869_v4 = vld [vmem:[#allocation10] ss:$0 sm:$0xff] }
 0x5a9   : > { %2008 = vmax.xlane.f32.xlu0 %v2007_v5  ;;  %v2003_v6 = vpop.f32.mrf.mxu1 }
 0x5aa   : > { %v3870_v6 = vld [vmem:[#allocation11] ss:$0 sm:$0xff] }
 0x5ab   : > { %v4044_v7 = vpop.f32.mrf.mxu1 }
 0x62a   : > { %v1898_v8 = vpop.xlane.xlu1 %1897 }
 0x62b   : > { %v1899_v9 = vsub.f32 %v1894_v60, %v1898_v8  ;;  %v4522_v60 = vld [vmem:[%s6234_s7 + $0x10] sm:$0xff]  }
 0x62d   : > { %v1900_v10 = vmul.f32 1.442695, %v1899_v9 }
 0x62f   : > { %4561 = vpow2.f32 %v1900_v10  ;;  %v4525_v10 = vld [vmem:[%s6235_s22 + $0x38] sm:$0xff]   ;;  %s6239_s22 = sld [smem:[#allocation66_spill]] }
 0x632   : > { %v2009_v11 = vpop.xlane.xlu0 %2008 }
 0x633   : > { %v2010_v12 = vsub.f32 %v2006_v3, %v2009_v11  ;;  %v4526_v11 = vld [vmem:[%s6236_s18 + $0x30] sm:$0xff]  }
 0x635   : > { %v2011_v13 = vmul.f32 1.442695, %v2010_v12  ;;  %v4527_v12 = vld [vmem:[%s6236_s18 + $0x28] sm:$0xff]  }
 0x637   : > { %4563 = vpow2.f32 %v2011_v13  ;;  %v4528_v13 = vld [vmem:[%s6236_s18 + $0x20] sm:$0xff]  }
 0x63c   : > { %v4562_v14 = vpop.eup %4561 }
 0x63d   : > { %v1902_v15 = vsel %vm1895_vm4, %v4562_v14, 0.0 }
 0x63e   : > { %1903 = vadd.xlane.f32.xlu1 %v1902_v15  ;;  %v4530_v15 = vld [vmem:[%s6236_s18 + $0x10] sm:$0xff]  }
 0x644   : > { %v4564_v16 = vpop.eup %4563 }
 0x645   : > { %v2013_v17 = vsel %vm1895_vm4, %v4564_v16, 0.0 }
 0x646   : > { %2014 = vadd.xlane.f32.xlu1 %v2013_v17  ;;  %v4532_v17 = vld [vmem:[%s6236_s18] sm:$0xff]  }
 0x657   : > { %2020 = vrot.lane.b32.xlu1 %v1844_v50, %s6143_s26  ;;  %s6248_s26 = sld [smem:[#allocation70_spill]] }
 0x6c7   : > { %v1904_v18 = vpop.xlane.xlu1 %1903 }
 0x6c8   : > { %4565 = vrcp.f32 %v1904_v18  ;;  %v2400_v18 = vld [vmem:[%s6237_s0 + $0x38] sm:$0xff]  ;;  %s6240_s0 = sld [smem:[#allocation65_spill]] }
 0x6ce   : > { %s6241_s21 = smov %s6240_s0 }
 0x6cf   : > { %v2015_v19 = vpop.xlane.xlu1 %2014 }
 0x6d0   : > { %4567 = vrcp.f32 %v2015_v19  ;;  %v2399_v19 = vld [vmem:[%s6238_s1 + $0x30] sm:$0xff] }
 0x6d3   : > { %v2021_v23 = vpop.permute.xlu1 %2020 }
 0x6d4   : > { %v2026_v25 = vsel %vm1911_vm3, %v2021_v23, 0  ;;  %v2396_v23 = vld [vmem:[%s6238_s1 + $0x18] sm:$0xff] }
 0x6d5   : > { %v4566_v21 = vpop.eup %4565 }
 0x6d6   : > { %v1906_v22 = vmul.f32 %v4566_v21, %v4562_v14  ;;  %v4529_v14 = vld [vmem:[%s6236_s18 + $0x18] sm:$0xff]   ;;  %v2398_v21 = vld [vmem:[%s6238_s1 + $0x28] sm:$0xff] }
 0x6d8   : > { %v1907_v24 = vpack.c.bf16 %v1906_v22, %v1906_v22  ;;  %v2397_v22 = vld [vmem:[%s6238_s1 + $0x20] sm:$0xff] }
 0x6da   : > { %4036 = vmatmul.mubr.msk.bf16.vlgmr.msra.gmra.mxu0 %vm1895_vm4, %v1907_v24  ;;  %v3871_v24 = vld [vmem:[#allocation19] ss:$0 sm:$0xff] }
 0x6db   : > { %4046 = vmatpush3.bf16.msra.mxu0 %v2026_v25  ;;  %4047 = vmatprep.mubr.msk.bf16.mxu0 %vm5337_vm0, %v5336_v0 }
 0x6dc   : > { %4063 = vmatprep.subr.bf16.mxu0 %v5336_v0 }
 0x6dd   : > { %v4568_v26 = vpop.eup %4567 }
 0x6de   : > { %v2017_v27 = vmul.f32 %v4568_v26, %v4564_v16  ;;  %v4531_v16 = vld [vmem:[%s6236_s18 + $0x8] sm:$0xff]  }
 0x6e0   : > { %v2018_v28 = vpack.c.bf16 %v2017_v27, %v2017_v27 }
 0x6e2   : > { %4048 = vmatmul.mubr.msk.bf16.vlgmr.msra.gmra.mxu0 %vm1895_vm4, %v2018_v28 }
 0x6e3   : > { %4071 = vmatprep.mubr.msk.bf16.mxu0 %vm5337_vm0, %v5336_v0  ;;  %4064 = vmatpush3.bf16.msra.mxu0 %v4521_v59 }
 0x6e4   : > { %4065 = vmatprep.subr.bf16.mxu0 %v5336_v0 }
 0x6e7   : > { %4066 = vmatpush3.bf16.msra.mxu0 %v4522_v60 }
 0x6e8   : > { %4067 = vmatprep.subr.bf16.mxu0 %v5336_v0 }
 0x6eb   : > { %4068 = vmatpush3.bf16.msra.mxu0 %v4523_v61 }
 0x6ec   : > { %4069 = vmatprep.subr.bf16.mxu0 %v5336_v0 }
 0x6ef   : > { %4070 = vmatpush3.bf16.msra.mxu0 %v4524_v62 }
 0x6f0   : > { %4095 = vmatprep.subr.mxu0 %v5336_v0 }
 0x79a   : > { %v1949_v33 = vpop.f32.mrf.mxu0 }
 0x79c   : > { %v4037_v34 = vpop.f32.mrf.mxu0 }
 0x79e   : > { %v1952_v35 = vpop.f32.mrf.mxu0 }
 0x7a0   : > { %v4038_v36 = vpop.f32.mrf.mxu0 }
 0x7a2   : > { %v2062_v37 = vpop.f32.mrf.mxu0 }
 0x7a3   : > { %2069 = vrot.lane.b32.xlu0 %v2062_v37, %s6142_s8 }
 0x7a4   : > { %v4049_v38 = vpop.f32.mrf.mxu0 }
 0x7a6   : > { %v2065_v40 = vpop.f32.mrf.mxu0 }
 0x7a8   : > { %v4050_v41 = vpop.f32.mrf.mxu0 }
 0x7a9   : > { %v2395_v41 = vld [vmem:[%s6238_s1 + $0x10] sm:$0xff] }
 0x815   : > { %v2070_v42 = vpop.permute.xlu0 %2069 }
 0x816   : > { %v2072_v43 = vsel %vm1645_vm2, %v1949_v33, %v2070_v42  ;;  %v2394_v42 = vld [vmem:[%s6238_s1 + $0x8] sm:$0xff] }
 0x817   : > { %v2082_v44 = vpack.c.bf16 %v2072_v43, %v2072_v43  ;;  %v2393_v43 = vld [vmem:[%s6238_s1] sm:$0xff]  ;;  %s6249_s1 = sld [smem:[#allocation68_spill]] }
 0x819   : > { %4060 = vmatmul.mubr.msk.bf16.vlgmr.msra.gmra.mxu1 %vm2113_vm5, %v2082_v44  ;;  %v3877_v44 = vld [vmem:[#allocation20] ss:$0 sm:$0xff] }
 0x81a   : > { %4091 = vmatprep.mubr.msk.bf16.mxu1 %vm5337_vm0, %v5336_v0  ;;  %4076 = vmatpush3.bf16.msra.mxu1 %v4525_v10 }
 0x81b   : > { %4077 = vmatprep.subr.bf16.mxu1 %v5336_v0 }
 0x81e   : > { %4078 = vmatpush3.bf16.msra.mxu1 %v4526_v11 }
 0x81f   : > { %4079 = vmatprep.subr.bf16.mxu1 %v5336_v0 }
 0x822   : > { %4080 = vmatpush3.bf16.msra.mxu1 %v4527_v12 }
 0x823   : > { %4081 = vmatprep.subr.bf16.mxu1 %v5336_v0 }
 0x826   : > { %4082 = vmatpush3.bf16.msra.mxu1 %v4528_v13 }
 0x827   : > { %4083 = vmatprep.subr.bf16.mxu1 %v5336_v0 }
 0x82a   : > { %4084 = vmatpush3.bf16.msra.mxu1 %v4529_v14 }
 0x82b   : > { %4085 = vmatprep.subr.bf16.mxu1 %v5336_v0 }
 0x82e   : > { %4086 = vmatpush3.bf16.msra.mxu1 %v4530_v15  ;;  %v2404_v15 = vld [vmem:[%s6240_s0 + $0x18] sm:$0xff]  ;;  %s6244_s0 = sld [smem:[#allocation73_spill]] }
 0x82f   : > { %4087 = vmatprep.subr.bf16.mxu1 %v5336_v0 }
 0x832   : > { %4088 = vmatpush3.bf16.msra.mxu1 %v4531_v16  ;;  %v2403_v16 = vld [vmem:[%s6241_s21 + $0x10] sm:$0xff] }
 0x833   : > { %4089 = vmatprep.subr.bf16.mxu1 %v5336_v0 }
 0x834   : > { %s6245_s8 = smov %s6244_s0 }
 0x836   : > { %4090 = vmatpush3.bf16.msra.mxu1 %v4532_v17  ;;  %v2402_v17 = vld [vmem:[%s6241_s21 + $0x8] sm:$0xff] }
 0x8d9   : > { %v2151_v47 = vpop.f32.mrf.mxu1 }
 0x8da   : > { %v2152_v49 = vadd.f32 %v3863_v46, %v2151_v47 }
 0x8db   : > { %v4061_v50 = vpop.f32.mrf.mxu1 }
 0x8dc   : > { %v5887_v51 = vadd.f32 %v2152_v49, %v1736_v48  ;;  %v2487_v50 = vlaneseq }
 0x8dd   : > { %v2154_v52 = vpop.f32.mrf.mxu1 }
 0x8de   : > { %v2160_v53 = vsel %vm2113_vm5, %v5887_v51, 0.0  ;;  %v5943_v52 = vand.u32 127, %v2487_v50  ;;  %v4544_v50 = vld [vmem:[%s6245_s8 + $0x8] sm:$0xff]  }
 0x8df   : > { %2161 = vadd.xlane.f32.xlu1 %v2160_v53  ;;  %v4062_v54 = vpop.f32.mrf.mxu1  ;;  %v3887_v53 = vld [vmem:[%s6239_s22] ss:$0 sm:$0xff]  ;;  %s6242_s22 = sld [smem:[#allocation74_spill]] }
 0x8e0   : > { %vm2517_vm6 = vcmp.ge.s32.totalorder %v5943_v52, 16  ;;  %vm2518_vm7 = vcmp.lt.s32.totalorder %v5943_v52, 32  ;;  %vm2490_vm8 = vcmp.lt.s32.totalorder %v5943_v52, 16  ;;  %vm3424_vm1 = vcmp.eq.s32.totalorder %v5943_v52, 0 }
 0x8e1   : > { %vm2519_vm9 = vmand %vm2517_vm6, %vm2518_vm7 }
 0x8e5   : > { %s6243_s3 = smov %s6242_s22 }
 0x968   : > { %v2162_v55 = vpop.xlane.xlu1 %2161 }
 0x969   : > { %v2164_v56 = vmul.f32 0.015625, %v2162_v55 }
 0x96b   : > { %v2165_v57 = vsub.f32 %v5887_v51, %v2164_v56 }
 0x96d   : > { %v2166_v58 = vmul.f32 %v2165_v57, %v2165_v57 }
 0x96f   : > { %v2167_v39 = vsel %vm2113_vm5, %v2166_v58, 0.0 }
 0x970   : > { %2168 = vadd.xlane.f32.xlu0 %v2167_v39 }
 0x9f9   : > { %v2169_v63 = vpop.xlane.xlu0 %2168 }
 0x9fa   : > { %v2170_v1 = vmul.f32 0.015625, %v2169_v63 }
 0x9fc   : > { %v2171_v2 = vadd.f32 1e-05, %v2170_v1 }
 0x9fe   : > { %4569 = vrsqrt.f32 %v2171_v2 }
 0xa0b   : > { %v4570_v3 = vpop.eup %4569 }
 0xa0c   : > { %v2173_v5 = vmul.f32 %v4570_v3, %v2165_v57 }
 0xa0e   : > { %v2180_v7 = vmul.f32 %v3869_v4, %v2173_v5 }
 0xa10   : > { %v2187_v8 = vadd.f32 %v3870_v6, %v2180_v7 }
 0xa12   : > { %v2197_v9 = vpack.c.bf16 %v2187_v8, %v2187_v8 }
 0xa14   : > { %4072 = vmatmul.mubr.msk.bf16.vlgmr.msra.gmra.mxu0 %vm2113_vm5, %v2197_v9 }
 0xa15   : > { %4111 = vmatprep.mubr.msk.f32.mxu0 %vm5337_vm0, %v5336_v0  ;;  %4096 = vmatpush3.msra.mxu0 %v2400_v18  ;;  %v2401_v18 = vld [vmem:[%s6241_s21] sm:$0xff] }
 0xa16   : > { %4097 = vmatprep.subr.mxu0 %v5336_v0 }
 0xa17   : > { %4098 = vmatpush3.msra.mxu0 %v2399_v19 }
 0xa18   : > { %4099 = vmatprep.subr.mxu0 %v5336_v0 }
 0xa19   : > { %4100 = vmatpush3.msra.mxu0 %v2398_v21 }
 0xa1a   : > { %4101 = vmatprep.subr.mxu0 %v5336_v0 }
 0xa1b   : > { %4102 = vmatpush3.msra.mxu0 %v2397_v22 }
 0xa1c   : > { %4103 = vmatprep.subr.mxu0 %v5336_v0 }
 0xa1d   : > { %4104 = vmatpush3.msra.mxu0 %v2396_v23 }
 0xa1e   : > { %4105 = vmatprep.subr.mxu0 %v5336_v0 }
 0xa1f   : > { %4106 = vmatpush3.msra.mxu0 %v2395_v41 }
 0xa20   : > { %4107 = vmatprep.subr.mxu0 %v5336_v0 }
 0xa21   : > { %4108 = vmatpush3.msra.mxu0 %v2394_v42  ;;  %v4535_v42 = vld [vmem:[%s6242_s22 + $0x34] ss:$8 sps:$4 sm:$0xff]   ;;  %s6246_s22 = sld [smem:[#allocation69_spill]] }
 0xa22   : > { %4109 = vmatprep.subr.mxu0 %v5336_v0  ;;  %2824 = vmatprep.subr.bf16.mxu1 %v4535_v42 }
 0xa23   : > { %4110 = vmatpush3.msra.mxu0 %v2393_v43  ;;  %v4533_v43 = vld [vmem:[%s6243_s3 + $0x30] ss:$8 sps:$4 sm:$0xff]  }
 0xa24   : > { %4114 = vmatprep.subr.mxu0 %v5336_v0 }
 0xad4   : > { %v2265_v25 = vpop.f32.mrf.mxu0 }
 0xad5   : > { %v2266_v26 = vadd.f32 %v3871_v24, %v2265_v25 }
 0xad6   : > { %v4073_v27 = vpop.f32.mrf.mxu0 }
 0xad7   : > { %v2271_v28 = vmul.f32 %v2266_v26, %v2266_v26 }
 0xad8   : > { %v2268_v29 = vpop.f32.mrf.mxu0 }
 0xad9   : > { %v2272_v30 = vmul.f32 %v2271_v28, %v2266_v26 }
 0xada   : > { %v4074_v31 = vpop.f32.mrf.mxu0 }
 0xadb   : > { %v2273_v32 = vmul.f32 0.044715, %v2272_v30 }
 0xadd   : > { %v2274_v33 = vadd.f32 %v2273_v32, %v2266_v26 }
 0xadf   : > { %v2275_v34 = vmul.f32 0.7978846, %v2274_v33 }
 0xae1   : > { %4571 = vtanh.f32 %v2275_v34 }
 0xaee   : > { %v4572_v35 = vpop.eup %4571 }
 0xaef   : > { %v2277_v36 = vadd.f32 1.0, %v4572_v35 }
 0xaf1   : > { %v2278_v37 = vmul.f32 0.5, %v2277_v36 }
 0xaf3   : > { %v2279_v38 = vmul.f32 %v2278_v37, %v2266_v26 }
 0xaf5   : > { %v2297_v40 = vpack.c.bf16 %v2279_v38, %v2279_v38 }
 0xaf7   : > { %4092 = vmatmul.mubr.bf16.vlgmr.msra.gmra.mxu1 %v2297_v40 }
 0xaf8   : > { %2848 = vmatprep.mubr.bf16.mxu1 %v5338_v20  ;;  %2825 = vmatpush1.bf16.msra.mxu1 %v4533_v43 }
 0xbb7   : > { %v2386_v45 = vpop.f32.mrf.mxu1 }
 0xbb8   : > { %v2387_v46 = vadd.f32 %v3877_v44, %v2386_v45  ;;  %v4536_v44 = vld [vmem:[%s6244_s0 + $0x18] sm:$0xff]   ;;  %v4539_v45 = vld [vmem:[%s6243_s3 + $0x24] ss:$8 sps:$4 sm:$0xff]   ;;  %s6247_s0 = sld [smem:[#allocation67_spill]] }
 0xbb9   : > { %v4093_v47 = vpop.f32.mrf.mxu1  ;;  %2826 = vmatprep.subr.bf16.mxu1 %v4539_v45 }
 0xbba   : > { %v5937_v48 = vadd.f32 %v2387_v46, %v5887_v51  ;;  %v4537_v46 = vld [vmem:[%s6243_s3 + $0x20] ss:$8 sps:$4 sm:$0xff]   ;;  %v4540_v47 = vld [vmem:[%s6245_s8 + $0x10] sm:$0xff]  }
 0xbbb   : > { %v2389_v20 = vpop.f32.mrf.mxu1  ;;  %2827 = vmatpush1.bf16.msra.mxu1 %v4537_v46 }
 0xbbc   : > { %4112 = vmatmul.mubr.msk.f32.vlgmr.msra.gmra.mxu0 %vm2113_vm5, %v5937_v48  ;;  %v4543_v20 = vld [vmem:[%s6243_s3 + $0x14] ss:$8 sps:$4 sm:$0xff]  }
 0xbbd   : > { %v4094_v49 = vpop.f32.mrf.mxu1  ;;  %4122 = vmatprep.mubr.msk.f32.mxu0 %vm5337_vm0, %v5336_v0  ;;  %4115 = vmatpush3.msra.mxu0 %v2404_v15 }
 0xbbe   : > { %4116 = vmatprep.subr.mxu0 %v5336_v0  ;;  %v4541_v49 = vld [vmem:[%s6243_s3 + $0x10] ss:$8 sps:$4 sm:$0xff]   ;;  %2828 = vmatprep.subr.bf16.mxu1 %v4543_v20 }
 0xbbf   : > { %4117 = vmatpush3.msra.mxu0 %v2403_v16  ;;  %2829 = vmatpush1.bf16.msra.mxu1 %v4541_v49 }
 0xbc0   : > { %4118 = vmatprep.subr.mxu0 %v5336_v0 }
 0xbc1   : > { %4119 = vmatpush3.msra.mxu0 %v2402_v17 }
 0xbc2   : > { %4120 = vmatprep.subr.mxu0 %v5336_v0 }
 0xbc3   : > { %4121 = vmatpush3.msra.mxu0 %v2401_v18  ;;  %v3911_v18 = vld [vmem:[#allocation26] ss:$0 sm:$0xff] }
 0xbc4   : > { %4125 = vmatprep.subr.bf16.mxu0 %v5336_v0 }
 0xc7c   : > { %v2475_v54 = vpop.f32.mrf.mxu0 }
 0xc7d   : > { %v2479_v55 = vmul.f32 2.0, %v2475_v54  ;;  %v4545_v54 = vld [vmem:[%s6243_s3] ss:$8 sps:$4 sm:$0xff]  }
 0xc7e   : > { %v4113_v51 = vpop.f32.mrf.mxu0 }
 0xc7f   : > { %v2486_v56 = vsub.f32 %v3887_v53, %v2479_v55  ;;  %v4547_v53 = vld [vmem:[%s6243_s3 + $0x4] ss:$8 sps:$4 sm:$0xff]  }
 0xc80   : > { %v4548_v55 = vld [vmem:[%s6245_s8] sm:$0xff]   ;;  %2830 = vmatprep.subr.bf16.mxu1 %v4547_v53 }
 0xc81   : > { %v2492_v57 = vsel %vm2490_vm8, %v2486_v56, inf  ;;  %v2520_v39 = vsel %vm2519_vm9, %v2486_v56, inf  ;;  %2831 = vmatpush1.bf16.msra.mxu1 %v4545_v54 }
 0xc82   : > { %v2493_v58 = vsel %vm1645_vm2, %v2492_v57, inf  ;;  %v2521_v59 = vsel %vm1645_vm2, %v2520_v39, inf  ;;  %4143 = vmatprep.subr.bf16.mxu1 %v5336_v0 }
 0xc83   : > { %2494 = vmin.xlane.f32.xlu1 %v2493_v58 }
 0xc87   : > { %2522 = vmin.xlane.f32.xlu1 %v2521_v59  ;;  %v3899_v59 = vld [vmem:[%s6247_s0] ss:$0 sm:$0xff]  ;;  %s6253_s0 = sld [smem:[#allocation76_spill]] }
 0xd0c   : > { %v2495_v60 = vpop.xlane.xlu1 %2494 }
 0xd0d   : > { %vm2496_vm10 = vcmp.le.f32.partialorder %v2492_v57, %v2495_v60 }
 0xd0e   : > { %v2497_v61 = vsel %vm2496_vm10, %v5943_v52, 32 }
 0xd0f   : > { %v2498_v62 = vsel %vm1645_vm2, %v2497_v61, 2147483647  ;;  %v3892_v61 = vld [vmem:[%s6248_s26] ss:$0 sm:$0xff]  ;;  %s6250_s26 = smov 32  }
 0xd10   : > { %v2523_v63 = vpop.xlane.xlu1 %2522  ;;  %v2500_v1 = vshra.s32 %v2498_v62, 16  ;;  %v2499_v7 = vand.u32 65535, %v2498_v62  ;;  %v3900_v62 = vld [vmem:[%s6249_s1] ss:$0 sm:$0xff]  ;;  %s6251_s1 = smov 64  }
 0xd11   : > { %vm2524_vm11 = vcmp.le.f32.partialorder %v2520_v39, %v2523_v63  ;;  %v3891_v39 = vld [vmem:[%s6246_s22] ss:$0 sm:$0xff]  ;;  %s6252_s22 = smov 96  }
 0xd12   : > { %v2525_v2 = vsel %vm2524_vm11, %v5943_v52, 32  ;;  %v2502_v3 = vcvt.s32.f32 %v2500_v1  ;;  %v2501_v9 = vcvt.s32.f32 %v2499_v7 }
 0xd13   : > { %v2526_v4 = vsel %vm1645_vm2, %v2525_v2, 2147483647 }
 0xd14   : > { %2503 = vmin.xlane.f32.xlu1 %v2502_v3  ;;  %v2528_v5 = vshra.s32 %v2526_v4, 16  ;;  %v2527_v10 = vand.u32 65535, %v2526_v4 }
 0xd16   : > { %v2530_v6 = vcvt.s32.f32 %v2528_v5  ;;  %v2529_v13 = vcvt.s32.f32 %v2527_v10 }
 0xd18   : > { %2531 = vmin.xlane.f32.xlu0 %v2530_v6 }
 0xd9d   : > { %v2504_v8 = vpop.xlane.xlu1 %2503 }
 0xd9e   : > { %vm2505_vm12 = vcmp.eq.f32.partialorder %v2502_v3, %v2504_v8  ;;  %v2510_v19 = vcvt.f32.s32 %v2504_v8 }
 0xd9f   : > { %v2506_v11 = vsel %vm2505_vm12, %v2501_v9, inf }
 0xda0   : > { %2507 = vmin.xlane.f32.xlu1 %v2506_v11  ;;  %v2511_v22 = vshll.u32 %v2510_v19, 16 }
 0xda1   : > { %v2532_v12 = vpop.xlane.xlu0 %2531 }
 0xda2   : > { %vm2533_vm13 = vcmp.eq.f32.partialorder %v2530_v6, %v2532_v12  ;;  %v2538_v23 = vcvt.f32.s32 %v2532_v12  ;;  %v3910_v6 = vld [vmem:[#allocation25] ss:$0 sm:$0xff] }
 0xda3   : > { %v2534_v14 = vsel %vm2533_vm13, %v2529_v13, inf }
 0xda4   : > { %2535 = vmin.xlane.f32.xlu0 %v2534_v14  ;;  %v2539_v27 = vshll.u32 %v2538_v23, 16 }
 0xe29   : > { %v2508_v21 = vpop.xlane.xlu1 %2507 }
 0xe2a   : > { %v2509_v24 = vcvt.f32.s32 %v2508_v21 }
 0xe2c   : > { %v2512_v25 = vadd.s32 %v2511_v22, %v2509_v24 }
 0xe2d   : > { %v2536_v26 = vpop.xlane.xlu0 %2535 }
 0xe2e   : > { %v2537_v28 = vcvt.f32.s32 %v2536_v26  ;;  %vm2513_vm14 = vcmp.eq.s32.totalorder %v5943_v52, %v2512_v25 }
 0xe2f   : > { %v3888_v30 = vsel %vm2513_vm14, 1.0, %v5336_v0 }
 0xe30   : > { %v2540_v29 = vadd.s32 %v2539_v27, %v2537_v28 }
 0xe32   : > { %vm2541_vm15 = vcmp.eq.s32.totalorder %v5943_v52, %v2540_v29 }
 0xe33   : > { %v3889_v31 = vsel %vm2541_vm15, 1.0, %v5336_v0 }
 0xe34   : > { %v5967_v32 = vadd.f32 %v3889_v31, %v3888_v30 }
 0xe36   : > { %4123 = vmatmul.mubr.msk.f32.vlgmr.msra.gmra.mxu0 %vm1645_vm2, %v5967_v32 }
 0xe37   : > { %4133 = vmatprep.mubr.msk.bf16.mxu0 %vm5337_vm0, %v5336_v0  ;;  %4126 = vmatpush3.bf16.msra.mxu0 %v4536_v44 }
 0xe38   : > { %4127 = vmatprep.subr.bf16.mxu0 %v5336_v0 }
 0xe3b   : > { %4128 = vmatpush3.bf16.msra.mxu0 %v4540_v47 }
 0xe3c   : > { %4129 = vmatprep.subr.bf16.mxu0 %v5336_v0 }
 0xe3f   : > { %4130 = vmatpush3.bf16.msra.mxu0 %v4544_v50 }
 0xe40   : > { %4131 = vmatprep.subr.bf16.mxu0 %v5336_v0 }
 0xe43   : > { %4132 = vmatpush3.bf16.msra.mxu0 %v4548_v55 }
 0xe44   : > { %4137 = vmatprep.subr.bf16.mxu0 %v5336_v0 }
 0xef6   : > { %v5973_v33 = vpop.f32.mrf.mxu0 }
 0xef7   : > { %v2638_v34 = vsel %vm2113_vm5, %v5973_v33, 0.0 }
 0xef8   : > { %2639 = vadd.xlane.f32.xlu1 %v2638_v34  ;;  %v4124_v35 = vpop.f32.mrf.mxu0 }
 0xf81   : > { %v2640_v36 = vpop.xlane.xlu1 %2639 }
 0xf82   : > { %v2641_v37 = vmul.f32 0.015625, %v2640_v36 }
 0xf84   : > { %v2642_v38 = vsub.f32 %v5973_v33, %v2641_v37 }
 0xf86   : > { %v2643_v40 = vmul.f32 %v2642_v38, %v2642_v38 }
 0xf88   : > { %v2644_v41 = vsel %vm2113_vm5, %v2643_v40, 0.0 }
 0xf89   : > { %2645 = vadd.xlane.f32.xlu0 %v2644_v41 }
0x1012   : > { %v2646_v51 = vpop.xlane.xlu0 %2645 }
0x1013   : > { %v2647_v56 = vmul.f32 0.015625, %v2646_v51 }
0x1015   : > { %v2648_v57 = vadd.f32 1e-05, %v2647_v56 }
0x1017   : > { %4573 = vrsqrt.f32 %v2648_v57 }
0x1024   : > { %v4574_v58 = vpop.eup %4573 }
0x1025   : > { %v2650_v60 = vmul.f32 %v4574_v58, %v2642_v38 }
0x1027   : > { %v2657_v63 = vmul.f32 %v3891_v39, %v2650_v60  ;;  %v2756_v1 = vmul.f32 %v3899_v59, %v2650_v60 }
0x1029   : > { %v2664_v2 = vadd.f32 %v3892_v61, %v2657_v63  ;;  %v2763_v3 = vadd.f32 %v3900_v62, %v2756_v1  ;;  %v4549_v63 = vld [vmem:[%s6253_s0 + $0x8] sm:$0xff]  }
0x102b   : > { %v2674_v4 = vpack.c.bf16 %v2664_v2, %v2664_v2  ;;  %v2764_v5 = vpack.c.bf16 %v2763_v3, %v2763_v3 }
0x102d   : > { %4134 = vmatmul.mubr.msk.bf16.vlgmr.msra.gmra.mxu0 %vm2113_vm5, %v2674_v4  ;;  %3909 = vmatmul.mubr.msk.bf16.vlgmr.msra.gmra.mxu1 %vm2113_vm5, %v2764_v5 }
0x102e   : > { %4139 = vmatprep.mubr.msk.bf16.mxu0 %vm5337_vm0, %v5336_v0  ;;  %4145 = vmatprep.mubr.msk.bf16.mxu1 %vm5337_vm0, %v5336_v0 }
0x10ed   : > { %v6006_v7 = vpop.f32.mrf.mxu0  ;;  %v2850_v8 = vpop.f32.mrf.mxu1 }
0x10ee   : > { %v2864_v9 = vadd.f32 %v3910_v6, %v2850_v8  ;;  %v2874_v10 = vpack.c.bf16 %v2850_v8, %v2850_v8 }
0x10ef   : > { %v4135_v11 = vpop.f32.mrf.mxu0  ;;  %v2852_v12 = vpop.f32.mrf.mxu1 }
0x10f0   : > { %2941 = vrot.lane.b32.xlu0 %v2874_v10, %s6250_s26  ;;  %2877 = vrot.lane.b32.xlu1 %v2874_v10, %s6251_s1  ;;  %v2873_v15 = vpack.c.bf16 %v2864_v9, %v2864_v9  ;;  %v2872_v22 = vadd.f32 %v3911_v18, %v2852_v12  ;;  %s6254_s1 = smov %s6253_s0  ;;  %s6256_s26 = sld [smem:[#allocation71_spill]] }
0x10f1   : > { %v2745_v13 = vpop.f32.mrf.mxu0  ;;  %v2854_v14 = vpop.f32.mrf.mxu1  ;;  %v4550_v1 = vld [vmem:[%s6254_s1] sm:$0xff]   ;;  %s6258_s0 = sld [smem:[#allocation79_spill]] }
0x10f2   : > { %v2875_v25 = vpack.c.bf16 %v2872_v22, %v2872_v22  ;;  %v3893_v14 = vld [vmem:[#allocation23] ss:$0 sm:$0xff] }
0x10f3   : > { %v4136_v16 = vpop.f32.mrf.mxu0  ;;  %v2855_v17 = vpop.f32.mrf.mxu1 }
0x10f4   : > { %2939 = vrot.lane.b32.xlu1 %v2873_v15, %s6252_s22  ;;  %v3055_v27 = vsel %vm1911_vm3, %v2875_v25, 0  ;;  %v2743_v17 = vadd.f32 %v3893_v14, %v6006_v7 }
0x10f7   : > { %s6259_s1 = smov %s6258_s0 }
0x1162   : > { %v2942_v19 = vpop.permute.xlu0 %2941  ;;  %v2878_v21 = vpop.permute.xlu1 %2877 }
0x1163   : > { %v2947_v23 = vsel %vm1645_vm2, %v2942_v19, 0  ;;  %v2883_v24 = vsel %vm1645_vm2, %v2878_v21, 0 }
0x1164   : > { %4138 = vmatpush3.bf16.xpose.msra.mxu0 %v2883_v24  ;;  %4144 = vmatpush3.bf16.xpose.msra.mxu1 %v2947_v23 }
0x1165   : > { %4155 = vmatprep.subr.bf16.mxu1 %v5336_v0  ;;  %4149 = vmatprep.subr.bf16.mxu0 %v5336_v0 }
0x1166   : > { %v2940_v26 = vpop.permute.xlu1 %2939 }
0x116b   : > { %4140 = vmatmul.mubr.msk.bf16.vlgmr.msra.gmra.mxu0 %vm1645_vm2, %v2873_v15  ;;  %4146 = vmatmul.mubr.msk.bf16.vlgmr.msra.gmra.mxu1 %vm1645_vm2, %v2940_v26  ;;  %v3916_v15 = vld [vmem:[#allocation28] ss:$0 sm:$0xff] }
0x116c   : > { %4156 = vmatpush3.bf16.msra.mxu1 %v3055_v27  ;;  %4151 = vmatprep.mubr.msk.bf16.mxu0 %vm5337_vm0, %v5336_v0 }
0x116d   : > { %4157 = vmatprep.mubr.msk.bf16.mxu1 %vm5337_vm0, %v5336_v0  ;;  %4169 = vmatprep.subr.bf16.mxu1 %v5336_v0 }
0x122b   : > { %v2919_v28 = vpop.f32.mrf.mxu0  ;;  %v2983_v29 = vpop.f32.mrf.mxu1 }
0x122c   : > { %v2925_v30 = vmul.f32 0.17677669, %v2919_v28  ;;  %v2989_v31 = vmul.f32 0.17677669, %v2983_v29  ;;  %v2625_v28 = vsub.f32 %v5973_v33, %v5937_v48 }
0x122d   : > { %v4141_v34 = vpop.f32.mrf.mxu0  ;;  %v4147_v35 = vpop.f32.mrf.mxu1 }
0x122e   : > { %v2990_v36 = vsel %vm1895_vm4, %v2989_v31, -inf  ;;  %v2926_v37 = vsel %vm1895_vm4, %v2925_v30, -inf  ;;  %v4551_v34 = vld [vmem:[#allocation29 + $0x8] sm:$0xff]   ;;  %v4552_v35 = vld [vmem:[#allocation29] sm:$0xff]  }
0x122f   : > { %2991 = vmax.xlane.f32.xlu0 %v2990_v36  ;;  %v2986_v38 = vpop.f32.mrf.mxu1  ;;  %2927 = vmax.xlane.f32.xlu1 %v2926_v37  ;;  %v2922_v40 = vpop.f32.mrf.mxu0  ;;  %v2618_v36 = vsel %vm1645_vm2, %v5967_v32, 0.0 }
0x1230   : > { %v2619_v48 = vrot.slane %v2618_v36, 4 }
0x1231   : > { %v4142_v41 = vpop.f32.mrf.mxu0  ;;  %v4148_v42 = vpop.f32.mrf.mxu1 }
0x1232   : > { %v2620_v33 = vadd.f32 %v2619_v48, %v2618_v36 }
0x1234   : > { %v2621_v38 = vrot.slane %v2620_v33, 2 }
0x12b8   : > { %v2992_v43 = vpop.xlane.xlu0 %2991  ;;  %v2928_v44 = vpop.xlane.xlu1 %2927 }
0x12b9   : > { %v2993_v45 = vsub.f32 %v2989_v31, %v2992_v43  ;;  %v2929_v46 = vsub.f32 %v2925_v30, %v2928_v44  ;;  %v2626_v30 = vmul.f32 %v2625_v28, %v2625_v28  ;;  %v2622_v43 = vadd.f32 %v2621_v38, %v2620_v33 }
0x12bb   : > { %v2994_v47 = vmul.f32 1.442695, %v2993_v45  ;;  %v2930_v20 = vmul.f32 1.442695, %v2929_v46  ;;  %v2627_v31 = vsel %vm2113_vm5, %v2626_v30, 0.0  ;;  %v2623_v46 = vrot.slane %v2622_v43, 1 }
0x12bc   : > { %v3932_v30 = vld [vmem:[#allocation35] ss:$0 sm:$0xff] }
0x12bd   : > { %4575 = vpow2.f32 %v2994_v47 }
0x12be   : > { %4577 = vpow2.f32 %v2930_v20 }
0x12ca   : > { %v4576_v49 = vpop.eup %4575 }
0x12cb   : > { %v4578_v50 = vpop.eup %4577  ;;  %v2996_v53 = vsel %vm1895_vm4, %v4576_v49, 0.0 }
0x12cc   : > { %2997 = vadd.xlane.f32.xlu1 %v2996_v53  ;;  %v2932_v54 = vsel %vm1895_vm4, %v4578_v50, 0.0 }
0x12cd   : > { %2933 = vadd.xlane.f32.xlu0 %v2932_v54 }
0x12e3   : > { %3003 = vrot.lane.b32.xlu0 %v2875_v25, %s6252_s22  ;;  %s6257_s22 = sshll.u32 %s5814_s10, 3  ;;  %s1564_s10 = sand.u32 1, %s5259_s23  }
0x12e4   : > { %s1580_s2 = scalar_lea.vmem %s6255_s6, %s6257_s22  ;;  %s3432_s3 = scalar_lea.sflag [#allocation4], %s1564_s10 }
0x1355   : > { %v2998_v55 = vpop.xlane.xlu1 %2997 }
0x1356   : > { %v2934_v51 = vpop.xlane.xlu0 %2933  ;;  %4579 = vrcp.f32 %v2998_v55 }
0x1357   : > { %4581 = vrcp.f32 %v2934_v51 }
0x135a   : > { %v3004_v56 = vpop.permute.xlu0 %3003 }
0x135b   : > { %v3009_v57 = vsel %vm1911_vm3, %v3004_v56, 0  ;;  %vm3426_vm3 = vcmask 1040384   ;;  %v3920_v56 = vld [vmem:[%s6256_s26] ss:$0 sm:$0xff]  ;;  %s3937_s26 = sshll.u32 %s5589_s28, 7  ;;  %s5342_s28 = smov [#allocation37]  }
0x135c   : > { %4150 = vmatpush3.bf16.msra.mxu0 %v3009_v57 }
0x135d   : > { %4161 = vmatprep.subr.bf16.mxu0 %v5336_v0 }
0x1363   : > { %v4580_v58 = vpop.eup %4579 }
0x1364   : > { %v4582_v39 = vpop.eup %4581  ;;  %v3000_v59 = vmul.f32 %v4580_v58, %v4576_v49  ;;  %v2624_v49 = vadd.f32 %v2623_v46, %v2622_v43 }
0x1365   : > { %v2936_v60 = vmul.f32 %v4582_v39, %v4578_v50  ;;  %v3921_v39 = vld [vmem:[#allocation22] ss:$0 sm:$0xff] }
0x1366   : > { %v3001_v61 = vpack.c.bf16 %v3000_v59, %v3000_v59  ;;  %v3423_v53 = vsel %vm1645_vm2, %v2624_v49, 0.0 }
0x1367   : > { %v2937_v62 = vpack.c.bf16 %v2936_v60, %v2936_v60 }
0x1368   : > { %4152 = vmatmul.mubr.msk.bf16.vlgmr.msra.gmra.mxu0 %vm1895_vm4, %v3001_v61  ;;  %v4553_v61 = vld [vmem:[%s6258_s0 + $0x18] sm:$0xff]  }
0x1369   : > { %4158 = vmatmul.mubr.msk.bf16.vlgmr.msra.gmra.mxu1 %vm1895_vm4, %v2937_v62  ;;  %4165 = vmatprep.mubr.msk.bf16.mxu0 %vm5337_vm0, %v5336_v0  ;;  %vm3428_vm4 = vcmask 1041408   ;;  %v4554_v62 = vld [vmem:[%s6259_s1 + $0x10] sm:$0xff]  }
0x136a   : > { %4173 = vmatprep.mubr.msk.bf16.mxu1 %vm5337_vm0, %v5336_v0  ;;  %4162 = vmatpush3.bf16.msra.mxu0 %v4549_v63  ;;  %v4555_v63 = vld [vmem:[%s6259_s1 + $0x8] sm:$0xff]  }
0x136b   : > { %4163 = vmatprep.subr.bf16.mxu0 %v5336_v0  ;;  %4170 = vmatpush3.bf16.msra.mxu1 %v4551_v34 }
0x136c   : > { %4171 = vmatprep.subr.bf16.mxu1 %v5336_v0 }
0x136e   : > { %4164 = vmatpush3.bf16.msra.mxu0 %v4550_v1  ;;  %v4556_v1 = vld [vmem:[%s6259_s1] sm:$0xff]   ;;  %s6080_s1 = scalar_lea.hbm %s5561_s5, %s3937_s26 }
0x136f   : > { %4177 = vmatprep.subr.bf16.mxu0 %v5336_v0  ;;  %4172 = vmatpush3.bf16.msra.mxu1 %v4552_v35 }
0x1370   : > { %4189 = vmatprep.subr.bf16.mxu1 %v5336_v0 }
0x1428   : > { %v3045_v2 = vpop.f32.mrf.mxu0 }
0x1429   : > { %v3091_v3 = vpop.f32.mrf.mxu1 }
0x142a   : > { %v3092_v4 = vadd.f32 %v3091_v3, %v3045_v2  ;;  %v4153_v5 = vpop.f32.mrf.mxu0  ;;  %v3922_v2 = vld [vmem:[#allocation31] ss:$0 sm:$0xff] }
0x142b   : > { %v4159_v6 = vpop.f32.mrf.mxu1 }
0x142c   : > { %v3097_v8 = vmul.f32 0.5, %v3092_v4  ;;  %v3048_v9 = vpop.f32.mrf.mxu0 }
0x142d   : > { %v3094_v10 = vpop.f32.mrf.mxu1 }
0x142e   : > { %v3103_v11 = vpack.c.bf16 %v3097_v8, %v3097_v8  ;;  %v4154_v12 = vpop.f32.mrf.mxu0 }
0x142f   : > { %v4160_v13 = vpop.f32.mrf.mxu1 }
0x1430   : > { %4166 = vmatmul.mubr.msk.bf16.vlgmr.msra.gmra.mxu0 %vm1645_vm2, %v3103_v11 }
0x1431   : > { %4185 = vmatprep.mubr.msk.bf16.mxu0 %vm5337_vm0, %v5336_v0  ;;  %4178 = vmatpush3.bf16.msra.mxu0 %v4553_v61 }
0x1432   : > { %4179 = vmatprep.subr.bf16.mxu0 %v5336_v0 }
0x1435   : > { %4180 = vmatpush3.bf16.msra.mxu0 %v4554_v62 }
0x1436   : > { %4181 = vmatprep.subr.bf16.mxu0 %v5336_v0 }
0x1439   : > { %4182 = vmatpush3.bf16.msra.mxu0 %v4555_v63 }
0x143a   : > { %4183 = vmatprep.subr.bf16.mxu0 %v5336_v0 }
0x143d   : > { %4184 = vmatpush3.bf16.msra.mxu0 %v4556_v1 }
0x14f0   : > { %v3159_v16 = vpop.f32.mrf.mxu0 }
0x14f1   : > { %v3160_v18 = vadd.f32 %v3916_v15, %v3159_v16 }
0x14f2   : > { %v4167_v19 = vpop.f32.mrf.mxu0 }
0x14f3   : > { %v6044_v21 = vadd.f32 %v3160_v18, %v2743_v17  ;;  %v4557_v19 = vld [vmem:[#allocation34 + $0x8] sm:$0xff]  }
0x14f4   : > { %v3162_v22 = vpop.f32.mrf.mxu0 }
0x14f5   : > { %v3168_v23 = vsel %vm1645_vm2, %v6044_v21, 0.0  ;;  %v4558_v22 = vld [vmem:[#allocation34] sm:$0xff]  }
0x14f6   : > { %3169 = vadd.xlane.f32.xlu1 %v3168_v23  ;;  %v4168_v24 = vpop.f32.mrf.mxu0  ;;  %v3926_v23 = vld [vmem:[#allocation32] ss:$0 sm:$0xff] }
0x157f   : > { %v3170_v25 = vpop.xlane.xlu1 %3169 }
0x1580   : > { %v3171_v26 = vmul.f32 0.03125, %v3170_v25 }
0x1582   : > { %v3172_v27 = vsub.f32 %v6044_v21, %v3171_v26 }
0x1584   : > { %v3173_v29 = vmul.f32 %v3172_v27, %v3172_v27 }
0x1586   : > { %v3174_v7 = vsel %vm1645_vm2, %v3173_v29, 0.0 }
0x1587   : > { %3175 = vadd.xlane.f32.xlu1 %v3174_v7 }
0x158b   : > { %2628 = vadd.xlane.f32.xlu1 %v2627_v31 }
0x1610   : > { %v3176_v37 = vpop.xlane.xlu1 %3175 }
0x1611   : > { %v3177_v40 = vmul.f32 0.03125, %v3176_v37 }
0x1613   : > { %v3178_v41 = vadd.f32 1e-05, %v3177_v40 }
0x1614   : > { %v2629_v42 = vpop.xlane.xlu1 %2628 }
0x1615   : > { %4583 = vrsqrt.f32 %v3178_v41  ;;  %v2630_v44 = vrot.slane %v2629_v42, 4 }
0x1617   : > { %v2631_v45 = vadd.f32 %v2630_v44, %v2629_v42 }
0x1619   : > { %v2632_v47 = vrot.slane %v2631_v45, 2 }
0x161b   : > { %v2633_v20 = vadd.f32 %v2632_v47, %v2631_v45 }
0x161d   : > { %v2634_v50 = vrot.slane %v2633_v20, 1 }
0x161f   : > { %v2635_v32 = vadd.f32 %v2634_v50, %v2633_v20 }
0x1621   : > { %v3425_v54 = vsel %vm3424_vm1, %v2635_v32, 0.0 }
0x1622   : > { %v4584_v55 = vpop.eup %4583  ;;  %v3427_v51 = vsel %vm3426_vm3, %v3423_v53, %v3425_v54 }
0x1623   : > { %v3180_v57 = vmul.f32 %v4584_v55, %v3172_v27  ;;  %v3429_v58 = vsel %vm3428_vm4, %v3427_v51, 0.0 }
0x1624   : > { %3430 = vst [vmem:[%s1580_s2] sm:$0xff] %v3429_v58  ;;  %s3838_s2 = sshll.u32 %s1564_s10, 3 }
0x1625   : > { %v3187_v52 = vmul.f32 %v3920_v56, %v3180_v57  ;;  %s1566_s22 = scalar_lea.vmem [#allocation37], %s3838_s2  ;;  %s5163_s2 = sshll.u32 %s5342_s28, 4  ;;  %s5164_s2 = int_to_ptr.vmem [resolvable:$false] %s5163_s2 }
0x1626   : > { %s3449_s0 = sshll.u32 %s1566_s22, 4  ;;  %s5165_s6 = scalar_lea.vmem %s5164_s2, 256  ;;  %s6082_s0 = int_to_ptr.vmem [resolvable:$true] %s3449_s0 }
0x1627   : > { %v3194_v59 = vadd.f32 %v3921_v39, %v3187_v52  ;;  %s5159_s4 = scalar_lea.vmem %s6082_s0, 128  ;;  %p5166_p0 = scmp.lt.s32.totalorder %s6082_s0, %s5164_s2 }
0x1628   : > { %p5160_p10 = scmp.ne.s32.totalorder %s6082_s0, %s5159_s4  ;;  %p5167_p13 = scmp.lt.s32.totalorder %s5165_s6, %s5159_s4 }
0x1629   : > { %v3200_v60 = vpack.c.bf16 %v3194_v59, %v3194_v59 }
0x162a   : > { %p5161_p8 = pnand %p5160_p10, %p6260_p7  ;;  %p5168_p1 = por %p5167_p13, %p5166_p0 }
0x162b   : > { %4174 = vmatmul.mubr.msk.bf16.vlgmr.msra.gmra.mxu1 %vm1645_vm2, %v3200_v60 }
0x162c   : > { %4193 = vmatprep.mubr.msk.bf16.mxu1 %vm5337_vm0, %v5336_v0  ;;  %4190 = vmatpush3.bf16.msra.mxu1 %v4557_v19  ;;  %p5162_p11 = pneg %p5161_p8 }
0x162d   : > { %4191 = vmatprep.subr.bf16.mxu1 %v5336_v0 }
0x162e   : > { %p5169_p2 = pnand %p5168_p1, %p5162_p11 }
0x1630   : > { %4192 = vmatpush3.bf16.msra.mxu1 %v4558_v22 }
0x16eb   : > { %v3256_v3 = vpop.f32.mrf.mxu1 }
0x16ec   : > { %v3257_v4 = vadd.f32 %v3922_v2, %v3256_v3 }
0x16ed   : > { %v4175_v5 = vpop.f32.mrf.mxu1 }
0x16ee   : > { %v3262_v6 = vmul.f32 %v3257_v4, %v3257_v4 }
0x16ef   : > { %v3259_v8 = vpop.f32.mrf.mxu1 }
0x16f0   : > { %v3263_v9 = vmul.f32 %v3262_v6, %v3257_v4 }
0x16f1   : > { %v4176_v10 = vpop.f32.mrf.mxu1 }
0x16f2   : > { %v3264_v11 = vmul.f32 0.044715, %v3263_v9 }
0x16f4   : > { %v3265_v12 = vadd.f32 %v3264_v11, %v3257_v4 }
0x16f6   : > { %v3266_v13 = vmul.f32 0.7978846, %v3265_v12 }
0x16f8   : > { %4585 = vtanh.f32 %v3266_v13 }
0x1705   : > { %v4586_v14 = vpop.eup %4585 }
0x1706   : > { %v3268_v15 = vadd.f32 1.0, %v4586_v14 }
0x1708   : > { %v3269_v16 = vmul.f32 0.5, %v3268_v15 }
0x170a   : > { %v3270_v17 = vmul.f32 %v3269_v16, %v3257_v4 }
0x170c   : > { %v3280_v18 = vpack.c.bf16 %v3270_v17, %v3270_v17 }
0x170e   : > { %4186 = vmatmul.mubr.msk.bf16.vlgmr.msra.gmra.mxu0 %vm2113_vm5, %v3280_v18 }
0x17ce   : > { %v3348_v24 = vpop.f32.mrf.mxu0 }
0x17cf   : > { %v3349_v25 = vadd.f32 %v3926_v23, %v3348_v24 }
0x17d0   : > { %v4187_v26 = vpop.f32.mrf.mxu0 }
0x17d1   : > { %v3354_v27 = vadd.f32 %v3349_v25, %v6044_v21 }
0x17d2   : > { %v3351_v28 = vpop.f32.mrf.mxu0 }
0x17d3   : > { %v3360_v29 = vpack.c.bf16 %v3354_v27, %v3354_v27 }
0x17d4   : > { %v4188_v7 = vpop.f32.mrf.mxu0 }
0x17d5   : > { %4194 = vmatmul.mubr.msk.bf16.vlgmr.msra.gmra.mxu1 %vm1645_vm2, %v3360_v29 }
0x1895   : > { %v3416_v0 = vpop.f32.mrf.mxu1 }
0x1896   : > { %v3417_v31 = vadd.f32 %v3932_v30, %v3416_v0 }
0x1897   : > { %v4195_v21 = vpop.f32.mrf.mxu1 }
0x1898   : > { %3422 = vst [vmem:[%s1566_s22] sm:$0xff] %v3417_v31 }
0x1899   : > { %v3419_v34 = vpop.f32.mrf.mxu1 }
0x189a   : > { %5172 = shalt.err (!%p5169_p2)
}
0x189b   : > { %s5173_s10 = scalar_lea.hbm %s6080_s1, 128  ;;  %s5177_s26 = scalar_lea.hbm %s5561_s5, 256 }
0x189c   : > { %p5174_p12 = scmp.ne.s32.totalorder %s6080_s1, %s5173_s10  ;;  %p5178_p4 = scmp.lt.s32.totalorder %s6080_s1, %s5561_s5 }
0x189d   : > { %p5179_p5 = scmp.lt.s32.totalorder %s5177_s26, %s5173_s10 }
0x189e   : > { %p5175_p3 = pnand %p5174_p12, %p6260_p7 }
0x189f   : > { %p5180_p6 = por %p5179_p5, %p5178_p4 }
0x18a0   : > { %p5176_p9 = pneg %p5175_p3 }
0x18a2   : > { %p5181_p10 = pnand %p5180_p6, %p5176_p9 }
0x18a4   : > { %5184 = shalt.err (!%p5181_p10)
}
0x18a5   : > { %4285 = dma.vmem_to_hbm [thread:$0]  (%p6260_p7), %s6082_s0, 128, %s6080_s1, %s3432_s3   ;;  %v4196_v35 = vpop.f32.mrf.mxu1 }
0x18a6 PF: > { %s6261_s6 = sld [smem:[#allocation84_spill]] }
0x18a7   : > { %s6262_s4 = sld [smem:[#allocation82_spill]] }
0x18a8   : > { %s6263_s22 = sld [smem:[#allocation87_spill]] }
0x18ac   : > { %p4402_p8 = scmp.ge.s32.totalorder %s6261_s6, 2 }
0x18ad   : > { %s3464_s28 = sand.u32 1, %s6262_s4  }
0x18ae   : > { %p6264_p11 = scmp.ne.s32.totalorder %s6263_s22, 0  ;;  %s3465_s2 = scalar_lea.sflag [#allocation4], %s3464_s28 }
0x18b0   : > { %p4355_p0 = pnand %p4402_p8, %p6264_p11 }
0x18b2   : > { %p4356_p13 = pneg %p4355_p0 }
0x18b4   : > { %5250 = dma.done.wait (%p4356_p13), %s3465_s2, 128  }
0x18b5   : > { %5252 = vsyncadd (%p4356_p13), %s3465_s2, 4294967168  ;;  %s6265_s26 = sld [smem:[#allocation85_spill]]  ;;  %s6268_s22 = smov %s5259_s23 }
0x18b6   : > { %s6266_s10 = sld [smem:[#allocation83_spill]] }
0x18b7   : > { %s6267_s0 = sld [smem:[#allocation86_spill]] }
0x18bb   : > { %p110_p1 = scmp.ge.s32.totalorder %s6265_s26, 4  }
0x18bc   : > { %s6269_s23 = smov %s6266_s10 }
0x18bd   :  { %112 = sbr.rel (!%p110_p1) target bundleno = 95 (0x5f), region = 367 }
0x18c2   :  { %3477 = vsyncpa [#allocation3], 1 }
0x18c3   :  { %3479 = vsyncpa [#allocation3 + $0x1], 1 }
0x18c4   :  { %3480 = vsyncpa [#allocation6], 1 }
0x18c5   :  { %3481 = vsyncpa [#allocation9], 1 }
0x18c6   :  { %3482 = vsyncpa [#allocation12], 1 }
0x18c7   :  { %3483 = vsyncpa [#allocation15], 1 }
0x18c8   :  { %3484 = vsyncpa [#allocation18], 1 }
0x18c9   :  { %3485 = vsyncpa [#allocation21], 1 }
0x18ca   :  { %3486 = vsyncpa [#allocation24], 1 }
0x18cb   :  { %3487 = vsyncpa [#allocation27], 1 }
0x18cc   :  { %3488 = vsyncpa [#allocation30], 1 }
0x18cd   :  { %3489 = vsyncpa [#allocation33], 1 }
0x18ce   :  { %3490 = vsyncpa [#allocation36], 1 }
0x18cf   :  { %3491 = vsyncpa [#allocation4], 1 }
0x18d0   :  { %3493 = vsyncpa [#allocation4 + $0x1], 1 }

</bundles_post_ra>
